<compile_context>
chip_gen: v6e
topology: v6e:2x2x1
jax: 0.10.0
libtpu: 0.0.40
codegen_flags: <defaults>
</compile_context>

<pallas_src>
import jax
import jax.numpy as jnp
from jax.experimental import pallas as pl
from jax.experimental.pallas import tpu as pltpu


def _elu(x):
    # exp(x) - 1.0 (not expm1) to stay on ops guaranteed to lower in Mosaic;
    # precision difference near 0 is negligible for this module.
    return jnp.where(x > 0, x, jnp.exp(x) - 1.0)


def attn_fusioner_kernel(x_ref, wq_ref, wk_ref, out_ref):
    # x_ref:   (I, TN, D)   activations (input dtype, e.g. f32 or bf16)
    # wq_ref:  (I, D, H)    pre-folded  Wq^T @ w_att[:H], split per input i
    # wk_ref:  (D, H)       pre-folded  Wk^T @ w_att[H:]
    # out_ref: (TN, I*D)
    I, TN, D = x_ref.shape
    H = wk_ref.shape[-1]

    x = x_ref[...]                                   # keep stored dtype for MXU

    # q-term: K-split accumulation (no lane-axis concat of the inputs).
    #   qw = sum_i x[i] @ wq_fold[i]                 -> (TN, H), f32
    # NOTE: Python unroll is fine for small I (=2); for I >~ 8 switch to
    # lax.fori_loop(..., unroll=True) to bound vreg pressure.
    qw = jnp.dot(x[0], wq_ref[0], preferred_element_type=jnp.float32)
    for i in range(1, I):
        qw = qw + jnp.dot(x[i], wq_ref[i], preferred_element_type=jnp.float32)

    # k-term: one batched matmul over the merged (I*TN) leading dim
    # (leading-dim reshape only; last dim unchanged -> no relayout).
    kbot = jnp.dot(x.reshape(I * TN, D), wk_ref[...],
                   preferred_element_type=jnp.float32).reshape(I, TN, H)

    # e_i = elu(qw + kbot_i)    (dropout omitted: eval mode)
    e = _elu(qw[None, :, :] + kbot)                  # (I, TN, H)

    # softmax over the input_num axis
    m = jnp.max(e, axis=0, keepdims=True)
    ex = jnp.exp(e - m)
    denom = jnp.sum(ex, axis=0, keepdims=True)       # in [1, I]
    attn = ex * pl.reciprocal(denom, approx=True)    # EUP vrcp slot

    # out[:, i*D:(i+1)*D] = x_i * attn_i
    xf = x.astype(jnp.float32)
    if D % 128 == 0:
        # lane-aligned direct stores, no concat/relayout
        for i in range(I):
            out_ref[:, i * D:(i + 1) * D] = (xf[i] * attn[i]).astype(out_ref.dtype)
    else:
        # D not a multiple of 128 (e.g. 64): a single concat yields one
        # lane-dense (TN, I*D) store instead of I masked partial stores.
        out_ref[...] = jnp.concatenate(
            [xf[i] * attn[i] for i in range(I)], axis=-1).astype(out_ref.dtype)


def _pick_tile_n(N, cap=2048):
    """Largest multiple-of-8 divisor of N not exceeding `cap` (else N).

    cap=2048 keeps the double-buffered x/out tiles at ~4 MiB for I=2, D=64,
    comfortably inside every generation's scoped VMEM (incl. v7x's 64 MiB)."""
    if N <= cap:
        return N
    t = cap - (cap % 8)
    while t >= 8:
        if N % t == 0:
            return t
        t -= 8
    return N


def attn_fusioner(x, wq_t, wk_t, w_att, *, tile_n=None):
    """x: [I, N, D]; wq_t: [I*D, H]; wk_t: [D, H]; w_att: [2H, H] -> [N, I*D]."""
    I, N, D = x.shape
    H = wq_t.shape[1]
    assert wq_t.shape == (I * D, H)
    assert wk_t.shape == (D, H)
    assert w_att.shape == (2 * H, H)
    assert D == H, "elementwise mul of inputs with attention requires in_size == hidden"

    # --- weight fold, done once outside the kernel on tiny [D,H] matrices ---
    w_top = w_att[:H].astype(jnp.float32)
    w_bot = w_att[H:].astype(jnp.float32)
    wq_fold = (wq_t.astype(jnp.float32) @ w_top).reshape(I, D, H).astype(x.dtype)
    wk_fold = (wk_t.astype(jnp.float32) @ w_bot).astype(x.dtype)

    # --- N-tiling: multi-step grid => pipelined DMA + megacore sharding -----
    tn = _pick_tile_n(N) if tile_n is None else tile_n
    assert N % tn == 0, "tile_n must divide N"
    assert tn % 8 == 0 or tn == N, "tile_n must be a multiple of 8 (sublane)"

    grid = (N // tn,)
    return pl.pallas_call(
        attn_fusioner_kernel,
        out_shape=jax.ShapeDtypeStruct((N, I * D), jnp.float32),
        grid_spec=pltpu.PrefetchScalarGridSpec(
            num_scalar_prefetch=0,
            grid=grid,
            in_specs=[
                pl.BlockSpec((I, tn, D), lambda n: (0, n, 0)),
                pl.BlockSpec((I, D, H), lambda n: (0, 0, 0)),
                pl.BlockSpec((D, H), lambda n: (0, 0)),
            ],
            out_specs=pl.BlockSpec((tn, I * D), lambda n: (n, 0)),
        ),
        compiler_params=pltpu.CompilerParams(
            dimension_semantics=("parallel",),
        ),
    )(x, wq_fold, wk_fold)


def attn_fusioner_reference(x, wq_t, wk_t, w_att):
    """Pure-JAX reference mirroring the PyTorch forward (eval mode), no folding."""
    I, N, D = x.shape
    H = wq_t.shape[1]
    x_cat = jnp.concatenate([x[i] for i in range(I)], axis=-1)        # [N, I*D]
    q = x_cat @ wq_t                                                  # [N, H]
    q_rep = jnp.concatenate([q] * I, axis=0)                          # [I*N, H]
    k = jnp.concatenate([x[i] @ wk_t for i in range(I)], axis=0)      # [I*N, H]
    attn_in = jnp.concatenate([q_rep, k], axis=1)                     # [I*N, 2H]
    e = attn_in @ w_att
    e = jnp.where(e > 0, e, jnp.exp(e) - 1.0)                         # elu
    e = e.reshape(I, N, H).transpose(1, 0, 2)                         # [N, I, H]
    attn = jax.nn.softmax(e, axis=1)                                  # softmax over I
    stacked = x.transpose(1, 0, 2)                                    # [N, I, D]
    out = stacked * attn                                              # [N, I, D]
    return jnp.concatenate([out[:, i, :] for i in range(I)], axis=-1)  # [N, I*D]


if __name__ == "__main__":
    input_num = 2
    in_size = 64      # must equal hidden (see module semantics)
    hidden = 64
    N = 1024          # small, but enough rows for a multi-step grid
    tile_n = 256      # grid = (4,): exercises pipelining / both v7x cores

    key = jax.random.PRNGKey(0)
    k_x, k_wq, k_wk, k_wa = jax.random.split(key, 4)

    # deterministic "parameter" init (synthetic, not a checkpoint load)
    x = jax.random.normal(k_x, (input_num, N, in_size), dtype=jnp.float32)
    # encoder_q: Linear(in_size*input_num -> hidden), stored pre-transposed
    wq_t = jax.random.uniform(k_wq, (in_size * input_num, hidden),
                              dtype=jnp.float32, minval=-0.1, maxval=0.1)
    # encoder_k: Linear(in_size -> hidden), stored pre-transposed
    wk_t = jax.random.uniform(k_wk, (in_size, hidden),
                              dtype=jnp.float32, minval=-0.1, maxval=0.1)
    # w_att: [2*hidden, hidden], xavier-ish uniform
    w_att = jax.random.uniform(k_wa, (2 * hidden, hidden),
                               dtype=jnp.float32, minval=-0.15, maxval=0.15)

    out = attn_fusioner(x, wq_t, wk_t, w_att, tile_n=tile_n)
    out = jax.block_until_ready(out)

    ref = attn_fusioner_reference(x, wq_t, wk_t, w_att)
    assert out.shape == (N, input_num * in_size)
    # Tolerance covers the weight-fold reassociation and the approximate
    # (EUP) reciprocal in the softmax; observed differences are far smaller.
    assert jnp.allclose(out, ref, atol=2e-3, rtol=2e-3), (
        "mismatch vs JAX reference; max abs diff = %g"
        % float(jnp.max(jnp.abs(out - ref))))

    print("KERNEL_OK")
</pallas_src>

<mosaic_0001>
module attributes {stable_mosaic.version = 11 : i64} {
  func.func @attn_fusioner_kernel(%arg0: i32, %arg1: memref<2x256x64xf32, #tpu.memory_space<vmem>>, %arg2: memref<2x64x64xf32, #tpu.memory_space<vmem>>, %arg3: memref<64x64xf32, #tpu.memory_space<vmem>>, %arg4: memref<256x128xf32, #tpu.memory_space<vmem>>) attributes {dimension_semantics = [#tpu.dimension_semantics<parallel>], iteration_bounds = array<i64: 4>, scalar_prefetch = 0 : i64, scratch_operands = 0 : i64, tpu.core_type = #tpu.core_type<tc>, window_params = [{transform_indices = @transform_0, window_bounds = array<i64: 2, 256, 64>}, {pipeline_mode = #tpu.pipeline_mode<synchronous>, transform_indices = @transform_1, window_bounds = array<i64: 2, 64, 64>}, {pipeline_mode = #tpu.pipeline_mode<synchronous>, transform_indices = @transform_2, window_bounds = array<i64: 64, 64>}, {transform_indices = @transform_3, window_bounds = array<i64: 256, 128>}]} {
    %c0 = arith.constant 0 : index
    %c0_0 = arith.constant 0 : index
    %c0_1 = arith.constant 0 : index
    %0 = vector.load %arg1[%c0, %c0_0, %c0_1] : memref<2x256x64xf32, #tpu.memory_space<vmem>>, vector<2x256x64xf32>
    %1 = vector.extract_strided_slice %0 {offsets = [0, 0, 0], sizes = [1, 256, 64], strides = [1, 1, 1]} : vector<2x256x64xf32> to vector<1x256x64xf32>
    %2 = vector.shape_cast %1 : vector<1x256x64xf32> to vector<256x64xf32>
    %c0_2 = arith.constant 0 : index
    %c0_3 = arith.constant 0 : index
    %c0_4 = arith.constant 0 : index
    %3 = vector.load %arg2[%c0_2, %c0_3, %c0_4] : memref<2x64x64xf32, #tpu.memory_space<vmem>>, vector<1x64x64xf32>
    %4 = vector.shape_cast %3 : vector<1x64x64xf32> to vector<64x64xf32>
    %cst = arith.constant dense<0.000000e+00> : vector<256x64xf32>
    %5 = tpu.matmul %2, %4, %cst {dimension_numbers = #tpu.dot_dimension_numbers<[1], [0], [0], [1], [0, 0, 1, 1], [], []>} : vector<256x64xf32>, vector<64x64xf32>, vector<256x64xf32> -> vector<256x64xf32>
    %6 = vector.extract_strided_slice %0 {offsets = [1, 0, 0], sizes = [1, 256, 64], strides = [1, 1, 1]} : vector<2x256x64xf32> to vector<1x256x64xf32>
    %7 = vector.shape_cast %6 : vector<1x256x64xf32> to vector<256x64xf32>
    %c1 = arith.constant 1 : index
    %c0_5 = arith.constant 0 : index
    %c0_6 = arith.constant 0 : index
    %8 = vector.load %arg2[%c1, %c0_5, %c0_6] : memref<2x64x64xf32, #tpu.memory_space<vmem>>, vector<1x64x64xf32>
    %9 = vector.shape_cast %8 : vector<1x64x64xf32> to vector<64x64xf32>
    %cst_7 = arith.constant dense<0.000000e+00> : vector<256x64xf32>
    %10 = tpu.matmul %7, %9, %cst_7 {dimension_numbers = #tpu.dot_dimension_numbers<[1], [0], [0], [1], [0, 0, 1, 1], [], []>} : vector<256x64xf32>, vector<64x64xf32>, vector<256x64xf32> -> vector<256x64xf32>
    %11 = arith.addf %5, %10 : vector<256x64xf32>
    %12 = vector.shape_cast %0 : vector<2x256x64xf32> to vector<512x64xf32>
    %c0_8 = arith.constant 0 : index
    %c0_9 = arith.constant 0 : index
    %13 = vector.load %arg3[%c0_8, %c0_9] : memref<64x64xf32, #tpu.memory_space<vmem>>, vector<64x64xf32>
    %cst_10 = arith.constant dense<0.000000e+00> : vector<512x64xf32>
    %14 = tpu.matmul %12, %13, %cst_10 {dimension_numbers = #tpu.dot_dimension_numbers<[1], [0], [0], [1], [0, 0, 1, 1], [], []>} : vector<512x64xf32>, vector<64x64xf32>, vector<512x64xf32> -> vector<512x64xf32>
    %15 = vector.shape_cast %14 : vector<512x64xf32> to vector<2x256x64xf32>
    %16 = vector.shape_cast %11 : vector<256x64xf32> to vector<1x256x64xf32>
    %17 = vector.broadcast %16 : vector<1x256x64xf32> to vector<2x256x64xf32>
    %18 = arith.addf %17, %15 : vector<2x256x64xf32>
    %cst_11 = arith.constant 0.000000e+00 : f32
    %19 = vector.broadcast %cst_11 : f32 to vector<2x256x64xf32>
    %20 = arith.cmpf ogt, %18, %19 : vector<2x256x64xf32>
    %21 = math.exp %18 : vector<2x256x64xf32>
    %cst_12 = arith.constant 1.000000e+00 : f32
    %22 = vector.broadcast %cst_12 : f32 to vector<2x256x64xf32>
    %23 = arith.subf %21, %22 : vector<2x256x64xf32>
    %24 = arith.select %20, %18, %23 : vector<2x256x64xi1>, vector<2x256x64xf32>
    %cst_13 = arith.constant dense<0xFF800000> : vector<256x64xf32>
    %25 = vector.multi_reduction <maximumf>, %24, %cst_13 [0] : vector<2x256x64xf32> to vector<256x64xf32>
    %26 = vector.shape_cast %25 : vector<256x64xf32> to vector<1x256x64xf32>
    %27 = vector.broadcast %26 : vector<1x256x64xf32> to vector<2x256x64xf32>
    %28 = arith.subf %24, %27 : vector<2x256x64xf32>
    %29 = math.exp %28 : vector<2x256x64xf32>
    %cst_14 = arith.constant dense<0.000000e+00> : vector<256x64xf32>
    %30 = vector.multi_reduction <add>, %29, %cst_14 [0] : vector<2x256x64xf32> to vector<256x64xf32>
    %31 = vector.shape_cast %30 : vector<256x64xf32> to vector<1x256x64xf32>
    %32 = tpu.reciprocal %31 {approx = true} : vector<1x256x64xf32> -> vector<1x256x64xf32>
    %33 = vector.broadcast %32 : vector<1x256x64xf32> to vector<2x256x64xf32>
    %34 = arith.mulf %29, %33 : vector<2x256x64xf32>
    %35 = vector.extract_strided_slice %0 {offsets = [0, 0, 0], sizes = [1, 256, 64], strides = [1, 1, 1]} : vector<2x256x64xf32> to vector<1x256x64xf32>
    %36 = vector.shape_cast %35 : vector<1x256x64xf32> to vector<256x64xf32>
    %37 = vector.extract_strided_slice %34 {offsets = [0, 0, 0], sizes = [1, 256, 64], strides = [1, 1, 1]} : vector<2x256x64xf32> to vector<1x256x64xf32>
    %38 = vector.shape_cast %37 : vector<1x256x64xf32> to vector<256x64xf32>
    %39 = arith.mulf %36, %38 : vector<256x64xf32>
    %40 = vector.extract_strided_slice %0 {offsets = [1, 0, 0], sizes = [1, 256, 64], strides = [1, 1, 1]} : vector<2x256x64xf32> to vector<1x256x64xf32>
    %41 = vector.shape_cast %40 : vector<1x256x64xf32> to vector<256x64xf32>
    %42 = vector.extract_strided_slice %34 {offsets = [1, 0, 0], sizes = [1, 256, 64], strides = [1, 1, 1]} : vector<2x256x64xf32> to vector<1x256x64xf32>
    %43 = vector.shape_cast %42 : vector<1x256x64xf32> to vector<256x64xf32>
    %44 = arith.mulf %41, %43 : vector<256x64xf32>
    %45 = tpu.concatenate %39, %44 in 1 : vector<256x64xf32>, vector<256x64xf32> -> vector<256x128xf32>
    %c0_15 = arith.constant 0 : index
    %c0_16 = arith.constant 0 : index
    %46 = vector.load %arg4[%c0_15, %c0_16] : memref<256x128xf32, #tpu.memory_space<vmem>>, vector<256x128xf32>
    tpu.vector_store %arg4[%c0_15, %c0_16], %45 {strides = array<i32>} : memref<256x128xf32, #tpu.memory_space<vmem>>, vector<256x128xf32>,
    return
  }
  func.func @transform_0(%arg0: i32) -> (i32, i32, i32) {
    %c0_i32 = arith.constant 0 : i32
    %c0_i32_0 = arith.constant 0 : i32
    %c0_i32_1 = arith.constant 0 : i32
    return %c0_i32, %arg0, %c0_i32_0 : i32, i32, i32
  }
  func.func @transform_1(%arg0: i32) -> (i32, i32, i32) {
    %c0_i32 = arith.constant 0 : i32
    %c0_i32_0 = arith.constant 0 : i32
    %c0_i32_1 = arith.constant 0 : i32
    %c0_i32_2 = arith.constant 0 : i32
    return %c0_i32, %c0_i32_0, %c0_i32_1 : i32, i32, i32
  }
  func.func @transform_2(%arg0: i32) -> (i32, i32) {
    %c0_i32 = arith.constant 0 : i32
    %c0_i32_0 = arith.constant 0 : i32
    %c0_i32_1 = arith.constant 0 : i32
    return %c0_i32, %c0_i32_0 : i32, i32
  }
  func.func @transform_3(%arg0: i32) -> (i32, i32) {
    %c0_i32 = arith.constant 0 : i32
    %c0_i32_0 = arith.constant 0 : i32
    return %arg0, %c0_i32 : i32, i32
  }
}

</mosaic_0001>

<bundles_post_ra>
// kernel: tpu_custom_call.1
= control target key start
LH: loop header
LB: loop body
LE: loop exit
PB: predicated region body
PF: predicated region fallthrough
CT: control target
= control target key end

     0   :  { %8 = vsyncpa [#allocation4], 0  ;;  %s6200_s0 = inlined_call_operand.vmem [shape: f32[2,1024,64], index: 0, kind: input, shape index: {}]   ;;  %s6201_s1 = inlined_call_operand.vmem [shape: f32[2,64,64], index: 1, kind: input, shape index: {}]   ;;  %s6202_s2 = inlined_call_operand.vmem [shape: f32[64,64], index: 2, kind: input, shape index: {}]   ;;  %s6203_s3 = inlined_call_operand.hbm [shape: f32[1024,128], index: 3, kind: output, shape index: {}]  }
   0x1   :  { %10 = vsyncpa [#allocation4 + $0x1], 0  ;;  %s3898_s12 = smov 0   ;;  %s3900_s13 = smov 0  }
   0x2   :  { %s3902_s14 = smov 0   ;;  %s3904_s15 = smov 0  }
   0x3 LB: > { %s2777_s16 = sadd.s32 4294967295, %s3872_s15   ;;  %s2778_s17 = sadd.s32 4294967294, %s3872_s15   ;;  %s3872_s15 = sphi %s3904_s15, %s6398_s15   ;;  %s3868_s14 = sphi %s3902_s14, %s6397_s14   ;;  %s3864_s13 = sphi %s3900_s13, %s6396_s13   ;;  %s3860_s12 = sphi %s3898_s12, %s6395_s12  }
   0x4   : > { %s3921_s18 = sadd.s32 1, %s3872_s15   ;;  %s23_s19 = sadd.s32 1, %s3868_s14 }
   0x5   : > { %s20_s20 = ssub.s32 %s3872_s15, %s3921_s18  ;;  %p30_p0 = scmp.ne.s32.totalorder %s3868_s14, %s3864_s13 }
   0x6   : > { %p21_p1 = scmp.eq.s32.totalorder %s20_s20, 0  ;;  %p31_p2 = scmp.eq.s32.totalorder %s3872_s15, 0 }
   0x7   : > { %p102_p3 = scmp.eq.s32.totalorder %s2777_s16, 3  ;;  %p107_p4 = scmp.ne.s32.totalorder %s3864_s13, %s3860_s12 }
   0x8   : > { %s3934_s21 = scalar_select %p21_p1, %s3868_s14, %s23_s19  }
   0x9   : > { %p32_p5 = por %p31_p2, %p30_p0  ;;  %p3936_p6 = por %p102_p3, %p30_p0 }
   0xa   : > { %p108_p7 = scmp.eq.s32.totalorder %s2778_s17, 3  ;;  %p2780_p9 = scmp.ge.s32.totalorder %s3872_s15, 4 }
   0xc   : > { %p3940_p8 = por %p108_p7, %p107_p4  ;;  %130 = sbr.rel (%p2780_p9) target bundleno = 53 (0x35), region = 24 }
  0x11   : > { %133 = sbr.rel (!%p32_p5) target bundleno = 53 (0x35), region = 28  ;;  %s135_s24 = sand.u32 (%p32_p5), 1, %s3868_s14  }
  0x12   : > { %s2992_s25 = sshll.u32 (%p32_p5), %s3872_s15, 8  ;;  %s2781_s26 = sshll.u32 (%p32_p5), %s135_s24, 9 }
  0x13   : > { %s3950_s29 = scalar_lea.vmem (%p32_p5), %s6200_s0, %s2992_s25  ;;  %s3955_s30 = scalar_lea.vmem (%p32_p5), [#allocation2], %s2781_s26 }
  0x14   : > { %v295_v0 = vld [vmem:[%s3950_s29] sm:$0xff] (%p32_p5)  ;;  %v297_v1 = vld [vmem:[%s3950_s29 + $0x8] sm:$0xff] (%p32_p5)  ;;  %v299_v2 = vld [vmem:[%s3950_s29 + $0x10] sm:$0xff] (%p32_p5) }
  0x15   : > { %296 = vst [vmem:[%s3955_s30] sm:$0xff] (%p32_p5), %v295_v0  ;;  %298 = vst [vmem:[%s3955_s30 + $0x8] sm:$0xff] (%p32_p5), %v297_v1  ;;  %v301_v3 = vld [vmem:[%s3950_s29 + $0x18] sm:$0xff] (%p32_p5)  ;;  %v303_v4 = vld [vmem:[%s3950_s29 + $0x20] sm:$0xff] (%p32_p5) }
  0x16   : > { %300 = vst [vmem:[%s3955_s30 + $0x10] sm:$0xff] %v299_v2  ;;  %v305_v5 = vld [vmem:[%s3950_s29 + $0x28] sm:$0xff]  ;;  %302 = vst [vmem:[%s3955_s30 + $0x18] sm:$0xff] %v301_v3  ;;  %v307_v6 = vld [vmem:[%s3950_s29 + $0x30] sm:$0xff] }
  0x17   : > { %304 = vst [vmem:[%s3955_s30 + $0x20] sm:$0xff] %v303_v4  ;;  %306 = vst [vmem:[%s3955_s30 + $0x28] sm:$0xff] %v305_v5  ;;  %v309_v7 = vld [vmem:[%s3950_s29 + $0x38] sm:$0xff]  ;;  %v311_v8 = vld [vmem:[%s3950_s29 + $0x40] sm:$0xff] }
  0x18   : > { %308 = vst [vmem:[%s3955_s30 + $0x30] sm:$0xff] %v307_v6  ;;  %310 = vst [vmem:[%s3955_s30 + $0x38] sm:$0xff] %v309_v7  ;;  %v313_v9 = vld [vmem:[%s3950_s29 + $0x48] sm:$0xff]  ;;  %v315_v10 = vld [vmem:[%s3950_s29 + $0x50] sm:$0xff] }
  0x19   : > { %312 = vst [vmem:[%s3955_s30 + $0x40] sm:$0xff] %v311_v8  ;;  %v317_v11 = vld [vmem:[%s3950_s29 + $0x58] sm:$0xff]  ;;  %314 = vst [vmem:[%s3955_s30 + $0x48] sm:$0xff] %v313_v9  ;;  %v319_v12 = vld [vmem:[%s3950_s29 + $0x60] sm:$0xff] }
  0x1a   : > { %316 = vst [vmem:[%s3955_s30 + $0x50] sm:$0xff] %v315_v10  ;;  %318 = vst [vmem:[%s3955_s30 + $0x58] sm:$0xff] %v317_v11  ;;  %v321_v13 = vld [vmem:[%s3950_s29 + $0x68] sm:$0xff]  ;;  %v323_v14 = vld [vmem:[%s3950_s29 + $0x70] sm:$0xff] }
  0x1b   : > { %320 = vst [vmem:[%s3955_s30 + $0x60] sm:$0xff] %v319_v12  ;;  %322 = vst [vmem:[%s3955_s30 + $0x68] sm:$0xff] %v321_v13  ;;  %v325_v15 = vld [vmem:[%s3950_s29 + $0x78] sm:$0xff]  ;;  %v327_v16 = vld [vmem:[%s3950_s29 + $0x80] sm:$0xff] }
  0x1c   : > { %324 = vst [vmem:[%s3955_s30 + $0x70] sm:$0xff] %v323_v14  ;;  %v329_v17 = vld [vmem:[%s3950_s29 + $0x88] sm:$0xff]  ;;  %326 = vst [vmem:[%s3955_s30 + $0x78] sm:$0xff] %v325_v15  ;;  %v331_v18 = vld [vmem:[%s3950_s29 + $0x90] sm:$0xff] }
  0x1d   : > { %328 = vst [vmem:[%s3955_s30 + $0x80] sm:$0xff] %v327_v16  ;;  %330 = vst [vmem:[%s3955_s30 + $0x88] sm:$0xff] %v329_v17  ;;  %v333_v19 = vld [vmem:[%s3950_s29 + $0x98] sm:$0xff]  ;;  %v335_v20 = vld [vmem:[%s3950_s29 + $0xa0] sm:$0xff] }
  0x1e   : > { %332 = vst [vmem:[%s3955_s30 + $0x90] sm:$0xff] %v331_v18  ;;  %334 = vst [vmem:[%s3955_s30 + $0x98] sm:$0xff] %v333_v19  ;;  %v337_v21 = vld [vmem:[%s3950_s29 + $0xa8] sm:$0xff]  ;;  %v339_v22 = vld [vmem:[%s3950_s29 + $0xb0] sm:$0xff] }
  0x1f   : > { %336 = vst [vmem:[%s3955_s30 + $0xa0] sm:$0xff] %v335_v20  ;;  %v341_v23 = vld [vmem:[%s3950_s29 + $0xb8] sm:$0xff]  ;;  %338 = vst [vmem:[%s3955_s30 + $0xa8] sm:$0xff] %v337_v21  ;;  %v343_v24 = vld [vmem:[%s3950_s29 + $0xc0] sm:$0xff] }
  0x20   : > { %340 = vst [vmem:[%s3955_s30 + $0xb0] sm:$0xff] %v339_v22  ;;  %342 = vst [vmem:[%s3955_s30 + $0xb8] sm:$0xff] %v341_v23  ;;  %v345_v25 = vld [vmem:[%s3950_s29 + $0xc8] sm:$0xff]  ;;  %v347_v26 = vld [vmem:[%s3950_s29 + $0xd0] sm:$0xff] }
  0x21   : > { %344 = vst [vmem:[%s3955_s30 + $0xc0] sm:$0xff] %v343_v24  ;;  %346 = vst [vmem:[%s3955_s30 + $0xc8] sm:$0xff] %v345_v25  ;;  %v349_v27 = vld [vmem:[%s3950_s29 + $0xd8] sm:$0xff]  ;;  %v351_v28 = vld [vmem:[%s3950_s29 + $0xe0] sm:$0xff] }
  0x22   : > { %348 = vst [vmem:[%s3955_s30 + $0xd0] sm:$0xff] %v347_v26  ;;  %v353_v29 = vld [vmem:[%s3950_s29 + $0xe8] sm:$0xff]  ;;  %350 = vst [vmem:[%s3955_s30 + $0xd8] sm:$0xff] %v349_v27  ;;  %v355_v30 = vld [vmem:[%s3950_s29 + $0xf0] sm:$0xff] }
  0x23   : > { %352 = vst [vmem:[%s3955_s30 + $0xe0] sm:$0xff] %v351_v28  ;;  %354 = vst [vmem:[%s3955_s30 + $0xe8] sm:$0xff] %v353_v29  ;;  %v357_v31 = vld [vmem:[%s3950_s29 + $0xf8] sm:$0xff]  ;;  %v359_v32 = vld [vmem:[%s3950_s29 + $0x400] sm:$0xff] }
  0x24   : > { %356 = vst [vmem:[%s3955_s30 + $0xf0] sm:$0xff] %v355_v30  ;;  %358 = vst [vmem:[%s3955_s30 + $0xf8] sm:$0xff] %v357_v31  ;;  %v361_v33 = vld [vmem:[%s3950_s29 + $0x408] sm:$0xff]  ;;  %v363_v34 = vld [vmem:[%s3950_s29 + $0x410] sm:$0xff] }
  0x25   : > { %360 = vst [vmem:[%s3955_s30 + $0x100] sm:$0xff] %v359_v32  ;;  %v365_v35 = vld [vmem:[%s3950_s29 + $0x418] sm:$0xff]  ;;  %362 = vst [vmem:[%s3955_s30 + $0x108] sm:$0xff] %v361_v33  ;;  %v367_v36 = vld [vmem:[%s3950_s29 + $0x420] sm:$0xff] }
  0x26   : > { %364 = vst [vmem:[%s3955_s30 + $0x110] sm:$0xff] %v363_v34  ;;  %366 = vst [vmem:[%s3955_s30 + $0x118] sm:$0xff] %v365_v35  ;;  %v369_v37 = vld [vmem:[%s3950_s29 + $0x428] sm:$0xff]  ;;  %v371_v38 = vld [vmem:[%s3950_s29 + $0x430] sm:$0xff] }
  0x27   : > { %368 = vst [vmem:[%s3955_s30 + $0x120] sm:$0xff] %v367_v36  ;;  %370 = vst [vmem:[%s3955_s30 + $0x128] sm:$0xff] %v369_v37  ;;  %v373_v39 = vld [vmem:[%s3950_s29 + $0x438] sm:$0xff]  ;;  %v375_v40 = vld [vmem:[%s3950_s29 + $0x440] sm:$0xff] }
  0x28   : > { %372 = vst [vmem:[%s3955_s30 + $0x130] sm:$0xff] %v371_v38  ;;  %v377_v41 = vld [vmem:[%s3950_s29 + $0x448] sm:$0xff]  ;;  %374 = vst [vmem:[%s3955_s30 + $0x138] sm:$0xff] %v373_v39  ;;  %v379_v42 = vld [vmem:[%s3950_s29 + $0x450] sm:$0xff] }
  0x29   : > { %376 = vst [vmem:[%s3955_s30 + $0x140] sm:$0xff] %v375_v40  ;;  %378 = vst [vmem:[%s3955_s30 + $0x148] sm:$0xff] %v377_v41  ;;  %v381_v43 = vld [vmem:[%s3950_s29 + $0x458] sm:$0xff]  ;;  %v383_v44 = vld [vmem:[%s3950_s29 + $0x460] sm:$0xff] }
  0x2a   : > { %380 = vst [vmem:[%s3955_s30 + $0x150] sm:$0xff] %v379_v42  ;;  %382 = vst [vmem:[%s3955_s30 + $0x158] sm:$0xff] %v381_v43  ;;  %v385_v45 = vld [vmem:[%s3950_s29 + $0x468] sm:$0xff]  ;;  %v387_v46 = vld [vmem:[%s3950_s29 + $0x470] sm:$0xff] }
  0x2b   : > { %384 = vst [vmem:[%s3955_s30 + $0x160] sm:$0xff] %v383_v44  ;;  %v389_v47 = vld [vmem:[%s3950_s29 + $0x478] sm:$0xff]  ;;  %386 = vst [vmem:[%s3955_s30 + $0x168] sm:$0xff] %v385_v45  ;;  %v391_v48 = vld [vmem:[%s3950_s29 + $0x480] sm:$0xff] }
  0x2c   : > { %388 = vst [vmem:[%s3955_s30 + $0x170] sm:$0xff] %v387_v46  ;;  %390 = vst [vmem:[%s3955_s30 + $0x178] sm:$0xff] %v389_v47  ;;  %v393_v49 = vld [vmem:[%s3950_s29 + $0x488] sm:$0xff]  ;;  %v395_v50 = vld [vmem:[%s3950_s29 + $0x490] sm:$0xff] }
  0x2d   : > { %392 = vst [vmem:[%s3955_s30 + $0x180] sm:$0xff] %v391_v48  ;;  %394 = vst [vmem:[%s3955_s30 + $0x188] sm:$0xff] %v393_v49  ;;  %v397_v51 = vld [vmem:[%s3950_s29 + $0x498] sm:$0xff]  ;;  %v399_v52 = vld [vmem:[%s3950_s29 + $0x4a0] sm:$0xff] }
  0x2e   : > { %396 = vst [vmem:[%s3955_s30 + $0x190] sm:$0xff] %v395_v50  ;;  %v401_v53 = vld [vmem:[%s3950_s29 + $0x4a8] sm:$0xff]  ;;  %398 = vst [vmem:[%s3955_s30 + $0x198] sm:$0xff] %v397_v51  ;;  %v403_v54 = vld [vmem:[%s3950_s29 + $0x4b0] sm:$0xff] }
  0x2f   : > { %400 = vst [vmem:[%s3955_s30 + $0x1a0] sm:$0xff] %v399_v52  ;;  %402 = vst [vmem:[%s3955_s30 + $0x1a8] sm:$0xff] %v401_v53  ;;  %v405_v55 = vld [vmem:[%s3950_s29 + $0x4b8] sm:$0xff]  ;;  %v407_v56 = vld [vmem:[%s3950_s29 + $0x4c0] sm:$0xff] }
  0x30   : > { %404 = vst [vmem:[%s3955_s30 + $0x1b0] sm:$0xff] %v403_v54  ;;  %406 = vst [vmem:[%s3955_s30 + $0x1b8] sm:$0xff] %v405_v55  ;;  %v409_v57 = vld [vmem:[%s3950_s29 + $0x4c8] sm:$0xff]  ;;  %v411_v58 = vld [vmem:[%s3950_s29 + $0x4d0] sm:$0xff] }
  0x31   : > { %408 = vst [vmem:[%s3955_s30 + $0x1c0] sm:$0xff] %v407_v56  ;;  %v413_v59 = vld [vmem:[%s3950_s29 + $0x4d8] sm:$0xff]  ;;  %410 = vst [vmem:[%s3955_s30 + $0x1c8] sm:$0xff] %v409_v57  ;;  %v415_v60 = vld [vmem:[%s3950_s29 + $0x4e0] sm:$0xff] }
  0x32   : > { %412 = vst [vmem:[%s3955_s30 + $0x1d0] sm:$0xff] %v411_v58  ;;  %414 = vst [vmem:[%s3955_s30 + $0x1d8] sm:$0xff] %v413_v59  ;;  %v417_v61 = vld [vmem:[%s3950_s29 + $0x4e8] sm:$0xff]  ;;  %v419_v62 = vld [vmem:[%s3950_s29 + $0x4f0] sm:$0xff] }
  0x33   : > { %416 = vst [vmem:[%s3955_s30 + $0x1e0] sm:$0xff] %v415_v60  ;;  %418 = vst [vmem:[%s3955_s30 + $0x1e8] sm:$0xff] %v417_v61  ;;  %v421_v63 = vld [vmem:[%s3950_s29 + $0x4f8] sm:$0xff] }
  0x34   : > { %420 = vst [vmem:[%s3955_s30 + $0x1f0] sm:$0xff] %v419_v62  ;;  %422 = vst [vmem:[%s3955_s30 + $0x1f8] sm:$0xff] %v421_v63 }
  0x35 PF: > { %p2784_p10 = scmp.ge.s32.totalorder %s3872_s15, 1  ;;  %p427_p11 = scmp.lt.s32.totalorder %s3872_s15, 5 }
  0x37   : > { %p428_p12 = pnand %p2784_p10, %p427_p11 }
  0x39   : > { %431 = sbr.rel (%p428_p12) target bundleno = 730 (0x2da), region = 66 }
  0x3e   : > { %v2794_v0 = vld [vmem:[%s6201_s1 + $0x78] sm:$0xff]  ;;  %v2793_v2 = vld [vmem:[%s6201_s1 + $0x70] sm:$0xff]  ;;  %v2792_v4 = vld [vmem:[%s6201_s1 + $0x68] sm:$0xff]  ;;  %s4103_s25 = sand.u32 1, %s3864_s13   ;;  %vm540_vm0 = vcmask 523264   ;;  %s3874_s4 = smov 64  }
  0x3f   : > { %v1190_v1 = vld [vmem:[%s6202_s2 + $0x38] sm:$0xff]  ;;  %3146 = vmatprep.subr.mxu1 %v2794_v0  ;;  %v1189_v3 = vld [vmem:[%s6202_s2 + $0x30] sm:$0xff]  ;;  %v1188_v5 = vld [vmem:[%s6202_s2 + $0x28] sm:$0xff]  ;;  %s2785_s7 = sshll.u32 %s4103_s25, 9  ;;  %s2786_s5 = sshll.u32 %s4103_s25, 8 }
  0x40   : > { %3274 = vmatprep.subr.mxu0 %v1190_v1  ;;  %3147 = vmatpush3.msra.mxu1 %v2794_v0  ;;  %v2791_v6 = vld [vmem:[%s6201_s1 + $0x60] sm:$0xff]  ;;  %v2790_v8 = vld [vmem:[%s6201_s1 + $0x58] sm:$0xff]  ;;  %v2789_v10 = vld [vmem:[%s6201_s1 + $0x50] sm:$0xff]  ;;  %s4133_s28 = scalar_lea.vmem [#allocation2], %s2785_s7  ;;  %s6023_s6 = scalar_lea.vmem [#allocation3], %s2786_s5 }
  0x41   : > { %3275 = vmatpush3.msra.mxu0 %v1190_v1  ;;  %3148 = vmatprep.subr.mxu1 %v2793_v2  ;;  %v1187_v7 = vld [vmem:[%s6202_s2 + $0x20] sm:$0xff]  ;;  %v1186_v9 = vld [vmem:[%s6202_s2 + $0x18] sm:$0xff]  ;;  %v1185_v11 = vld [vmem:[%s6202_s2 + $0x10] sm:$0xff]  ;;  %s2993_s7 = sshll.u32 %s2777_s16, 12  ;;  %s2710_s8 = sshll.u32 %s6023_s6, 4  ;;  %s6156_s8 = int_to_ptr.vmem [resolvable:$true] %s2710_s8 }
  0x42   : > { %3276 = vmatprep.subr.mxu0 %v1189_v3  ;;  %3149 = vmatpush3.msra.mxu1 %v2793_v2  ;;  %v2788_v12 = vld [vmem:[%s6201_s1 + $0x48] sm:$0xff]  ;;  %v2787_v14 = vld [vmem:[%s6201_s1 + $0x40] sm:$0xff]  ;;  %v530_v18 = vld [vmem:[%s6201_s1 + $0x38] sm:$0xff]  ;;  %s6154_s11 = scalar_lea.hbm %s6203_s3, %s2993_s7  ;;  %s2697_s16 = scalar_lea.sflag [#allocation4], %s4103_s25 }
  0x43   : > { %3277 = vmatpush3.msra.mxu0 %v1189_v3  ;;  %3150 = vmatprep.subr.mxu1 %v2792_v4  ;;  %v1184_v13 = vld [vmem:[%s6202_s2 + $0x8] sm:$0xff]  ;;  %v4136_v15 = vld [vmem:[%s4133_s28 + $0x100] sm:$0xff]  ;;  %v4158_v21 = vld [vmem:[%s4133_s28 + $0x110] sm:$0xff]  ;;  %s3812_s17 = scalar_lea.vmem %s6156_s8, 4096 }
  0x44   : > { %3278 = vmatprep.subr.mxu0 %v1188_v5  ;;  %3151 = vmatpush3.msra.mxu1 %v2792_v4  ;;  %v1183_v16 = vld [vmem:[%s6202_s2] sm:$0xff]  ;;  %v4142_v17 = vld [vmem:[%s4133_s28 + $0x108] sm:$0xff]  ;;  %v4161_v22 = vld [vmem:[%s4133_s28 + $0x10] sm:$0xff]  ;;  %p3813_p13 = scmp.ne.s32.totalorder %s6156_s8, %s3812_s17 }
  0x45   : > { %3279 = vmatpush3.msra.mxu0 %v1188_v5  ;;  %3152 = vmatprep.subr.mxu1 %v2791_v6  ;;  %v4150_v19 = vld [vmem:[%s4133_s28] sm:$0xff]  ;;  %v4153_v20 = vld [vmem:[%s4133_s28 + $0x8] sm:$0xff]  ;;  %v4166_v23 = vld [vmem:[%s4133_s28 + $0x118] sm:$0xff] }
  0x46   : > { %3280 = vmatprep.subr.mxu0 %v1187_v7  ;;  %3153 = vmatpush3.msra.mxu1 %v2791_v6  ;;  %v529_v24 = vld [vmem:[%s6201_s1 + $0x30] sm:$0xff]  ;;  %v4174_v25 = vld [vmem:[%s4133_s28 + $0x120] sm:$0xff]  ;;  %v4181_v26 = vld [vmem:[%s4133_s28 + $0x18] sm:$0xff]  ;;  %p3814_p0 = pnand %p3813_p13, %p3936_p6 }
  0x47   : > { %3281 = vmatpush3.msra.mxu0 %v1187_v7  ;;  %3154 = vmatprep.subr.mxu1 %v2790_v8  ;;  %v528_v27 = vld [vmem:[%s6201_s1 + $0x28] sm:$0xff]  ;;  %v4189_v28 = vld [vmem:[%s4133_s28 + $0x20] sm:$0xff]  ;;  %v4202_v31 = vld [vmem:[%s4133_s28 + $0x130] sm:$0xff] }
  0x48   : > { %3282 = vmatprep.subr.mxu0 %v1186_v9  ;;  %3155 = vmatpush3.msra.mxu1 %v2790_v8  ;;  %v4194_v29 = vld [vmem:[%s4133_s28 + $0x128] sm:$0xff]  ;;  %v527_v30 = vld [vmem:[%s6201_s1 + $0x20] sm:$0xff]  ;;  %v526_v33 = vld [vmem:[%s6201_s1 + $0x18] sm:$0xff]  ;;  %p3815_p1 = pneg %p3814_p0 }
  0x49   : > { %3283 = vmatpush3.msra.mxu0 %v1186_v9  ;;  %3156 = vmatprep.subr.mxu1 %v2789_v10  ;;  %v4207_v32 = vld [vmem:[%s4133_s28 + $0x28] sm:$0xff]  ;;  %v4215_v34 = vld [vmem:[%s4133_s28 + $0x30] sm:$0xff]  ;;  %v4220_v35 = vld [vmem:[%s4133_s28 + $0x138] sm:$0xff] }
  0x4a   : > { %3284 = vmatprep.subr.mxu0 %v1185_v11  ;;  %3157 = vmatpush3.msra.mxu1 %v2789_v10  ;;  %v525_v36 = vld [vmem:[%s6201_s1 + $0x10] sm:$0xff]  ;;  %v4228_v37 = vld [vmem:[%s4133_s28 + $0x140] sm:$0xff]  ;;  %v4233_v38 = vld [vmem:[%s4133_s28 + $0x38] sm:$0xff] }
  0x4b   : > { %3285 = vmatpush3.msra.mxu0 %v1185_v11  ;;  %3158 = vmatprep.subr.mxu1 %v2788_v12  ;;  %v524_v39 = vld [vmem:[%s6201_s1 + $0x8] sm:$0xff]  ;;  %v4241_v40 = vld [vmem:[%s4133_s28 + $0x40] sm:$0xff]  ;;  %v4254_v43 = vld [vmem:[%s4133_s28 + $0x150] sm:$0xff] }
  0x4c   : > { %3286 = vmatprep.subr.mxu0 %v1184_v13  ;;  %3159 = vmatpush3.msra.mxu1 %v2788_v12  ;;  %v4246_v41 = vld [vmem:[%s4133_s28 + $0x148] sm:$0xff]  ;;  %v523_v42 = vld [vmem:[%s6201_s1] sm:$0xff]  ;;  %v4264_v45 = vld [vmem:[%s4133_s28 + $0x50] sm:$0xff] }
  0x4d   : > { %3287 = vmatpush3.msra.mxu0 %v1184_v13  ;;  %3160 = vmatprep.subr.mxu1 %v2787_v14  ;;  %v4259_v44 = vld [vmem:[%s4133_s28 + $0x48] sm:$0xff]  ;;  %v4269_v46 = vld [vmem:[%s4133_s28 + $0x158] sm:$0xff]  ;;  %v4274_v47 = vld [vmem:[%s4133_s28 + $0x160] sm:$0xff] }
  0x4e   : > { %3162 = vmatprep.mubr.msk.f32.mxu1 %vm540_vm0, %v4136_v15  ;;  %3161 = vmatpush3.msra.mxu1 %v2787_v14  ;;  %v4279_v48 = vld [vmem:[%s4133_s28 + $0x58] sm:$0xff]  ;;  %v4284_v49 = vld [vmem:[%s4133_s28 + $0x60] sm:$0xff]  ;;  %v4289_v50 = vld [vmem:[%s4133_s28 + $0x168] sm:$0xff] }
  0x4f   : > { %3288 = vmatprep.subr.mxu0 %v1183_v16  ;;  %3163 = vmatmul.mubr.msk.f32.vlgmr.msra.gmra.mxu1 %vm540_vm0, %v4142_v17  ;;  %v4294_v51 = vld [vmem:[%s4133_s28 + $0x170] sm:$0xff]  ;;  %v4299_v52 = vld [vmem:[%s4133_s28 + $0x68] sm:$0xff]  ;;  %v4309_v54 = vld [vmem:[%s4133_s28 + $0x178] sm:$0xff] }
  0x50   : > { %3210 = vmatprep.subr.mxu1 %v530_v18  ;;  %3289 = vmatpush3.msra.mxu0 %v1183_v16  ;;  %v4304_v53 = vld [vmem:[%s4133_s28 + $0x70] sm:$0xff]  ;;  %v4314_v55 = vld [vmem:[%s4133_s28 + $0x180] sm:$0xff]  ;;  %v4319_v56 = vld [vmem:[%s4133_s28 + $0x78] sm:$0xff] }
  0x51   : > { %3290 = vmatprep.mubr.msk.f32.mxu0 %vm540_vm0, %v4150_v19  ;;  %3211 = vmatpush3.msra.mxu1 %v530_v18  ;;  %v4324_v57 = vld [vmem:[%s4133_s28 + $0x80] sm:$0xff]  ;;  %v4329_v58 = vld [vmem:[%s4133_s28 + $0x188] sm:$0xff]  ;;  %v4334_v59 = vld [vmem:[%s4133_s28 + $0x190] sm:$0xff] }
  0x52   : > { %3291 = vmatmul.mubr.msk.f32.vlgmr.msra.gmra.mxu0 %vm540_vm0, %v4153_v20  ;;  %3165 = vmatprep.mubr.msk.f32.mxu1 %vm540_vm0, %v4158_v21  ;;  %v4339_v60 = vld [vmem:[%s4133_s28 + $0x88] sm:$0xff]  ;;  %v4344_v61 = vld [vmem:[%s4133_s28 + $0x90] sm:$0xff]  ;;  %v4349_v62 = vld [vmem:[%s4133_s28 + $0x198] sm:$0xff] }
  0x53   : > { %3293 = vmatprep.mubr.msk.f32.mxu0 %vm540_vm0, %v4161_v22  ;;  %3166 = vmatmul.mubr.msk.f32.gmra.mxu1 %vm540_vm0, %v4166_v23  ;;  %v4354_v63 = vld [vmem:[%s4133_s28 + $0x1a0] sm:$0xff]  ;;  %v4359_v0 = vld [vmem:[%s4133_s28 + $0x98] sm:$0xff]  ;;  %v4369_v2 = vld [vmem:[%s4133_s28 + $0x1a8] sm:$0xff] }
  0x54   : > { %3212 = vmatprep.subr.mxu1 %v529_v24  ;;  %3168 = vmatprep.mubr.msk.f32.mxu1 %vm540_vm0, %v4174_v25  ;;  %v4364_v1 = vld [vmem:[%s4133_s28 + $0xa0] sm:$0xff]  ;;  %v4374_v3 = vld [vmem:[%s4133_s28 + $0x1b0] sm:$0xff]  ;;  %v4379_v4 = vld [vmem:[%s4133_s28 + $0xa8] sm:$0xff] }
  0x55   : > { %3213 = vmatpush3.msra.mxu1 %v529_v24  ;;  %v4384_v5 = vld [vmem:[%s4133_s28 + $0xb0] sm:$0xff]  ;;  %v4389_v6 = vld [vmem:[%s4133_s28 + $0x1b8] sm:$0xff]  ;;  %v4394_v7 = vld [vmem:[%s4133_s28 + $0x1c0] sm:$0xff] }
  0x56   : > { %3294 = vmatmul.mubr.msk.f32.gmra.mxu0 %vm540_vm0, %v4181_v26  ;;  %3214 = vmatprep.subr.mxu1 %v528_v27  ;;  %v4399_v8 = vld [vmem:[%s4133_s28 + $0xb8] sm:$0xff]  ;;  %v4404_v9 = vld [vmem:[%s4133_s28 + $0xc0] sm:$0xff]  ;;  %v4409_v10 = vld [vmem:[%s4133_s28 + $0x1c8] sm:$0xff] }
  0x57   : > { %3296 = vmatprep.mubr.msk.f32.mxu0 %vm540_vm0, %v4189_v28  ;;  %3215 = vmatpush3.msra.mxu1 %v528_v27  ;;  %v4414_v11 = vld [vmem:[%s4133_s28 + $0x1d0] sm:$0xff]  ;;  %v4419_v12 = vld [vmem:[%s4133_s28 + $0xc8] sm:$0xff]  ;;  %v4429_v14 = vld [vmem:[%s4133_s28 + $0x1d8] sm:$0xff] }
  0x58   : > { %3169 = vmatmul.mubr.msk.f32.gmra.mxu1 %vm540_vm0, %v4194_v29  ;;  %3216 = vmatprep.subr.mxu1 %v527_v30  ;;  %v4424_v13 = vld [vmem:[%s4133_s28 + $0xd0] sm:$0xff]  ;;  %v4434_v16 = vld [vmem:[%s4133_s28 + $0x1e0] sm:$0xff]  ;;  %v4439_v18 = vld [vmem:[%s4133_s28 + $0xd8] sm:$0xff] }
  0x59   : > { %3171 = vmatprep.mubr.msk.f32.mxu1 %vm540_vm0, %v4202_v31  ;;  %3217 = vmatpush3.msra.mxu1 %v527_v30  ;;  %v4444_v24 = vld [vmem:[%s4133_s28 + $0xe0] sm:$0xff]  ;;  %v4449_v27 = vld [vmem:[%s4133_s28 + $0x1e8] sm:$0xff]  ;;  %v4454_v30 = vld [vmem:[%s4133_s28 + $0x1f0] sm:$0xff] }
  0x5a   : > { %3297 = vmatmul.mubr.msk.f32.gmra.mxu0 %vm540_vm0, %v4207_v32  ;;  %3218 = vmatprep.subr.mxu1 %v526_v33 }
  0x5b   : > { %3299 = vmatprep.mubr.msk.f32.mxu0 %vm540_vm0, %v4215_v34  ;;  %3219 = vmatpush3.msra.mxu1 %v526_v33  ;;  %v4459_v33 = vld [vmem:[%s4133_s28 + $0xe8] sm:$0xff] }
  0x5c   : > { %3172 = vmatmul.mubr.msk.f32.gmra.mxu1 %vm540_vm0, %v4220_v35  ;;  %3220 = vmatprep.subr.mxu1 %v525_v36 }
  0x5d   : > { %3174 = vmatprep.mubr.msk.f32.mxu1 %vm540_vm0, %v4228_v37  ;;  %3221 = vmatpush3.msra.mxu1 %v525_v36  ;;  %v4464_v36 = vld [vmem:[%s4133_s28 + $0xf0] sm:$0xff] }
  0x5e   : > { %3300 = vmatmul.mubr.msk.f32.gmra.mxu0 %vm540_vm0, %v4233_v38  ;;  %3222 = vmatprep.subr.mxu1 %v524_v39 }
  0x5f   : > { %3302 = vmatprep.mubr.msk.f32.mxu0 %vm540_vm0, %v4241_v40  ;;  %3223 = vmatpush3.msra.mxu1 %v524_v39  ;;  %v4469_v39 = vld [vmem:[%s4133_s28 + $0x1f8] sm:$0xff] }
  0x60   : > { %3175 = vmatmul.mubr.msk.f32.gmra.mxu1 %vm540_vm0, %v4246_v41  ;;  %3224 = vmatprep.subr.mxu1 %v523_v42 }
  0x61   : > { %3177 = vmatprep.mubr.msk.f32.mxu1 %vm540_vm0, %v4254_v43  ;;  %3225 = vmatpush3.msra.mxu1 %v523_v42  ;;  %v4476_v42 = vld [vmem:[%s4133_s28 + $0xf8] sm:$0xff] }
  0x62   : > { %3303 = vmatmul.mubr.msk.f32.gmra.mxu0 %vm540_vm0, %v4259_v44 }
  0x63   : > { %3305 = vmatprep.mubr.msk.f32.mxu0 %vm540_vm0, %v4264_v45 }
  0x64   : > { %3178 = vmatmul.mubr.msk.f32.gmra.mxu1 %vm540_vm0, %v4269_v46 }
  0x65   : > { %3180 = vmatprep.mubr.msk.f32.mxu1 %vm540_vm0, %v4274_v47 }
  0x66   : > { %3306 = vmatmul.mubr.msk.f32.gmra.mxu0 %vm540_vm0, %v4279_v48 }
  0x67   : > { %3308 = vmatprep.mubr.msk.f32.mxu0 %vm540_vm0, %v4284_v49 }
  0x68   : > { %3181 = vmatmul.mubr.msk.f32.gmra.mxu1 %vm540_vm0, %v4289_v50 }
  0x69   : > { %3183 = vmatprep.mubr.msk.f32.mxu1 %vm540_vm0, %v4294_v51 }
  0x6a   : > { %3309 = vmatmul.mubr.msk.f32.gmra.mxu0 %vm540_vm0, %v4299_v52 }
  0x6b   : > { %3311 = vmatprep.mubr.msk.f32.mxu0 %vm540_vm0, %v4304_v53 }
  0x6c   : > { %3184 = vmatmul.mubr.msk.f32.gmra.mxu1 %vm540_vm0, %v4309_v54 }
  0x6d   : > { %3186 = vmatprep.mubr.msk.f32.mxu1 %vm540_vm0, %v4314_v55 }
  0x6e   : > { %3312 = vmatmul.mubr.msk.f32.gmra.mxu0 %vm540_vm0, %v4319_v56 }
  0x6f   : > { %3314 = vmatprep.mubr.msk.f32.mxu0 %vm540_vm0, %v4324_v57 }
  0x70   : > { %3187 = vmatmul.mubr.msk.f32.gmra.mxu1 %vm540_vm0, %v4329_v58 }
  0x71   : > { %3189 = vmatprep.mubr.msk.f32.mxu1 %vm540_vm0, %v4334_v59 }
  0x72   : > { %3315 = vmatmul.mubr.msk.f32.gmra.mxu0 %vm540_vm0, %v4339_v60 }
  0x73   : > { %3317 = vmatprep.mubr.msk.f32.mxu0 %vm540_vm0, %v4344_v61 }
  0x74   : > { %3190 = vmatmul.mubr.msk.f32.gmra.mxu1 %vm540_vm0, %v4349_v62 }
  0x75   : > { %3192 = vmatprep.mubr.msk.f32.mxu1 %vm540_vm0, %v4354_v63 }
  0x76   : > { %3318 = vmatmul.mubr.msk.f32.gmra.mxu0 %vm540_vm0, %v4359_v0 }
  0x77   : > { %3320 = vmatprep.mubr.msk.f32.mxu0 %vm540_vm0, %v4364_v1 }
  0x78   : > { %3193 = vmatmul.mubr.msk.f32.gmra.mxu1 %vm540_vm0, %v4369_v2 }
  0x79   : > { %3195 = vmatprep.mubr.msk.f32.mxu1 %vm540_vm0, %v4374_v3 }
  0x7a   : > { %3321 = vmatmul.mubr.msk.f32.gmra.mxu0 %vm540_vm0, %v4379_v4 }
  0x7b   : > { %3323 = vmatprep.mubr.msk.f32.mxu0 %vm540_vm0, %v4384_v5 }
  0x7c   : > { %3196 = vmatmul.mubr.msk.f32.gmra.mxu1 %vm540_vm0, %v4389_v6 }
  0x7d   : > { %3198 = vmatprep.mubr.msk.f32.mxu1 %vm540_vm0, %v4394_v7 }
  0x7e   : > { %3324 = vmatmul.mubr.msk.f32.gmra.mxu0 %vm540_vm0, %v4399_v8 }
  0x7f   : > { %3326 = vmatprep.mubr.msk.f32.mxu0 %vm540_vm0, %v4404_v9 }
  0x80   : > { %3199 = vmatmul.mubr.msk.f32.gmra.mxu1 %vm540_vm0, %v4409_v10 }
  0x81   : > { %3201 = vmatprep.mubr.msk.f32.mxu1 %vm540_vm0, %v4414_v11 }
  0x82   : > { %3327 = vmatmul.mubr.msk.f32.gmra.mxu0 %vm540_vm0, %v4419_v12 }
  0x83   : > { %3329 = vmatprep.mubr.msk.f32.mxu0 %vm540_vm0, %v4424_v13 }
  0x84   : > { %3202 = vmatmul.mubr.msk.f32.gmra.mxu1 %vm540_vm0, %v4429_v14 }
  0x85   : > { %3204 = vmatprep.mubr.msk.f32.mxu1 %vm540_vm0, %v4434_v16 }
  0x86   : > { %3330 = vmatmul.mubr.msk.f32.gmra.mxu0 %vm540_vm0, %v4439_v18 }
  0x87   : > { %3332 = vmatprep.mubr.msk.f32.mxu0 %vm540_vm0, %v4444_v24 }
  0x88   : > { %3205 = vmatmul.mubr.msk.f32.gmra.mxu1 %vm540_vm0, %v4449_v27 }
  0x89   : > { %3207 = vmatprep.mubr.msk.f32.mxu1 %vm540_vm0, %v4454_v30 }
  0x8a   : > { %3333 = vmatmul.mubr.msk.f32.gmra.mxu0 %vm540_vm0, %v4459_v33 }
  0x8b   : > { %3335 = vmatprep.mubr.msk.f32.mxu0 %vm540_vm0, %v4464_v36 }
  0x8c   : > { %3208 = vmatmul.mubr.msk.f32.gmra.mxu1 %vm540_vm0, %v4469_v39 }
  0x8d   : > { %3226 = vmatprep.mubr.msk.f32.mxu1 %vm540_vm0, %v4150_v19 }
  0x8e   : > { %3336 = vmatmul.mubr.msk.f32.gmra.mxu0 %vm540_vm0, %v4476_v42 }
  0x8f   : > { %3338 = vmatprep.mubr.msk.f32.mxu0 %vm540_vm0, %v4136_v15 }
  0x90   : > { %3227 = vmatmul.mubr.msk.f32.vlgmr.msra.gmra.mxu1 %vm540_vm0, %v4153_v20 }
  0x91   : > { %3229 = vmatprep.mubr.msk.f32.mxu1 %vm540_vm0, %v4161_v22 }
  0x92   : > { %3339 = vmatmul.mubr.msk.f32.gmra.mxu0 %vm540_vm0, %v4142_v17 }
  0x93   : > { %3341 = vmatprep.mubr.msk.f32.mxu0 %vm540_vm0, %v4158_v21 }
  0x94   : > { %3230 = vmatmul.mubr.msk.f32.gmra.mxu1 %vm540_vm0, %v4181_v26 }
  0x95   : > { %3232 = vmatprep.mubr.msk.f32.mxu1 %vm540_vm0, %v4189_v28 }
  0x96   : > { %3342 = vmatmul.mubr.msk.f32.gmra.mxu0 %vm540_vm0, %v4166_v23 }
  0x97   : > { %3344 = vmatprep.mubr.msk.f32.mxu0 %vm540_vm0, %v4174_v25 }
  0x98   : > { %3233 = vmatmul.mubr.msk.f32.gmra.mxu1 %vm540_vm0, %v4207_v32 }
  0x99   : > { %3235 = vmatprep.mubr.msk.f32.mxu1 %vm540_vm0, %v4215_v34 }
  0x9a   : > { %3345 = vmatmul.mubr.msk.f32.gmra.mxu0 %vm540_vm0, %v4194_v29 }
  0x9b   : > { %3347 = vmatprep.mubr.msk.f32.mxu0 %vm540_vm0, %v4202_v31 }
  0x9c   : > { %3236 = vmatmul.mubr.msk.f32.gmra.mxu1 %vm540_vm0, %v4233_v38 }
  0x9d   : > { %3238 = vmatprep.mubr.msk.f32.mxu1 %vm540_vm0, %v4241_v40 }
  0x9e   : > { %3348 = vmatmul.mubr.msk.f32.gmra.mxu0 %vm540_vm0, %v4220_v35 }
  0x9f   : > { %3350 = vmatprep.mubr.msk.f32.mxu0 %vm540_vm0, %v4228_v37 }
  0xa0   : > { %3239 = vmatmul.mubr.msk.f32.gmra.mxu1 %vm540_vm0, %v4259_v44 }
  0xa1   : > { %3241 = vmatprep.mubr.msk.f32.mxu1 %vm540_vm0, %v4264_v45 }
  0xa2   : > { %3351 = vmatmul.mubr.msk.f32.gmra.mxu0 %vm540_vm0, %v4246_v41 }
  0xa3   : > { %3353 = vmatprep.mubr.msk.f32.mxu0 %vm540_vm0, %v4254_v43 }
  0xa4   : > { %3242 = vmatmul.mubr.msk.f32.gmra.mxu1 %vm540_vm0, %v4279_v48 }
  0xa5   : > { %3244 = vmatprep.mubr.msk.f32.mxu1 %vm540_vm0, %v4284_v49 }
  0xa6   : > { %3354 = vmatmul.mubr.msk.f32.gmra.mxu0 %vm540_vm0, %v4269_v46 }
  0xa7   : > { %3356 = vmatprep.mubr.msk.f32.mxu0 %vm540_vm0, %v4274_v47 }
  0xa8   : > { %3245 = vmatmul.mubr.msk.f32.gmra.mxu1 %vm540_vm0, %v4299_v52 }
  0xa9   : > { %3247 = vmatprep.mubr.msk.f32.mxu1 %vm540_vm0, %v4304_v53 }
  0xaa   : > { %3357 = vmatmul.mubr.msk.f32.gmra.mxu0 %vm540_vm0, %v4289_v50 }
  0xab   : > { %3359 = vmatprep.mubr.msk.f32.mxu0 %vm540_vm0, %v4294_v51 }
  0xac   : > { %3248 = vmatmul.mubr.msk.f32.gmra.mxu1 %vm540_vm0, %v4319_v56 }
  0xad   : > { %3250 = vmatprep.mubr.msk.f32.mxu1 %vm540_vm0, %v4324_v57 }
  0xae   : > { %3360 = vmatmul.mubr.msk.f32.gmra.mxu0 %vm540_vm0, %v4309_v54 }
  0xaf   : > { %3362 = vmatprep.mubr.msk.f32.mxu0 %vm540_vm0, %v4314_v55 }
  0xb0   : > { %3251 = vmatmul.mubr.msk.f32.gmra.mxu1 %vm540_vm0, %v4339_v60 }
  0xb1   : > { %3253 = vmatprep.mubr.msk.f32.mxu1 %vm540_vm0, %v4344_v61 }
  0xb2   : > { %3363 = vmatmul.mubr.msk.f32.gmra.mxu0 %vm540_vm0, %v4329_v58 }
  0xb3   : > { %3365 = vmatprep.mubr.msk.f32.mxu0 %vm540_vm0, %v4334_v59 }
  0xb4   : > { %3254 = vmatmul.mubr.msk.f32.gmra.mxu1 %vm540_vm0, %v4359_v0 }
  0xb5   : > { %3256 = vmatprep.mubr.msk.f32.mxu1 %vm540_vm0, %v4364_v1 }
  0xb6   : > { %3366 = vmatmul.mubr.msk.f32.gmra.mxu0 %vm540_vm0, %v4349_v62 }
  0xb7   : > { %3368 = vmatprep.mubr.msk.f32.mxu0 %vm540_vm0, %v4354_v63 }
  0xb8   : > { %3257 = vmatmul.mubr.msk.f32.gmra.mxu1 %vm540_vm0, %v4379_v4 }
  0xb9   : > { %3259 = vmatprep.mubr.msk.f32.mxu1 %vm540_vm0, %v4384_v5 }
  0xba   : > { %3369 = vmatmul.mubr.msk.f32.gmra.mxu0 %vm540_vm0, %v4369_v2 }
  0xbb   : > { %3371 = vmatprep.mubr.msk.f32.mxu0 %vm540_vm0, %v4374_v3 }
  0xbc   : > { %3260 = vmatmul.mubr.msk.f32.gmra.mxu1 %vm540_vm0, %v4399_v8 }
  0xbd   : > { %3262 = vmatprep.mubr.msk.f32.mxu1 %vm540_vm0, %v4404_v9 }
  0xbe   : > { %3372 = vmatmul.mubr.msk.f32.gmra.mxu0 %vm540_vm0, %v4389_v6 }
  0xbf   : > { %3374 = vmatprep.mubr.msk.f32.mxu0 %vm540_vm0, %v4394_v7 }
  0xc0   : > { %3263 = vmatmul.mubr.msk.f32.gmra.mxu1 %vm540_vm0, %v4419_v12 }
  0xc1   : > { %3265 = vmatprep.mubr.msk.f32.mxu1 %vm540_vm0, %v4424_v13 }
  0xc2   : > { %3375 = vmatmul.mubr.msk.f32.gmra.mxu0 %vm540_vm0, %v4409_v10 }
  0xc3   : > { %3377 = vmatprep.mubr.msk.f32.mxu0 %vm540_vm0, %v4414_v11 }
  0xc4   : > { %3266 = vmatmul.mubr.msk.f32.gmra.mxu1 %vm540_vm0, %v4439_v18 }
  0xc5   : > { %3268 = vmatprep.mubr.msk.f32.mxu1 %vm540_vm0, %v4444_v24 }
  0xc6   : > { %3378 = vmatmul.mubr.msk.f32.gmra.mxu0 %vm540_vm0, %v4429_v14 }
  0xc7   : > { %3380 = vmatprep.mubr.msk.f32.mxu0 %vm540_vm0, %v4434_v16 }
  0xc8   : > { %3269 = vmatmul.mubr.msk.f32.gmra.mxu1 %vm540_vm0, %v4459_v33 }
  0xc9   : > { %3271 = vmatprep.mubr.msk.f32.mxu1 %vm540_vm0, %v4464_v36 }
  0xca   : > { %3381 = vmatmul.mubr.msk.f32.gmra.mxu0 %vm540_vm0, %v4449_v27 }
  0xcb   : > { %3383 = vmatprep.mubr.msk.f32.mxu0 %vm540_vm0, %v4454_v30 }
  0xcc   : > { %3272 = vmatmul.mubr.msk.f32.gmra.mxu1 %vm540_vm0, %v4476_v42 }
  0xce   : > { %3384 = vmatmul.mubr.msk.f32.gmra.mxu0 %vm540_vm0, %v4469_v39 }
 0x10f   : > { %v4610_v15 = vpop.f32.mrf.mxu1 }
 0x111   : > { %v4614_v19 = vpop.f32.mrf.mxu1 }
 0x112   : > { %v4612_v17 = vpop.f32.mrf.mxu0 }
 0x113   : > { %v4618_v21 = vpop.f32.mrf.mxu1 }
 0x114   : > { %v4616_v20 = vpop.f32.mrf.mxu0 }
 0x115   : > { %v4622_v23 = vpop.f32.mrf.mxu1 }
 0x116   : > { %v4620_v22 = vpop.f32.mrf.mxu0 }
 0x118   : > { %v4624_v25 = vpop.f32.mrf.mxu0  ;;  %v4626_v26 = vpop.f32.mrf.mxu1 }
 0x11a   : > { %v4628_v28 = vpop.f32.mrf.mxu0  ;;  %v4630_v29 = vpop.f32.mrf.mxu1 }
 0x11c   : > { %v4632_v31 = vpop.f32.mrf.mxu0  ;;  %v4634_v32 = vpop.f32.mrf.mxu1 }
 0x11e   : > { %v4636_v34 = vpop.f32.mrf.mxu0  ;;  %v4638_v35 = vpop.f32.mrf.mxu1 }
 0x120   : > { %v4640_v37 = vpop.f32.mrf.mxu0  ;;  %v4642_v38 = vpop.f32.mrf.mxu1 }
 0x122   : > { %v4644_v40 = vpop.f32.mrf.mxu0  ;;  %v4646_v41 = vpop.f32.mrf.mxu1 }
 0x124   : > { %v4648_v43 = vpop.f32.mrf.mxu0  ;;  %v4650_v44 = vpop.f32.mrf.mxu1 }
 0x126   : > { %v4652_v45 = vpop.f32.mrf.mxu0  ;;  %v4654_v46 = vpop.f32.mrf.mxu1 }
 0x128   : > { %v4656_v47 = vpop.f32.mrf.mxu0  ;;  %v4658_v48 = vpop.f32.mrf.mxu1 }
 0x12a   : > { %v4660_v49 = vpop.f32.mrf.mxu0  ;;  %v4662_v50 = vpop.f32.mrf.mxu1 }
 0x12c   : > { %v4664_v51 = vpop.f32.mrf.mxu0  ;;  %v4666_v52 = vpop.f32.mrf.mxu1 }
 0x12e   : > { %v4668_v53 = vpop.f32.mrf.mxu0  ;;  %v4670_v54 = vpop.f32.mrf.mxu1 }
 0x130   : > { %v4672_v55 = vpop.f32.mrf.mxu0  ;;  %v4674_v56 = vpop.f32.mrf.mxu1 }
 0x132   : > { %v4676_v57 = vpop.f32.mrf.mxu0  ;;  %v4678_v58 = vpop.f32.mrf.mxu1 }
 0x134   : > { %v4680_v59 = vpop.f32.mrf.mxu0  ;;  %v4682_v60 = vpop.f32.mrf.mxu1 }
 0x136   : > { %v4684_v61 = vpop.f32.mrf.mxu0  ;;  %v4686_v62 = vpop.f32.mrf.mxu1 }
 0x138   : > { %v4688_v63 = vpop.f32.mrf.mxu0  ;;  %v4690_v0 = vpop.f32.mrf.mxu1 }
 0x13a   : > { %v4692_v1 = vpop.f32.mrf.mxu0  ;;  %v4694_v2 = vpop.f32.mrf.mxu1 }
 0x13c   : > { %v4696_v3 = vpop.f32.mrf.mxu0  ;;  %v4698_v4 = vpop.f32.mrf.mxu1 }
 0x13e   : > { %v4700_v5 = vpop.f32.mrf.mxu0  ;;  %v4702_v6 = vpop.f32.mrf.mxu1 }
 0x13f   : > { %6249 = vst [vmem:[#allocation6_spill] sm:$0xff] %v4700_v5  ;;  %6250 = vst [vmem:[#allocation7_spill] sm:$0xff] %v4702_v6 }
 0x140   : > { %v4704_v7 = vpop.f32.mrf.mxu0  ;;  %v4706_v8 = vpop.f32.mrf.mxu1 }
 0x141   : > { %6251 = vst [vmem:[#allocation8_spill] sm:$0xff] %v4704_v7  ;;  %6252 = vst [vmem:[#allocation9_spill] sm:$0xff] %v4706_v8 }
 0x142   : > { %v4708_v9 = vpop.f32.mrf.mxu0  ;;  %v4710_v10 = vpop.f32.mrf.mxu1 }
 0x143   : > { %6253 = vst [vmem:[#allocation10_spill] sm:$0xff] %v4708_v9  ;;  %6254 = vst [vmem:[#allocation11_spill] sm:$0xff] %v4710_v10 }
 0x144   : > { %v4712_v11 = vpop.f32.mrf.mxu0  ;;  %v4714_v12 = vpop.f32.mrf.mxu1 }
 0x145   : > { %6255 = vst [vmem:[#allocation12_spill] sm:$0xff] %v4712_v11  ;;  %6256 = vst [vmem:[#allocation13_spill] sm:$0xff] %v4714_v12 }
 0x146   : > { %v4716_v13 = vpop.f32.mrf.mxu0  ;;  %v4718_v14 = vpop.f32.mrf.mxu1 }
 0x147   : > { %6257 = vst [vmem:[#allocation14_spill] sm:$0xff] %v4716_v13  ;;  %6258 = vst [vmem:[#allocation15_spill] sm:$0xff] %v4718_v14 }
 0x148   : > { %v4720_v16 = vpop.f32.mrf.mxu0  ;;  %v4722_v18 = vpop.f32.mrf.mxu1 }
 0x149   : > { %6259 = vst [vmem:[#allocation16_spill] sm:$0xff] %v4720_v16  ;;  %6260 = vst [vmem:[#allocation17_spill] sm:$0xff] %v4722_v18 }
 0x14a   : > { %v4724_v24 = vpop.f32.mrf.mxu0  ;;  %v4726_v27 = vpop.f32.mrf.mxu1 }
 0x14b   : > { %6261 = vst [vmem:[#allocation18_spill] sm:$0xff] %v4724_v24  ;;  %6262 = vst [vmem:[#allocation19_spill] sm:$0xff] %v4726_v27 }
 0x14c   : > { %v4728_v30 = vpop.f32.mrf.mxu0  ;;  %v4730_v33 = vpop.f32.mrf.mxu1 }
 0x14d   : > { %6263 = vst [vmem:[#allocation20_spill] sm:$0xff] %v4728_v30  ;;  %6264 = vst [vmem:[#allocation21_spill] sm:$0xff] %v4730_v33 }
 0x14e   : > { %v4732_v36 = vpop.f32.mrf.mxu0  ;;  %v4734_v39 = vpop.f32.mrf.mxu1 }
 0x14f   : > { %6265 = vst [vmem:[#allocation22_spill] sm:$0xff] %v4732_v36  ;;  %6266 = vst [vmem:[#allocation23_spill] sm:$0xff] %v4734_v39 }
 0x150   : > { %v4736_v42 = vpop.f32.mrf.mxu0  ;;  %v3228_v13 = vpop.f32.mrf.mxu1 }
 0x151   : > { %6267 = vst [vmem:[#allocation24_spill] sm:$0xff] %v4736_v42  ;;  %v1030_v14 = vadd.f32 %v3228_v13, %v4610_v15 }
 0x152   : > { %v3340_v16 = vpop.f32.mrf.mxu0  ;;  %v1024_v12 = vpop.f32.mrf.mxu1 }
 0x153   : > { %v4740_v18 = vadd.f32 %v4612_v17, %v1030_v14  ;;  %v4742_v24 = vadd.f32 %v3340_v16, %v1030_v14  ;;  %v1025_v30 = vadd.f32 %v1024_v12, %v4614_v19 }
 0x154   : > { %v1417_v27 = vpop.f32.mrf.mxu0  ;;  %v3231_v33 = vpop.f32.mrf.mxu1 }
 0x155   : > { %v1706_v36 = vmul.f32 1.442695, %v4740_v18  ;;  %v1770_v39 = vmul.f32 1.442695, %v4742_v24  ;;  %v4748_v42 = vadd.f32 %v4616_v20, %v1025_v30  ;;  %v4750_v11 = vadd.f32 %v1417_v27, %v1025_v30 }
 0x156   : > { %v1040_v15 = vadd.f32 %v3231_v33, %v4618_v21  ;;  %v3343_v13 = vpop.f32.mrf.mxu0  ;;  %v1034_v17 = vpop.f32.mrf.mxu1  ;;  %vm1641_vm1 = vcmp.gt.f32.partialorder %v4740_v18, 0.0  ;;  %vm1673_vm2 = vcmp.gt.f32.partialorder %v4742_v24, 0.0 }
 0x157   : > { %3428 = vpow2.f32 %v1706_v36  ;;  %v1035_v14 = vadd.f32 %v1034_v17, %v4622_v23  ;;  %v1704_v19 = vmul.f32 1.442695, %v4748_v42  ;;  %v1768_v10 = vmul.f32 1.442695, %v4750_v11 }
 0x158   : > { %3430 = vpow2.f32 %v1770_v39  ;;  %v1427_v12 = vpop.f32.mrf.mxu0  ;;  %v3234_v16 = vpop.f32.mrf.mxu1  ;;  %v4757_v9 = vadd.f32 %v4620_v22, %v1040_v15  ;;  %v4759_v20 = vadd.f32 %v3343_v13, %v1040_v15  ;;  %vm1640_vm3 = vcmp.gt.f32.partialorder %v4748_v42, 0.0 }
 0x159   : > { %v4762_v27 = vadd.f32 %v4624_v25, %v1035_v14  ;;  %3432 = vpow2.f32 %v1704_v19  ;;  %v4764_v21 = vadd.f32 %v1427_v12, %v1035_v14  ;;  %v1050_v23 = vadd.f32 %v3234_v16, %v4626_v26 }
 0x15a   : > { %v1044_v30 = vpop.f32.mrf.mxu1  ;;  %v3346_v33 = vpop.f32.mrf.mxu0  ;;  %3434 = vpow2.f32 %v1768_v10  ;;  %v1710_v36 = vmul.f32 1.442695, %v4757_v9  ;;  %v1774_v39 = vmul.f32 1.442695, %v4759_v20  ;;  %vm1672_vm4 = vcmp.gt.f32.partialorder %v4750_v11, 0.0 }
 0x15b   : > { %v1708_v22 = vmul.f32 1.442695, %v4762_v27  ;;  %v1772_v25 = vmul.f32 1.442695, %v4764_v21  ;;  %v4772_v13 = vadd.f32 %v4628_v28, %v1050_v23  ;;  %v1045_v14 = vadd.f32 %v1044_v30, %v4630_v29 }
 0x15c   : > { %v3237_v17 = vpop.f32.mrf.mxu1  ;;  %v1437_v15 = vpop.f32.mrf.mxu0  ;;  %3436 = vpow2.f32 %v1710_v36  ;;  %v4775_v26 = vadd.f32 %v3346_v33, %v1050_v23  ;;  %vm1643_vm5 = vcmp.gt.f32.partialorder %v4757_v9, 0.0  ;;  %vm1675_vm6 = vcmp.gt.f32.partialorder %v4759_v20, 0.0 }
 0x15d   : > { %3438 = vpow2.f32 %v1774_v39  ;;  %v1060_v10 = vadd.f32 %v3237_v17, %v4634_v32  ;;  %v1714_v16 = vmul.f32 1.442695, %v4772_v13  ;;  %v4780_v8 = vadd.f32 %v4632_v31, %v1045_v14 }
 0x15e   : > { %v1054_v19 = vpop.f32.mrf.mxu1  ;;  %v3349_v12 = vpop.f32.mrf.mxu0  ;;  %3440 = vpow2.f32 %v1708_v22  ;;  %v1778_v36 = vmul.f32 1.442695, %v4775_v26  ;;  %v4788_v32 = vadd.f32 %v1437_v15, %v1045_v14  ;;  %vm1642_vm7 = vcmp.gt.f32.partialorder %v4762_v27, 0.0 }
 0x15f   : > { %3442 = vpow2.f32 %v1772_v25  ;;  %v4784_v28 = vadd.f32 %v4636_v34, %v1060_v10  ;;  %v1712_v29 = vmul.f32 1.442695, %v4780_v8  ;;  %v1055_v33 = vadd.f32 %v1054_v19, %v4638_v35 }
 0x160   : > { %3444 = vpow2.f32 %v1714_v16  ;;  %v3240_v23 = vpop.f32.mrf.mxu1  ;;  %v1447_v30 = vpop.f32.mrf.mxu0  ;;  %v1776_v34 = vmul.f32 1.442695, %v4788_v32  ;;  %v4795_v39 = vadd.f32 %v3349_v12, %v1060_v10  ;;  %vm1674_vm8 = vcmp.gt.f32.partialorder %v4764_v21, 0.0 }
 0x161   : > { %3446 = vpow2.f32 %v1778_v36  ;;  %v1718_v31 = vmul.f32 1.442695, %v4784_v28  ;;  %v4799_v17 = vadd.f32 %v4640_v37, %v1055_v33  ;;  %v4802_v15 = vadd.f32 %v3240_v23, %v4642_v38 }
 0x162   : > { %3448 = vpow2.f32 %v1712_v29  ;;  %v4804_v25 = vadd.f32 %v1447_v30, %v1055_v33  ;;  %v1782_v19 = vmul.f32 1.442695, %v4795_v39  ;;  %v1064_v29 = vpop.f32.mrf.mxu1  ;;  %vm1645_vm9 = vcmp.gt.f32.partialorder %v4772_v13, 0.0 }
 0x163   : > { %3450 = vpow2.f32 %v1718_v31  ;;  %v1716_v12 = vmul.f32 1.442695, %v4799_v17  ;;  %v4812_v37 = vadd.f32 %v4644_v40, %v4802_v15  ;;  %vm1644_vm10 = vcmp.gt.f32.partialorder %v4780_v8, 0.0 }
 0x164   : > { %v3429_v22 = vpop.eup %3428  ;;  %3452 = vpow2.f32 %v1776_v34  ;;  %v1780_v36 = vmul.f32 1.442695, %v4804_v25  ;;  %vm1677_vm11 = vcmp.gt.f32.partialorder %v4775_v26, 0.0  ;;  %vm1647_vm12 = vcmp.gt.f32.partialorder %v4784_v28, 0.0 }
 0x165   : > { %v3431_v14 = vpop.eup %3430  ;;  %v2924_v35 = vadd.f32 -1.0, %v3429_v22  ;;  %3454 = vpow2.f32 %v1716_v12  ;;  %vm1676_vm13 = vcmp.gt.f32.partialorder %v4788_v32, 0.0  ;;  %vm1679_vm14 = vcmp.gt.f32.partialorder %v4795_v39, 0.0 }
 0x166   : > { %v2956_v10 = vadd.f32 -1.0, %v3431_v14  ;;  %v3433_v38 = vpop.eup %3432  ;;  %3456 = vpow2.f32 %v1782_v19  ;;  %vm1646_vm15 = vcmp.gt.f32.partialorder %v4799_v17, 0.0 }
 0x167   : > { %v1897_v16 = vsel %vm1641_vm1, %v4740_v18, %v2924_v35  ;;  %v3435_v23 = vpop.eup %3434  ;;  %v2923_v40 = vadd.f32 -1.0, %v3433_v38  ;;  %v4831_v35 = vadd.f32 %v1064_v29, %v4646_v41  ;;  %3458 = vpow2.f32 %v1780_v36 }
 0x168   : > { %v1929_v30 = vsel %vm1673_vm2, %v4742_v24, %v2956_v10  ;;  %v1963_v31 = vsel %vm540_vm0, %v1897_v16, -inf  ;;  %v2955_v22 = vadd.f32 -1.0, %v3435_v23  ;;  %v1722_v24 = vmul.f32 1.442695, %v4812_v37 }
 0x169   : > { %v1964_v33 = vsel %vm540_vm0, %v1929_v30, -inf  ;;  %v3437_v18 = vpop.eup %3436  ;;  %v1896_v14 = vsel %vm1640_vm3, %v4748_v42, %v2923_v40  ;;  %vm1678_vm1 = vcmp.gt.f32.partialorder %v4804_v25, 0.0  ;;  %vm1649_vm2 = vcmp.gt.f32.partialorder %v4812_v37, 0.0 }
 0x16a   : > { %v1965_v34 = vmax.f32 %v1963_v31, %v1964_v33  ;;  %v3439_v10 = vpop.eup %3438  ;;  %v1928_v12 = vsel %vm1672_vm4, %v4750_v11, %v2955_v22  ;;  %v1960_v19 = vsel %vm540_vm0, %v1896_v14, -inf  ;;  %v2926_v38 = vadd.f32 -1.0, %v3437_v18 }
 0x16b   : > { %v3441_v23 = vpop.eup %3440  ;;  %v1961_v42 = vsel %vm540_vm0, %v1928_v12, -inf  ;;  %v2958_v40 = vadd.f32 -1.0, %v3439_v10  ;;  %v4843_v11 = vadd.f32 %v4648_v43, %v4831_v35  ;;  %3460 = vpow2.f32 %v1722_v24 }
 0x16c   : > { %v2057_v31 = vsub.f32 %v1897_v16, %v1965_v34  ;;  %v2089_v33 = vsub.f32 %v1929_v30, %v1965_v34  ;;  %v3443_v7 = vpop.eup %3442  ;;  %v1962_v5 = vmax.f32 %v1960_v19, %v1961_v42  ;;  %v1899_v41 = vsel %vm1643_vm5, %v4757_v9, %v2926_v38 }
 0x16d   : > { %v2925_v29 = vadd.f32 -1.0, %v3441_v23  ;;  %v3445_v22 = vpop.eup %3444  ;;  %v1931_v16 = vsel %vm1675_vm6, %v4759_v20, %v2958_v40  ;;  %v1969_v36 = vsel %vm540_vm0, %v1899_v41, -inf  ;;  %v2957_v38 = vadd.f32 -1.0, %v3443_v7 }
 0x16e   : > { %v3447_v30 = vpop.eup %3446  ;;  %v2056_v18 = vsub.f32 %v1896_v14, %v1962_v5  ;;  %v2088_v34 = vsub.f32 %v1928_v12, %v1962_v5  ;;  %v1970_v9 = vsel %vm540_vm0, %v1931_v16, -inf  ;;  %v2122_v19 = vmul.f32 1.442695, %v2057_v31 }
 0x16f   : > { %v1898_v43 = vsel %vm1642_vm7, %v4762_v27, %v2925_v29  ;;  %v3449_v10 = vpop.eup %3448  ;;  %v1971_v20 = vmax.f32 %v1969_v36, %v1970_v9  ;;  %v2186_v23 = vmul.f32 1.442695, %v2089_v33  ;;  %v2928_v40 = vadd.f32 -1.0, %v3445_v22 }
 0x170   : > { %v1966_v42 = vsel %vm540_vm0, %v1898_v43, -inf  ;;  %v3451_v5 = vpop.eup %3450  ;;  %v1930_v27 = vsel %vm1674_vm8, %v4764_v21, %v2957_v38  ;;  %v2927_v29 = vadd.f32 -1.0, %v3449_v10  ;;  %v2120_v6 = vmul.f32 1.442695, %v2056_v18 }
 0x171   : > { %v2059_v14 = vsub.f32 %v1899_v41, %v1971_v20  ;;  %v2091_v12 = vsub.f32 %v1931_v16, %v1971_v20  ;;  %v1967_v31 = vsel %vm540_vm0, %v1930_v27, -inf  ;;  %v1901_v7 = vsel %vm1645_vm9, %v4772_v13, %v2928_v40  ;;  %v3453_v22 = vpop.eup %3452 }
 0x172   : > { %v2960_v33 = vadd.f32 -1.0, %v3447_v30  ;;  %3462 = vpow2.f32 %v2122_v19  ;;  %v2184_v24 = vmul.f32 1.442695, %v2088_v34  ;;  %v1968_v41 = vmax.f32 %v1966_v42, %v1967_v31  ;;  %v3455_v16 = vpop.eup %3454  ;;  %v3352_v19 = vpop.f32.mrf.mxu0 }
 0x173   : > { %v1900_v21 = vsel %vm1644_vm10, %v4780_v8, %v2927_v29  ;;  %v1975_v13 = vsel %vm540_vm0, %v1901_v7, -inf  ;;  %v2930_v30 = vadd.f32 -1.0, %v3451_v5  ;;  %v3457_v18 = vpop.eup %3456  ;;  %3464 = vpow2.f32 %v2186_v23  ;;  %v3243_v42 = vpop.f32.mrf.mxu1 }
 0x174   : > { %v1933_v36 = vsel %vm1677_vm11, %v4775_v26, %v2960_v33  ;;  %v2058_v34 = vsub.f32 %v1898_v43, %v1968_v41  ;;  %v2090_v9 = vsub.f32 %v1930_v27, %v1968_v41  ;;  %3466 = vpow2.f32 %v2120_v6  ;;  %v3459_v40 = vpop.eup %3458 }
 0x175   : > { %v1976_v10 = vsel %vm540_vm0, %v1933_v36, -inf  ;;  %v2126_v20 = vmul.f32 1.442695, %v2059_v14  ;;  %v2959_v8 = vadd.f32 -1.0, %v3453_v22  ;;  %v2190_v29 = vmul.f32 1.442695, %v2091_v12 }
 0x176   : > { %v1977_v38 = vmax.f32 %v1975_v13, %v1976_v10  ;;  %v1903_v26 = vsel %vm1647_vm12, %v4784_v28, %v2930_v30  ;;  %v1972_v5 = vsel %vm540_vm0, %v1900_v21, -inf  ;;  %v2929_v31 = vadd.f32 -1.0, %v3455_v16  ;;  %v1457_v28 = vpop.f32.mrf.mxu0 }
 0x177   : > { %3468 = vpow2.f32 %v2184_v24  ;;  %v1932_v23 = vsel %vm1676_vm13, %v4788_v32, %v2959_v8  ;;  %v2962_v6 = vadd.f32 -1.0, %v3457_v18  ;;  %v2124_v14 = vmul.f32 1.442695, %v2058_v34  ;;  %v1074_v24 = vpop.f32.mrf.mxu1 }
 0x178   : > { %v2061_v43 = vsub.f32 %v1901_v7, %v1977_v38  ;;  %v2093_v27 = vsub.f32 %v1933_v36, %v1977_v38  ;;  %v1973_v33 = vsel %vm540_vm0, %v1932_v23, -inf  ;;  %v4887_v12 = vsel %vm1646_vm15, %v4799_v17, %v2929_v31  ;;  %v3461_v34 = vpop.eup %3460 }
 0x179   : > { %3470 = vpow2.f32 %v2126_v20  ;;  %v2188_v22 = vmul.f32 1.442695, %v2090_v9  ;;  %v1974_v41 = vmax.f32 %v1972_v5, %v1973_v33  ;;  %v1981_v7 = vsel %vm540_vm0, %v1903_v26, -inf  ;;  %v3246_v38 = vpop.f32.mrf.mxu1 }
 0x17a   : > { %3472 = vpow2.f32 %v2190_v29  ;;  %v2130_v16 = vmul.f32 1.442695, %v2061_v43  ;;  %v4893_v32 = vsel %vm1679_vm14, %v4795_v39, %v2962_v6  ;;  %v2961_v36 = vadd.f32 -1.0, %v3459_v40  ;;  %v3355_v39 = vpop.f32.mrf.mxu0 }
 0x17b   : > { %v2060_v13 = vsub.f32 %v1900_v21, %v1974_v41  ;;  %v2092_v30 = vsub.f32 %v1932_v23, %v1974_v41  ;;  %v1982_v17 = vsel %vm540_vm0, %v4893_v32, -inf  ;;  %v1978_v18 = vsel %vm540_vm0, %v4887_v12, -inf }
 0x17c   : > { %3474 = vpow2.f32 %v2124_v14  ;;  %v2194_v9 = vmul.f32 1.442695, %v2093_v27  ;;  %v1983_v10 = vmax.f32 %v1981_v7, %v1982_v17  ;;  %v4902_v20 = vsel %vm1678_vm1, %v4804_v25, %v2961_v36  ;;  %v1467_v6 = vpop.f32.mrf.mxu0 }
 0x17d   : > { %3476 = vpow2.f32 %v2188_v22  ;;  %v1979_v21 = vsel %vm540_vm0, %v4902_v20, -inf  ;;  %v1720_v5 = vmul.f32 1.442695, %v4843_v11  ;;  %v2128_v43 = vmul.f32 1.442695, %v2060_v13  ;;  %v1084_v22 = vpop.f32.mrf.mxu1 }
 0x17e   : > { %v2063_v8 = vsub.f32 %v1903_v26, %v1983_v10  ;;  %v2095_v40 = vsub.f32 %v4893_v32, %v1983_v10  ;;  %v4907_v29 = vmax.f32 %v1978_v18, %v1979_v21  ;;  %3478 = vpow2.f32 %v2130_v16  ;;  %v3358_v32 = vpop.f32.mrf.mxu0 }
 0x17f   : > { %v4910_v31 = vpop.eup %3462  ;;  %v4913_v25 = vadd.f32 %v3352_v19, %v4802_v15  ;;  %v1080_v23 = vadd.f32 %v3243_v42, %v4650_v44  ;;  %3480 = vpow2.f32 %v2194_v9  ;;  %v2192_v26 = vmul.f32 1.442695, %v2092_v30  ;;  %v3249_v30 = vpop.f32.mrf.mxu1 }
 0x180   : > { %v4916_v14 = vpop.eup %3464  ;;  %v2062_v27 = vsub.f32 %v4887_v12, %v4907_v29  ;;  %v2094_v33 = vsub.f32 %v4902_v20, %v4907_v29  ;;  %3482 = vpow2.f32 %v1720_v5  ;;  %v2134_v7 = vmul.f32 1.442695, %v2063_v8  ;;  %v1477_v10 = vpop.f32.mrf.mxu0 }
 0x181   : > { %v4922_v41 = vpop.eup %3466  ;;  %v1786_v15 = vmul.f32 1.442695, %v4913_v25  ;;  %v4926_v44 = vadd.f32 %v4652_v45, %v1080_v23  ;;  %v4929_v19 = vadd.f32 %v1457_v28, %v4831_v35  ;;  %3484 = vpow2.f32 %v2128_v43 }
 0x182   : > { %v1075_v42 = vadd.f32 %v1074_v24, %v4654_v46  ;;  %v4939_v45 = vadd.f32 %v3355_v39, %v1080_v23  ;;  %v1090_v46 = vadd.f32 %v3246_v38, %v4658_v48  ;;  %v1085_v24 = vadd.f32 %v1084_v22, %v4662_v50  ;;  %v1094_v50 = vpop.f32.mrf.mxu1 }
 0x183   : > { %3486 = vpow2.f32 %v1786_v15  ;;  %v1726_v16 = vmul.f32 1.442695, %v4926_v44  ;;  %v1784_v36 = vmul.f32 1.442695, %v4929_v19  ;;  %v2198_v38 = vmul.f32 1.442695, %v2095_v40 }
 0x184   : > { %v4932_v12 = vpop.eup %3468  ;;  %3488 = vpow2.f32 %v2192_v26  ;;  %v4937_v13 = vadd.f32 %v4656_v47, %v1075_v42  ;;  %v4944_v28 = vadd.f32 %v1467_v6, %v1075_v42  ;;  %v1790_v47 = vmul.f32 1.442695, %v4939_v45  ;;  %v3252_v22 = vpop.f32.mrf.mxu1 }
 0x185   : > { %6268 = vst [vmem:[#allocation25_spill] sm:$0xff] %v4932_v12  ;;  %3490 = vpow2.f32 %v2134_v7  ;;  %v4952_v9 = vadd.f32 %v4660_v49, %v1090_v46  ;;  %v4958_v39 = vadd.f32 %v4664_v51, %v1085_v24  ;;  %v2932_v8 = vadd.f32 -1.0, %v3461_v34  ;;  %v3361_v34 = vpop.f32.mrf.mxu0 }
 0x186   : > { %v4941_v35 = vpop.eup %3470  ;;  %3492 = vpow2.f32 %v1726_v16  ;;  %v1724_v18 = vmul.f32 1.442695, %v4937_v13  ;;  %v1788_v48 = vmul.f32 1.442695, %v4944_v28  ;;  %v2132_v5 = vmul.f32 1.442695, %v2062_v27 }
 0x187   : > { %v4947_v17 = vpop.eup %3472  ;;  %3494 = vpow2.f32 %v1784_v36  ;;  %v1730_v29 = vmul.f32 1.442695, %v4952_v9  ;;  %v1728_v49 = vmul.f32 1.442695, %v4958_v39  ;;  %v4964_v43 = vadd.f32 %v3358_v32, %v1090_v46 }
 0x188   : > { %3496 = vpow2.f32 %v1724_v18  ;;  %v1100_v51 = vadd.f32 %v3249_v30, %v4666_v52  ;;  %v4969_v6 = vadd.f32 %v1477_v10, %v1085_v24  ;;  %v4972_v26 = vadd.f32 %v1094_v50, %v4670_v54 }
 0x189   : > { %v4954_v20 = vpop.eup %3474  ;;  %3498 = vpow2.f32 %v1790_v47  ;;  %v1794_v27 = vmul.f32 1.442695, %v4964_v43  ;;  %v4979_v15 = vsel %vm1649_vm2, %v4812_v37, %v2932_v8  ;;  %v2196_v42 = vmul.f32 1.442695, %v2094_v33  ;;  %v1104_v33 = vpop.f32.mrf.mxu1 }
 0x18a   : > { %v4960_v21 = vpop.eup %3476  ;;  %3500 = vpow2.f32 %v1788_v48  ;;  %v4982_v52 = vadd.f32 %v4668_v53, %v1100_v51  ;;  %v1792_v54 = vmul.f32 1.442695, %v4969_v6  ;;  %v4987_v16 = vadd.f32 %v4672_v55, %v4972_v26 }
 0x18b   : > { %6269 = vst [vmem:[#allocation26_spill] sm:$0xff] %v4960_v21  ;;  %v4966_v23 = vpop.eup %3478  ;;  %3502 = vpow2.f32 %v1730_v29  ;;  %v4989_v32 = vadd.f32 %v3361_v34, %v1100_v51  ;;  %vm1648_vm3 = vcmp.gt.f32.partialorder %v4843_v11, 0.0  ;;  %vm1681_vm4 = vcmp.gt.f32.partialorder %v4913_v25, 0.0 }
 0x18c   : > { %v4974_v40 = vpop.eup %3480  ;;  %3504 = vpow2.f32 %v1728_v49  ;;  %v1734_v37 = vmul.f32 1.442695, %v4982_v52  ;;  %v1987_v53 = vsel %vm540_vm0, %v4979_v15, -inf  ;;  %vm1651_vm5 = vcmp.gt.f32.partialorder %v4926_v44, 0.0 }
 0x18d   : > { %6270 = vst [vmem:[#allocation27_spill] sm:$0xff] %v4974_v40  ;;  %v3483_v7 = vpop.eup %3482  ;;  %3506 = vpow2.f32 %v2198_v38  ;;  %v5002_v18 = vadd.f32 %v3252_v22, %v4674_v56  ;;  %vm1680_vm6 = vcmp.gt.f32.partialorder %v4929_v19, 0.0  ;;  %vm1650_vm7 = vcmp.gt.f32.partialorder %v4937_v13, 0.0 }
 0x18e   : > { %3508 = vpow2.f32 %v1794_v27  ;;  %v4991_v36 = vpop.eup %3484  ;;  %v2931_v30 = vadd.f32 -1.0, %v3483_v7  ;;  %v1798_v10 = vmul.f32 1.442695, %v4989_v32  ;;  %vm1683_vm8 = vcmp.gt.f32.partialorder %v4939_v45, 0.0 }
 0x18f   : > { %3510 = vpow2.f32 %v2132_v5  ;;  %v5017_v56 = vadd.f32 %v1104_v33, %v4678_v58  ;;  %vm1682_vm9 = vcmp.gt.f32.partialorder %v4944_v28, 0.0  ;;  %vm1653_vm10 = vcmp.gt.f32.partialorder %v4952_v9, 0.0 }
 0x190   : > { %v3487_v46 = vpop.eup %3486  ;;  %3512 = vpow2.f32 %v1792_v54  ;;  %v1904_v50 = vsel %vm1648_vm3, %v4843_v11, %v2931_v30  ;;  %v5024_v11 = vadd.f32 %v4676_v57, %v5002_v18  ;;  %vm1652_vm11 = vcmp.gt.f32.partialorder %v4958_v39, 0.0 }
 0x191   : > { %v4998_v55 = vpop.eup %3488  ;;  %v2964_v24 = vadd.f32 -1.0, %v3487_v46  ;;  %3514 = vpow2.f32 %v1734_v37  ;;  %v1984_v27 = vsel %vm540_vm0, %v1904_v50, -inf  ;;  %v5034_v7 = vadd.f32 %v4680_v59, %v5017_v56 }
 0x192   : > { %6271 = vst [vmem:[#allocation28_spill] sm:$0xff] %v4998_v55  ;;  %v5004_v47 = vpop.eup %3490  ;;  %3516 = vpow2.f32 %v2196_v42  ;;  %vm1685_vm12 = vcmp.gt.f32.partialorder %v4964_v43, 0.0  ;;  %vm1655_vm13 = vcmp.gt.f32.partialorder %v4982_v52, 0.0  ;;  %vm1684_vm14 = vcmp.gt.f32.partialorder %v4969_v6, 0.0 }
 0x193   : > { %6272 = vst [vmem:[#allocation29_spill] sm:$0xff] %v5004_v47  ;;  %v3493_v48 = vpop.eup %3492  ;;  %v1937_v38 = vsel %vm1681_vm4, %v4913_v25, %v2964_v24  ;;  %3518 = vpow2.f32 %v1798_v10  ;;  %vm1687_vm15 = vcmp.gt.f32.partialorder %v4989_v32, 0.0  ;;  %vm1654_vm1 = vcmp.gt.f32.partialorder %v4987_v16, 0.0 }
 0x194   : > { %v3495_v8 = vpop.eup %3494  ;;  %v1988_v29 = vsel %vm540_vm0, %v1937_v38, -inf  ;;  %v2934_v5 = vadd.f32 -1.0, %v3493_v48  ;;  %v1738_v48 = vmul.f32 1.442695, %v5024_v11  ;;  %vm1657_vm2 = vcmp.gt.f32.partialorder %v5024_v11, 0.0 }
 0x195   : > { %v3497_v49 = vpop.eup %3496  ;;  %v1989_v51 = vmax.f32 %v1987_v53, %v1988_v29  ;;  %v2963_v34 = vadd.f32 -1.0, %v3495_v8  ;;  %vm1656_vm4 = vcmp.gt.f32.partialorder %v5034_v7, 0.0 }
 0x196   : > { %v3499_v25 = vpop.eup %3498  ;;  %v5029_v58 = vsel %vm1651_vm5, %v4926_v44, %v2934_v5  ;;  %v2933_v22 = vadd.f32 -1.0, %v3497_v49  ;;  %v1732_v44 = vmul.f32 1.442695, %v4987_v16 }
 0x197   : > { %v3501_v54 = vpop.eup %3500  ;;  %v2065_v42 = vsub.f32 %v4979_v15, %v1989_v51  ;;  %v1936_v57 = vsel %vm1680_vm6, %v4929_v19, %v2963_v34  ;;  %v2966_v30 = vadd.f32 -1.0, %v3499_v25  ;;  %v1993_v15 = vsel %vm540_vm0, %v5029_v58, -inf }
 0x198   : > { %v3503_v37 = vpop.eup %3502  ;;  %v1985_v46 = vsel %vm540_vm0, %v1936_v57, -inf  ;;  %v1906_v59 = vsel %vm1650_vm7, %v4937_v13, %v2933_v22  ;;  %v2965_v53 = vadd.f32 -1.0, %v3501_v54  ;;  %v2097_v19 = vsub.f32 %v1937_v38, %v1989_v51  ;;  %v1487_v38 = vpop.f32.mrf.mxu0 }
 0x199   : > { %v3505_v33 = vpop.eup %3504  ;;  %v1986_v24 = vmax.f32 %v1984_v27, %v1985_v46  ;;  %v1939_v10 = vsel %vm1683_vm8, %v4939_v45, %v2966_v30  ;;  %v2138_v29 = vmul.f32 1.442695, %v2065_v42  ;;  %v2936_v49 = vadd.f32 -1.0, %v3503_v37 }
 0x19a   : > { %v5053_v8 = vpop.eup %3506  ;;  %v1994_v5 = vsel %vm540_vm0, %v1939_v10, -inf  ;;  %v1938_v13 = vsel %vm1682_vm9, %v4944_v28, %v2965_v53  ;;  %v1990_v27 = vsel %vm540_vm0, %v1906_v59, -inf  ;;  %v2935_v28 = vadd.f32 -1.0, %v3505_v33 }
 0x19b   : > { %6273 = vst [vmem:[#allocation30_spill] sm:$0xff] %v5053_v8  ;;  %v3509_v51 = vpop.eup %3508  ;;  %v2064_v34 = vsub.f32 %v1904_v50, %v1986_v24  ;;  %v2096_v45 = vsub.f32 %v1936_v57, %v1986_v24  ;;  %v1995_v25 = vmax.f32 %v1993_v15, %v1994_v5  ;;  %v1909_v54 = vsel %vm1653_vm10, %v4952_v9, %v2936_v49  ;;  %v3364_v5 = vpop.f32.mrf.mxu0 }
 0x19c   : > { %v5062_v22 = vpop.eup %3510  ;;  %v1991_v42 = vsel %vm540_vm0, %v1938_v13, -inf  ;;  %3520 = vpow2.f32 %v1732_v44  ;;  %v2202_v37 = vmul.f32 1.442695, %v2097_v19  ;;  %v2968_v24 = vadd.f32 -1.0, %v3509_v51  ;;  %v3255_v19 = vpop.f32.mrf.mxu1 }
 0x19d   : > { %v3513_v30 = vpop.eup %3512  ;;  %v2136_v46 = vmul.f32 1.442695, %v2064_v34  ;;  %3522 = vpow2.f32 %v1738_v48  ;;  %v2067_v57 = vsub.f32 %v5029_v58, %v1995_v25  ;;  %v2099_v15 = vsub.f32 %v1939_v10, %v1995_v25 }
 0x19e   : > { %v3515_v50 = vpop.eup %3514  ;;  %v1992_v53 = vmax.f32 %v1990_v27, %v1991_v42  ;;  %3524 = vpow2.f32 %v2138_v29  ;;  %v1999_v9 = vsel %vm540_vm0, %v1909_v54, -inf  ;;  %v5074_v44 = vadd.f32 %v1487_v38, %v4972_v26  ;;  %v1114_v42 = vpop.f32.mrf.mxu1 }
 0x19f   : > { %v5070_v47 = vpop.eup %3516  ;;  %v2938_v33 = vadd.f32 -1.0, %v3515_v50  ;;  %v1908_v58 = vsel %vm1652_vm11, %v4958_v39, %v2935_v28  ;;  %v1941_v10 = vsel %vm1685_vm12, %v4964_v43, %v2968_v24  ;;  %3526 = vpow2.f32 %v2202_v37 }
 0x1a0   : > { %6274 = vst [vmem:[#allocation31_spill] sm:$0xff] %v5070_v47  ;;  %v2066_v49 = vsub.f32 %v1906_v59, %v1992_v53  ;;  %v2098_v34 = vsub.f32 %v1938_v13, %v1992_v53  ;;  %v3519_v48 = vpop.eup %3518  ;;  %v2200_v29 = vmul.f32 1.442695, %v2096_v45  ;;  %v2000_v51 = vsel %vm540_vm0, %v1941_v10, -inf  ;;  %v1497_v59 = vpop.f32.mrf.mxu0 }
 0x1a1   : > { %v2967_v25 = vadd.f32 -1.0, %v3513_v30  ;;  %3528 = vpow2.f32 %v2136_v46  ;;  %v2142_v26 = vmul.f32 1.442695, %v2067_v57  ;;  %v2206_v38 = vmul.f32 1.442695, %v2099_v15 }
 0x1a2   : > { %v2001_v27 = vmax.f32 %v1999_v9, %v2000_v51  ;;  %v5086_v13 = vsel %vm1655_vm13, %v4982_v52, %v2938_v33  ;;  %v1996_v43 = vsel %vm540_vm0, %v1908_v58, -inf  ;;  %v2970_v45 = vadd.f32 -1.0, %v3519_v48  ;;  %v3367_v53 = vpop.f32.mrf.mxu0 }
 0x1a3   : > { %v1940_v39 = vsel %vm1684_vm14, %v4969_v6, %v2967_v25  ;;  %v2140_v28 = vmul.f32 1.442695, %v2066_v49  ;;  %3530 = vpow2.f32 %v2200_v29  ;;  %v2204_v50 = vmul.f32 1.442695, %v2098_v34  ;;  %v3258_v49 = vpop.f32.mrf.mxu1 }
 0x1a4   : > { %v2069_v30 = vsub.f32 %v1909_v54, %v2001_v27  ;;  %v2101_v37 = vsub.f32 %v1941_v10, %v2001_v27  ;;  %v1997_v46 = vsel %vm540_vm0, %v1940_v39, -inf  ;;  %v5096_v52 = vsel %vm1687_vm15, %v4989_v32, %v2970_v45 }
 0x1a5   : > { %v1998_v57 = vmax.f32 %v1996_v43, %v1997_v46  ;;  %3532 = vpow2.f32 %v2142_v26  ;;  %v2005_v6 = vsel %vm540_vm0, %v5086_v13, -inf  ;;  %v2006_v15 = vsel %vm540_vm0, %v5096_v52, -inf  ;;  %v1124_v27 = vpop.f32.mrf.mxu1 }
 0x1a6   : > { %v1796_v54 = vmul.f32 1.442695, %v5074_v44  ;;  %3534 = vpow2.f32 %v2206_v38  ;;  %v2146_v24 = vmul.f32 1.442695, %v2069_v30  ;;  %v2210_v34 = vmul.f32 1.442695, %v2101_v37  ;;  %v1507_v38 = vpop.f32.mrf.mxu0 }
 0x1a7   : > { %v2068_v9 = vsub.f32 %v1908_v58, %v1998_v57  ;;  %v2100_v33 = vsub.f32 %v1940_v39, %v1998_v57  ;;  %3536 = vpow2.f32 %v2140_v28  ;;  %v5104_v32 = vadd.f32 %v3364_v5, %v5002_v18 }
 0x1a8   : > { %3538 = vpow2.f32 %v2204_v50  ;;  %v2007_v29 = vmax.f32 %v2005_v6, %v2006_v15  ;;  %v5108_v25 = vsel %vm540_vm0, %v4932_v12, 0.0  ;;  %v5112_v58 = vsel %vm540_vm0, %v4960_v21, 0.0 }
 0x1a9   : > { %v3521_v10 = vpop.eup %3520  ;;  %v2144_v48 = vmul.f32 1.442695, %v2068_v9  ;;  %v2208_v26 = vmul.f32 1.442695, %v2100_v33  ;;  %3540 = vpow2.f32 %v1796_v54  ;;  %v5116_v18 = vsel %vm540_vm0, %v4974_v40, 0.0  ;;  %v3370_v54 = vpop.f32.mrf.mxu0 }
 0x1aa   : > { %v3523_v51 = vpop.eup %3522  ;;  %3542 = vpow2.f32 %v2146_v24  ;;  %v1736_v5 = vmul.f32 1.442695, %v5034_v7  ;;  %v5123_v43 = vsel %vm540_vm0, %v4998_v55, 0.0  ;;  %v1802_v45 = vmul.f32 1.442695, %v5104_v32 }
 0x1ab   : > { %v5119_v39 = vpop.eup %3524  ;;  %3544 = vpow2.f32 %v2210_v34  ;;  %v1120_v28 = vadd.f32 %v3255_v19, %v4682_v60  ;;  %v2071_v30 = vsub.f32 %v5086_v13, %v2007_v29  ;;  %v5129_v37 = vadd.f32 %v1497_v59, %v5017_v56 }
 0x1ac   : > { %3546 = vpow2.f32 %v2144_v48  ;;  %v1115_v46 = vadd.f32 %v1114_v42, %v4686_v62  ;;  %v5132_v50 = vpop.eup %3526  ;;  %v1130_v15 = vadd.f32 %v3258_v49, %v4690_v0  ;;  %v2937_v19 = vadd.f32 -1.0, %v3521_v10  ;;  %v3261_v62 = vpop.f32.mrf.mxu1 }
 0x1ad   : > { %6275 = vst [vmem:[#allocation32_spill] sm:$0xff] %v5132_v50  ;;  %3548 = vpow2.f32 %v2208_v26  ;;  %v5135_v57 = vadd.f32 %v4684_v61, %v1120_v28  ;;  %v5137_v6 = vadd.f32 %v3367_v53, %v1120_v28  ;;  %v1800_v56 = vmul.f32 1.442695, %v5129_v37 }
 0x1ae   : > { %v5140_v60 = vpop.eup %3528  ;;  %3550 = vpow2.f32 %v1736_v5  ;;  %v5144_v59 = vadd.f32 %v4688_v63, %v1115_v46  ;;  %v2103_v61 = vsub.f32 %v5096_v52, %v2007_v29  ;;  %v2150_v42 = vmul.f32 1.442695, %v2071_v30  ;;  %v1517_v52 = vpop.f32.mrf.mxu0 }
 0x1af   : > { %3552 = vpow2.f32 %v1802_v45  ;;  %v1742_v13 = vmul.f32 1.442695, %v5135_v57  ;;  %v1806_v63 = vmul.f32 1.442695, %v5137_v6  ;;  %v5155_v24 = vadd.f32 %v4692_v1, %v1130_v15  ;;  %v1134_v48 = vpop.f32.mrf.mxu1 }
 0x1b0   : > { %3554 = vpow2.f32 %v1800_v56  ;;  %v1740_v0 = vmul.f32 1.442695, %v5144_v59  ;;  %v5151_v53 = vpop.eup %3530  ;;  %v5157_v9 = vadd.f32 %v1507_v38, %v1115_v46  ;;  %v5162_v49 = vsel %vm1654_vm1, %v4987_v16, %v2937_v19 }
 0x1b1   : > { %6276 = vst [vmem:[#allocation33_spill] sm:$0xff] %v5151_v53  ;;  %3556 = vpow2.f32 %v1742_v13  ;;  %v1125_v34 = vadd.f32 %v1124_v27, %v4694_v2  ;;  %v5165_v10 = vadd.f32 %v3370_v54, %v1130_v15  ;;  %v2214_v26 = vmul.f32 1.442695, %v2103_v61  ;;  %v3373_v15 = vpop.f32.mrf.mxu0  ;;  %v6282_v61 = vld [vmem:[#allocation6_spill] sm:$0xff] }
 0x1b2   : > { %v5159_v33 = vpop.eup %3532  ;;  %3558 = vpow2.f32 %v1740_v0  ;;  %v2940_v5 = vadd.f32 -1.0, %v3523_v51  ;;  %v1746_v1 = vmul.f32 1.442695, %v5155_v24  ;;  %v1804_v45 = vmul.f32 1.442695, %v5157_v9  ;;  %v6280_v51 = vld [vmem:[#allocation7_spill] sm:$0xff] }
 0x1b3   : > { %6277 = vst [vmem:[#allocation34_spill] sm:$0xff] %v5159_v33  ;;  %v5167_v29 = vpop.eup %3534  ;;  %3560 = vpow2.f32 %v1806_v63  ;;  %v5174_v16 = vadd.f32 %v4696_v3, %v1125_v34  ;;  %v1810_v2 = vmul.f32 1.442695, %v5165_v10  ;;  %v1140_v28 = vadd.f32 %v3261_v62, %v4698_v4  ;;  %v6284_v63 = vld [vmem:[#allocation8_spill] sm:$0xff] }
 0x1b4   : > { %6278 = vst [vmem:[#allocation35_spill] sm:$0xff] %v5167_v29  ;;  %v5170_v38 = vpop.eup %3536  ;;  %3562 = vpow2.f32 %v2150_v42  ;;  %v5180_v30 = vadd.f32 %v1517_v52, %v1125_v34  ;;  %v5183_v46 = vadd.f32 %v1134_v48, %v6280_v51  ;;  %vm1686_vm3 = vcmp.gt.f32.partialorder %v5074_v44, 0.0 }
 0x1b5   : > { %v5177_v27 = vpop.eup %3538  ;;  %3564 = vpow2.f32 %v1746_v1  ;;  %v2002_v3 = vsel %vm540_vm0, %v5162_v49, -inf  ;;  %v1744_v19 = vmul.f32 1.442695, %v5174_v16  ;;  %v5194_v4 = vsel %vm1657_vm2, %v5024_v11, %v2940_v5 }
 0x1b6   : > { %6279 = vst [vmem:[#allocation36_spill] sm:$0xff] %v5177_v27  ;;  %v3541_v54 = vpop.eup %3540  ;;  %3566 = vpow2.f32 %v1804_v45  ;;  %v5197_v13 = vadd.f32 %v6282_v61, %v1140_v28  ;;  %v1808_v0 = vmul.f32 1.442695, %v5180_v30  ;;  %v5204_v52 = vadd.f32 %v6284_v63, %v5183_v46 }
 0x1b7   : > { %v5189_v56 = vpop.eup %3542  ;;  %3568 = vpow2.f32 %v2214_v26  ;;  %v2969_v62 = vadd.f32 -1.0, %v3541_v54  ;;  %v5206_v34 = vadd.f32 %v3373_v15, %v1140_v28  ;;  %v5212_v11 = vsel %vm540_vm0, %v5053_v8, 0.0 }
 0x1b8   : > { %6281 = vst [vmem:[#allocation7_spill] sm:$0xff] %v5189_v56  ;;  %v5199_v42 = vpop.eup %3544  ;;  %3570 = vpow2.f32 %v1744_v19  ;;  %v1750_v5 = vmul.f32 1.442695, %v5197_v13  ;;  %vm1689_vm5 = vcmp.gt.f32.partialorder %v5104_v32, 0.0  ;;  %v2011_v15 = vsel %vm540_vm0, %v5194_v4, -inf }
 0x1b9   : > { %6283 = vst [vmem:[#allocation6_spill] sm:$0xff] %v5199_v42  ;;  %v5208_v48 = vpop.eup %3546  ;;  %v1942_v26 = vsel %vm1686_vm3, %v5074_v44, %v2969_v62  ;;  %3572 = vpow2.f32 %v1810_v2  ;;  %vm1688_vm6 = vcmp.gt.f32.partialorder %v5129_v37, 0.0  ;;  %vm1659_vm7 = vcmp.gt.f32.partialorder %v5135_v57, 0.0 }
 0x1ba   : > { %6285 = vst [vmem:[#allocation8_spill] sm:$0xff] %v5208_v48  ;;  %v5218_v1 = vpop.eup %3548  ;;  %v2003_v45 = vsel %vm540_vm0, %v1942_v26, -inf  ;;  %3574 = vpow2.f32 %v1808_v0  ;;  %vm1658_vm8 = vcmp.gt.f32.partialorder %v5144_v59, 0.0  ;;  %v1814_v54 = vmul.f32 1.442695, %v5206_v34 }
 0x1bb   : > { %6286 = vst [vmem:[#allocation37_spill] sm:$0xff] %v5218_v1  ;;  %v3551_v28 = vpop.eup %3550  ;;  %v2004_v51 = vmax.f32 %v2002_v3, %v2003_v45  ;;  %3576 = vpow2.f32 %v1750_v5  ;;  %vm1691_vm9 = vcmp.gt.f32.partialorder %v5137_v6, 0.0  ;;  %vm1661_vm10 = vcmp.gt.f32.partialorder %v5155_v24, 0.0 }
 0x1bc   : > { %v3553_v44 = vpop.eup %3552  ;;  %v2939_v2 = vadd.f32 -1.0, %v3551_v28  ;;  %3578 = vpow2.f32 %v1814_v54  ;;  %vm1690_vm11 = vcmp.gt.f32.partialorder %v5157_v9, 0.0  ;;  %vm1660_vm12 = vcmp.gt.f32.partialorder %v5174_v16, 0.0 }
 0x1bd   : > { %v3555_v19 = vpop.eup %3554  ;;  %v2070_v62 = vsub.f32 %v5162_v49, %v2004_v51  ;;  %v2102_v61 = vsub.f32 %v1942_v26, %v2004_v51  ;;  %v2972_v0 = vadd.f32 -1.0, %v3553_v44  ;;  %v1748_v49 = vmul.f32 1.442695, %v5204_v52 }
 0x1be   : > { %v3557_v3 = vpop.eup %3556  ;;  %v1912_v63 = vsel %vm1656_vm4, %v5034_v7, %v2939_v2  ;;  %v2971_v5 = vadd.f32 -1.0, %v3555_v19  ;;  %vm1693_vm13 = vcmp.gt.f32.partialorder %v5165_v10, 0.0  ;;  %vm1692_vm14 = vcmp.gt.f32.partialorder %v5180_v30, 0.0 }
 0x1bf   : > { %v3559_v45 = vpop.eup %3558  ;;  %v1945_v28 = vsel %vm1689_vm5, %v5104_v32, %v2972_v0  ;;  %v2942_v8 = vadd.f32 -1.0, %v3557_v3  ;;  %v2008_v44 = vsel %vm540_vm0, %v1912_v63, -inf  ;;  %v2148_v19 = vmul.f32 1.442695, %v2070_v62  ;;  %v3264_v62 = vpop.f32.mrf.mxu1 }
 0x1c0   : > { %v3561_v26 = vpop.eup %3560  ;;  %v2012_v51 = vsel %vm540_vm0, %v1945_v28, -inf  ;;  %v1944_v7 = vsel %vm1688_vm6, %v5129_v37, %v2971_v5  ;;  %v2941_v2 = vadd.f32 -1.0, %v3559_v45  ;;  %v2212_v55 = vmul.f32 1.442695, %v2102_v61 }
 0x1c1   : > { %v5245_v54 = vpop.eup %3562  ;;  %v2013_v40 = vmax.f32 %v2011_v15, %v2012_v51  ;;  %v1915_v32 = vsel %vm1659_vm7, %v5135_v57, %v2942_v8  ;;  %v2009_v0 = vsel %vm540_vm0, %v1944_v7, -inf  ;;  %v2974_v5 = vadd.f32 -1.0, %v3561_v26 }
 0x1c2   : > { %6287 = vst [vmem:[#allocation38_spill] sm:$0xff] %v5245_v54  ;;  %v3565_v3 = vpop.eup %3564  ;;  %v2010_v21 = vmax.f32 %v2008_v44, %v2009_v0  ;;  %v1914_v37 = vsel %vm1658_vm8, %v5144_v59, %v2941_v2  ;;  %v2017_v8 = vsel %vm540_vm0, %v1915_v32, -inf  ;;  %3580 = vpow2.f32 %v1748_v49 }
 0x1c3   : > { %v3567_v15 = vpop.eup %3566  ;;  %v2073_v45 = vsub.f32 %v5194_v4, %v2013_v40  ;;  %v2105_v51 = vsub.f32 %v1945_v28, %v2013_v40  ;;  %v2944_v57 = vadd.f32 -1.0, %v3565_v3  ;;  %v1947_v44 = vsel %vm1691_vm9, %v5137_v6, %v2974_v5  ;;  %v6289_v4 = vld [vmem:[#allocation9_spill] sm:$0xff] }
 0x1c4   : > { %v5258_v12 = vpop.eup %3568  ;;  %v2072_v54 = vsub.f32 %v1912_v63, %v2010_v21  ;;  %v2104_v61 = vsub.f32 %v1944_v7, %v2010_v21  ;;  %v2973_v59 = vadd.f32 -1.0, %v3567_v15  ;;  %v2018_v2 = vsel %vm540_vm0, %v1947_v44, -inf }
 0x1c5   : > { %6288 = vst [vmem:[#allocation39_spill] sm:$0xff] %v5258_v12  ;;  %v3571_v26 = vpop.eup %3570  ;;  %v5266_v40 = vadd.f32 %v3264_v62, %v6289_v4  ;;  %3582 = vpow2.f32 %v2148_v19  ;;  %v2154_v0 = vmul.f32 1.442695, %v2073_v45  ;;  %v2019_v3 = vmax.f32 %v2017_v8, %v2018_v2  ;;  %v1527_v19 = vpop.f32.mrf.mxu0 }
 0x1c6   : > { %v3573_v28 = vpop.eup %3572  ;;  %v1946_v21 = vsel %vm1690_vm11, %v5157_v9, %v2973_v59  ;;  %vm1663_vm15 = vcmp.gt.f32.partialorder %v5197_v13, 0.0  ;;  %v1917_v63 = vsel %vm1661_vm10, %v5155_v24, %v2944_v57  ;;  %v2014_v49 = vsel %vm540_vm0, %v1914_v37, -inf  ;;  %v5278_v62 = vpop.f32.mrf.mxu1 }
 0x1c7   : > { %v3575_v6 = vpop.eup %3574  ;;  %v2015_v7 = vsel %vm540_vm0, %v1946_v21, -inf  ;;  %v2943_v5 = vadd.f32 -1.0, %v3571_v26  ;;  %vm1695_vm1 = vcmp.gt.f32.partialorder %v5206_v34, 0.0  ;;  %3584 = vpow2.f32 %v2212_v55 }
 0x1c8   : > { %v3577_v15 = vpop.eup %3576  ;;  %v2218_v9 = vmul.f32 1.442695, %v2105_v51  ;;  %v2075_v45 = vsub.f32 %v1915_v32, %v2019_v3  ;;  %v2016_v8 = vmax.f32 %v2014_v49, %v2015_v7  ;;  %v2152_v59 = vmul.f32 1.442695, %v2072_v54  ;;  %v3376_v54 = vpop.f32.mrf.mxu0 }
 0x1c9   : > { %v2216_v2 = vmul.f32 1.442695, %v2104_v61  ;;  %v2107_v4 = vsub.f32 %v1947_v44, %v2019_v3  ;;  %v2976_v56 = vadd.f32 -1.0, %v3573_v28  ;;  %3586 = vpow2.f32 %v2154_v0  ;;  %v3579_v33 = vpop.eup %3578  ;;  %v3267_v61 = vpop.f32.mrf.mxu1  ;;  %v6290_v28 = vld [vmem:[#allocation10_spill] sm:$0xff] }
 0x1ca   : > { %v2074_v24 = vsub.f32 %v1914_v37, %v2016_v8  ;;  %v1916_v57 = vsel %vm1660_vm12, %v5174_v16, %v2943_v5  ;;  %v2023_v26 = vsel %vm540_vm0, %v1917_v63, -inf  ;;  %v2106_v48 = vsub.f32 %v1946_v21, %v2016_v8 }
 0x1cb   : > { %v1949_v55 = vsel %vm1693_vm13, %v5165_v10, %v2976_v56  ;;  %v2946_v32 = vadd.f32 -1.0, %v3577_v15  ;;  %v2975_v51 = vadd.f32 -1.0, %v3575_v6  ;;  %3588 = vpow2.f32 %v2218_v9  ;;  %v1537_v9 = vpop.f32.mrf.mxu0 }
 0x1cc   : > { %v2158_v44 = vmul.f32 1.442695, %v2075_v45  ;;  %v2024_v37 = vsel %vm540_vm0, %v1949_v55, -inf  ;;  %v5290_v0 = vadd.f32 %v6290_v28, %v5266_v40  ;;  %3590 = vpow2.f32 %v2152_v59  ;;  %v1154_v45 = vpop.f32.mrf.mxu1 }
 0x1cd   : > { %v2222_v16 = vmul.f32 1.442695, %v2107_v4  ;;  %v2025_v3 = vmax.f32 %v2023_v26, %v2024_v37  ;;  %v2020_v21 = vsel %vm540_vm0, %v1916_v57, -inf  ;;  %3592 = vpow2.f32 %v2216_v2 }
 0x1ce   : > { %v2156_v49 = vmul.f32 1.442695, %v2074_v24  ;;  %v1948_v10 = vsel %vm1692_vm14, %v5180_v30, %v2975_v51  ;;  %v2978_v56 = vadd.f32 -1.0, %v3579_v33  ;;  %v5299_v5 = vsel %vm1663_vm15, %v5197_v13, %v2946_v32  ;;  %v3270_v51 = vpop.f32.mrf.mxu1 }
 0x1cf   : > { %v2077_v6 = vsub.f32 %v1917_v63, %v2025_v3  ;;  %v2109_v7 = vsub.f32 %v1949_v55, %v2025_v3  ;;  %v2021_v15 = vsel %vm540_vm0, %v1948_v10, -inf  ;;  %3594 = vpow2.f32 %v2158_v44  ;;  %v3581_v63 = vpop.eup %3580 }
 0x1d0   : > { %v2220_v8 = vmul.f32 1.442695, %v2106_v48  ;;  %v2022_v59 = vmax.f32 %v2020_v21, %v2021_v15  ;;  %v5305_v2 = vsel %vm1695_vm1, %v5206_v34, %v2978_v56  ;;  %v5309_v33 = vsel %vm540_vm0, %v5070_v47, 0.0  ;;  %v6294_v21 = vld [vmem:[#allocation11_spill] sm:$0xff] }
 0x1d1   : > { %3596 = vpow2.f32 %v2222_v16  ;;  %v2162_v30 = vmul.f32 1.442695, %v2077_v6  ;;  %v5312_v13 = vadd.f32 %v1527_v19, %v5183_v46  ;;  %v2029_v48 = vsel %vm540_vm0, %v5299_v5, -inf  ;;  %v3379_v19 = vpop.f32.mrf.mxu0 }
 0x1d2   : > { %v2076_v4 = vsub.f32 %v1916_v57, %v2022_v59  ;;  %v2108_v24 = vsub.f32 %v1948_v10, %v2022_v59  ;;  %v2030_v26 = vsel %vm540_vm0, %v5305_v2, -inf  ;;  %v5318_v34 = vpop.eup %3582  ;;  %v5322_v55 = vsel %vm540_vm0, %v5132_v50, 0.0 }
 0x1d3   : > { %6291 = vst [vmem:[#allocation9_spill] sm:$0xff] %v5318_v34  ;;  %3598 = vpow2.f32 %v2156_v49  ;;  %v2226_v32 = vmul.f32 1.442695, %v2109_v7  ;;  %v1754_v46 = vmul.f32 1.442695, %v5290_v0  ;;  %v5327_v57 = vsel %vm540_vm0, %v5151_v53, 0.0 }
 0x1d4   : > { %v5331_v44 = vsel %vm540_vm0, %v5167_v29, 0.0  ;;  %3600 = vpow2.f32 %v2220_v8  ;;  %v2160_v37 = vmul.f32 1.442695, %v2076_v4  ;;  %v5333_v28 = vpop.eup %3584  ;;  %v2224_v16 = vmul.f32 1.442695, %v2108_v24  ;;  %v6297_v8 = vld [vmem:[#allocation12_spill] sm:$0xff]  ;;  %v1547_v24 = vpop.f32.mrf.mxu0 }
 0x1d5   : > { %6292 = vst [vmem:[#allocation10_spill] sm:$0xff] %v5331_v44  ;;  %6293 = vst [vmem:[#allocation40_spill] sm:$0xff] %v5333_v28  ;;  %v2031_v3 = vmax.f32 %v2029_v48, %v2030_v26  ;;  %3602 = vpow2.f32 %v1754_v46  ;;  %v1145_v49 = vadd.f32 %v5278_v62, %v6294_v21  ;;  %v5339_v10 = vsel %vm540_vm0, %v5177_v27, 0.0  ;;  %v6298_v62 = vld [vmem:[#allocation13_spill] sm:$0xff]  ;;  %v1164_v48 = vpop.f32.mrf.mxu1  ;;  %v6300_v21 = vld [vmem:[#allocation14_spill] sm:$0xff] }
 0x1d6   : > { %3604 = vpow2.f32 %v2162_v30  ;;  %v1812_v56 = vmul.f32 1.442695, %v5312_v13  ;;  %v5343_v6 = vadd.f32 %v3376_v54, %v5266_v40  ;;  %v5345_v7 = vpop.eup %3586  ;;  %v5349_v15 = vsel %vm540_vm0, %v5199_v42, 0.0  ;;  %v6302_v42 = vld [vmem:[#allocation15_spill] sm:$0xff] }
 0x1d7   : > { %6295 = vst [vmem:[#allocation11_spill] sm:$0xff] %v5345_v7  ;;  %6296 = vst [vmem:[#allocation41_spill] sm:$0xff] %v5349_v15  ;;  %3606 = vpow2.f32 %v2226_v32  ;;  %v5352_v59 = vadd.f32 %v6297_v8, %v1145_v49  ;;  %v1160_v4 = vadd.f32 %v3267_v61, %v6298_v62  ;;  %v5357_v30 = vsel %vm540_vm0, %v5218_v1, 0.0  ;;  %v3273_v50 = vpop.f32.mrf.mxu1  ;;  %v6309_v1 = vld [vmem:[#allocation17_spill] sm:$0xff]  ;;  %v6310_v53 = vld [vmem:[#allocation19_spill] sm:$0xff] }
 0x1d8   : > { %3608 = vpow2.f32 %v2160_v37  ;;  %v2945_v40 = vadd.f32 -1.0, %v3581_v63  ;;  %v1818_v54 = vmul.f32 1.442695, %v5343_v6  ;;  %v5360_v26 = vpop.eup %3588  ;;  %v2079_v32 = vsub.f32 %v5299_v5, %v2031_v3 }
 0x1d9   : > { %6299 = vst [vmem:[#allocation12_spill] sm:$0xff] %v5360_v26  ;;  %3610 = vpow2.f32 %v2224_v16  ;;  %v1752_v46 = vmul.f32 1.442695, %v5352_v59  ;;  %v5365_v8 = vadd.f32 %v6300_v21, %v1160_v4  ;;  %v5367_v61 = vpop.eup %3590  ;;  %v5369_v62 = vadd.f32 %v1537_v9, %v1145_v49  ;;  %v3382_v21 = vpop.f32.mrf.mxu0 }
 0x1da   : > { %6301 = vst [vmem:[#allocation13_spill] sm:$0xff] %v5367_v61  ;;  %3612 = vpow2.f32 %v1812_v56  ;;  %v1155_v37 = vadd.f32 %v1154_v45, %v6302_v42  ;;  %v5372_v63 = vadd.f32 %v3379_v19, %v1160_v4  ;;  %v5374_v29 = vpop.eup %3592  ;;  %v5378_v16 = vsel %vm540_vm0, %v5258_v12, 0.0  ;;  %v6306_v45 = vld [vmem:[#allocation16_spill] sm:$0xff] }
 0x1db   : > { %6303 = vst [vmem:[#allocation14_spill] sm:$0xff] %v5374_v29  ;;  %6304 = vst [vmem:[#allocation15_spill] sm:$0xff] %v5378_v16  ;;  %vm1662_vm2 = vcmp.gt.f32.partialorder %v5204_v52, 0.0  ;;  %3614 = vpow2.f32 %v1752_v46  ;;  %v1758_v5 = vmul.f32 1.442695, %v5365_v8  ;;  %v5384_v9 = vsel %vm540_vm0, %v5333_v28, 0.0 }
 0x1dc   : > { %6305 = vst [vmem:[#allocation42_spill] sm:$0xff] %v5384_v9  ;;  %3616 = vpow2.f32 %v1818_v54  ;;  %v1816_v42 = vmul.f32 1.442695, %v5369_v62  ;;  %v5388_v19 = vadd.f32 %v6306_v45, %v1155_v37  ;;  %v5390_v49 = vpop.eup %3594  ;;  %v5393_v56 = vsel %vm1662_vm2, %v5204_v52, %v2945_v40  ;;  %v6311_v52 = vld [vmem:[#allocation21_spill] sm:$0xff] }
 0x1dd   : > { %6307 = vst [vmem:[#allocation16_spill] sm:$0xff] %v5390_v49  ;;  %v2111_v4 = vsub.f32 %v5305_v2, %v2031_v3  ;;  %3618 = vpow2.f32 %v1758_v5  ;;  %v1822_v46 = vmul.f32 1.442695, %v5372_v63  ;;  %v2166_v28 = vmul.f32 1.442695, %v2079_v32  ;;  %v1557_v49 = vpop.f32.mrf.mxu0  ;;  %v1174_v2 = vpop.f32.mrf.mxu1  ;;  %v6313_v32 = vld [vmem:[#allocation18_spill] sm:$0xff] }
 0x1de   : > { %v5397_v12 = vpop.eup %3596  ;;  %3620 = vpow2.f32 %v1816_v42  ;;  %v1756_v54 = vmul.f32 1.442695, %v5388_v19  ;;  %v1170_v27 = vadd.f32 %v3270_v51, %v6309_v1  ;;  %v5401_v45 = vadd.f32 %v1547_v24, %v1155_v37 }
 0x1df   : > { %6308 = vst [vmem:[#allocation43_spill] sm:$0xff] %v5397_v12  ;;  %3622 = vpow2.f32 %v1822_v46  ;;  %v1165_v47 = vadd.f32 %v1164_v48, %v6310_v53  ;;  %v1180_v40 = vadd.f32 %v3273_v50, %v6311_v52  ;;  %vm1665_vm3 = vcmp.gt.f32.partialorder %v5290_v0, 0.0  ;;  %v6314_v53 = vld [vmem:[#allocation20_spill] sm:$0xff]  ;;  %v6315_v50 = vld [vmem:[#allocation22_spill] sm:$0xff]  ;;  %v6316_v52 = vld [vmem:[#allocation23_spill] sm:$0xff] }
 0x1e0   : > { %v5405_v3 = vpop.eup %3598  ;;  %3624 = vpow2.f32 %v1756_v54  ;;  %v5409_v5 = vadd.f32 %v6313_v32, %v1170_v27  ;;  %v5411_v42 = vadd.f32 %v3382_v21, %v1170_v27  ;;  %v2230_v51 = vmul.f32 1.442695, %v2111_v4 }
 0x1e1   : > { %6312 = vst [vmem:[#allocation17_spill] sm:$0xff] %v5405_v3  ;;  %v5413_v1 = vpop.eup %3600  ;;  %v1820_v24 = vmul.f32 1.442695, %v5401_v45  ;;  %v5417_v48 = vadd.f32 %v6314_v53, %v1165_v47  ;;  %v5420_v37 = vadd.f32 %v6315_v50, %v1180_v40  ;;  %3626 = vpow2.f32 %v2166_v28  ;;  %v3385_v50 = vpop.f32.mrf.mxu0 }
 0x1e2   : > { %v3603_v46 = vpop.eup %3602  ;;  %vm1694_vm4 = vcmp.gt.f32.partialorder %v5312_v13, 0.0  ;;  %v1762_v54 = vmul.f32 1.442695, %v5409_v5  ;;  %v5425_v27 = vadd.f32 %v1174_v2, %v6316_v52  ;;  %v2026_v32 = vsel %vm540_vm0, %v5393_v56, -inf }
 0x1e3   : > { %v5427_v21 = vpop.eup %3604  ;;  %v2948_v4 = vadd.f32 -1.0, %v3603_v46  ;;  %3628 = vpow2.f32 %v1820_v24  ;;  %v1760_v53 = vmul.f32 1.442695, %v5417_v48  ;;  %v5436_v28 = vsel %vm540_vm0, %v5360_v26, 0.0 }
 0x1e4   : > { %6317 = vst [vmem:[#allocation19_spill] sm:$0xff] %v5427_v21  ;;  %v5432_v16 = vpop.eup %3606  ;;  %6319 = vst [vmem:[#allocation18_spill] sm:$0xff] %v5436_v28  ;;  %3630 = vpow2.f32 %v1762_v54  ;;  %v1826_v2 = vmul.f32 1.442695, %v5411_v42  ;;  %v1766_v52 = vmul.f32 1.442695, %v5420_v37  ;;  %v5447_v24 = vadd.f32 %v1557_v49, %v1165_v47 }
 0x1e5   : > { %6318 = vst [vmem:[#allocation21_spill] sm:$0xff] %v5432_v16  ;;  %v5440_v21 = vpop.eup %3608  ;;  %v5444_v46 = vsel %vm540_vm0, %v5374_v29, 0.0  ;;  %3632 = vpow2.f32 %v2230_v51  ;;  %vm1697_vm5 = vcmp.gt.f32.partialorder %v5343_v6, 0.0  ;;  %vm1664_vm6 = vcmp.gt.f32.partialorder %v5352_v59, 0.0  ;;  %v6322_v54 = vld [vmem:[#allocation24_spill] sm:$0xff] }
 0x1e6   : > { %6320 = vst [vmem:[#allocation20_spill] sm:$0xff] %v5440_v21  ;;  %6321 = vst [vmem:[#allocation22_spill] sm:$0xff] %v5444_v46  ;;  %v5449_v7 = vpop.eup %3610  ;;  %3634 = vpow2.f32 %v1760_v53  ;;  %v5454_v26 = vadd.f32 %v6322_v54, %v5425_v27  ;;  %v5456_v28 = vadd.f32 %v3385_v50, %v1180_v40  ;;  %v5460_v29 = vsel %vm540_vm0, %v5397_v12, 0.0 }
 0x1e7   : > { %v3613_v21 = vpop.eup %3612  ;;  %6323 = vst [vmem:[#allocation23_spill] sm:$0xff] %v5460_v29  ;;  %v1921_v47 = vsel %vm1665_vm3, %v5290_v0, %v2948_v4  ;;  %3636 = vpow2.f32 %v1826_v2  ;;  %v1824_v49 = vmul.f32 1.442695, %v5447_v24  ;;  %vm1667_vm7 = vcmp.gt.f32.partialorder %v5365_v8, 0.0 }
 0x1e8   : > { %v3615_v51 = vpop.eup %3614  ;;  %v2977_v53 = vadd.f32 -1.0, %v3613_v21  ;;  %vm1696_vm8 = vcmp.gt.f32.partialorder %v5369_v62, 0.0  ;;  %3638 = vpow2.f32 %v1766_v52  ;;  %vm1699_vm9 = vcmp.gt.f32.partialorder %v5372_v63, 0.0 }
 0x1e9   : > { %v3617_v40 = vpop.eup %3616  ;;  %v2947_v50 = vadd.f32 -1.0, %v3615_v51  ;;  %3640 = vpow2.f32 %v1824_v49  ;;  %v1830_v54 = vmul.f32 1.442695, %v5456_v28  ;;  %v2035_v21 = vsel %vm540_vm0, %v1921_v47, -inf }
 0x1ea   : > { %v3619_v12 = vpop.eup %3618  ;;  %v1950_v0 = vsel %vm1694_vm4, %v5312_v13, %v2977_v53  ;;  %v2980_v4 = vadd.f32 -1.0, %v3617_v40  ;;  %vm1666_vm10 = vcmp.gt.f32.partialorder %v5388_v19, 0.0  ;;  %vm1698_vm11 = vcmp.gt.f32.partialorder %v5401_v45, 0.0 }
 0x1eb   : > { %v3621_v2 = vpop.eup %3620  ;;  %v2027_v52 = vsel %vm540_vm0, %v1950_v0, -inf  ;;  %v5479_v51 = vsel %vm1664_vm6, %v5352_v59, %v2947_v50  ;;  %v2950_v49 = vadd.f32 -1.0, %v3619_v12  ;;  %v1764_v29 = vmul.f32 1.442695, %v5454_v26 }
 0x1ec   : > { %v3623_v15 = vpop.eup %3622  ;;  %v2028_v13 = vmax.f32 %v2026_v32, %v2027_v52  ;;  %v1953_v53 = vsel %vm1697_vm5, %v5343_v6, %v2980_v4  ;;  %v2979_v40 = vadd.f32 -1.0, %v3621_v2  ;;  %vm1669_vm12 = vcmp.gt.f32.partialorder %v5409_v5, 0.0 }
 0x1ed   : > { %3642 = vpow2.f32 %v1830_v54  ;;  %v3625_v3 = vpop.eup %3624  ;;  %v2036_v46 = vsel %vm540_vm0, %v1953_v53, -inf  ;;  %v5491_v12 = vsel %vm1667_vm7, %v5365_v8, %v2950_v49  ;;  %v2032_v59 = vsel %vm540_vm0, %v5479_v51, -inf }
 0x1ee   : > { %v2982_v32 = vadd.f32 -1.0, %v3623_v15  ;;  %v2078_v50 = vsub.f32 %v5393_v56, %v2028_v13  ;;  %v2110_v52 = vsub.f32 %v1950_v0, %v2028_v13  ;;  %v2037_v6 = vmax.f32 %v2035_v21, %v2036_v46  ;;  %v5499_v4 = vpop.eup %3626 }
 0x1ef   : > { %v1952_v54 = vsel %vm1696_vm8, %v5369_v62, %v2979_v40  ;;  %6324 = vst [vmem:[#allocation24_spill] sm:$0xff] %v5499_v4  ;;  %v2949_v44 = vadd.f32 -1.0, %v3625_v3  ;;  %v2041_v15 = vsel %vm540_vm0, %v5491_v12, -inf  ;;  %3644 = vpow2.f32 %v1764_v29 }
 0x1f0   : > { %v2033_v2 = vsel %vm540_vm0, %v1952_v54, -inf  ;;  %v1955_v8 = vsel %vm1699_vm9, %v5372_v63, %v2982_v32  ;;  %v3629_v49 = vpop.eup %3628  ;;  %v2164_v56 = vmul.f32 1.442695, %v2078_v50  ;;  %v2228_v0 = vmul.f32 1.442695, %v2110_v52  ;;  %v1567_v63 = vpop.f32.mrf.mxu0 }
 0x1f1   : > { %v2081_v46 = vsub.f32 %v1921_v47, %v2037_v6  ;;  %v3631_v21 = vpop.eup %3630  ;;  %v2113_v13 = vsub.f32 %v1953_v53, %v2037_v6  ;;  %v2034_v62 = vmax.f32 %v2032_v59, %v2033_v2  ;;  %v2042_v40 = vsel %vm540_vm0, %v1955_v8, -inf }
 0x1f2   : > { %v2981_v4 = vadd.f32 -1.0, %v3629_v49  ;;  %v5508_v61 = vpop.eup %3632  ;;  %v2043_v9 = vmax.f32 %v2041_v15, %v2042_v40  ;;  %vm1668_vm13 = vcmp.gt.f32.partialorder %v5417_v48, 0.0  ;;  %vm1701_vm14 = vcmp.gt.f32.partialorder %v5411_v42, 0.0 }
 0x1f3   : > { %6325 = vst [vmem:[#allocation44_spill] sm:$0xff] %v5508_v61  ;;  %v2170_v3 = vmul.f32 1.442695, %v2081_v46  ;;  %v3635_v32 = vpop.eup %3634  ;;  %v2080_v50 = vsub.f32 %v5479_v51, %v2034_v62  ;;  %v2112_v47 = vsub.f32 %v1952_v54, %v2034_v62  ;;  %v1922_v29 = vsel %vm1666_vm10, %v5388_v19, %v2949_v44 }
 0x1f4   : > { %v2952_v53 = vadd.f32 -1.0, %v3631_v21  ;;  %v3637_v59 = vpop.eup %3636  ;;  %3646 = vpow2.f32 %v2164_v56  ;;  %v1954_v52 = vsel %vm1698_vm11, %v5401_v45, %v2981_v4  ;;  %vm1671_vm15 = vcmp.gt.f32.partialorder %v5420_v37, 0.0 }
 0x1f5   : > { %vm1700_vm1 = vcmp.gt.f32.partialorder %v5447_v24, 0.0  ;;  %v3639_v6 = vpop.eup %3638  ;;  %3648 = vpow2.f32 %v2228_v0  ;;  %v2234_v2 = vmul.f32 1.442695, %v2113_v13  ;;  %v5525_v44 = vadd.f32 %v1567_v63, %v5425_v27 }
 0x1f6   : > { %v1925_v51 = vsel %vm1669_vm12, %v5409_v5, %v2952_v53  ;;  %v3641_v19 = vpop.eup %3640  ;;  %3650 = vpow2.f32 %v2170_v3  ;;  %v2083_v54 = vsub.f32 %v5491_v12, %v2043_v9  ;;  %v2038_v45 = vsel %vm540_vm0, %v1922_v29, -inf }
 0x1f7   : > { %v2039_v4 = vsel %vm540_vm0, %v1954_v52, -inf  ;;  %v2115_v15 = vsub.f32 %v1955_v8, %v2043_v9  ;;  %v2951_v56 = vadd.f32 -1.0, %v3635_v32  ;;  %v2984_v0 = vadd.f32 -1.0, %v3637_v59 }
 0x1f8   : > { %v2040_v49 = vmax.f32 %v2038_v45, %v2039_v4  ;;  %v2168_v46 = vmul.f32 1.442695, %v2080_v50  ;;  %v2232_v21 = vmul.f32 1.442695, %v2112_v47  ;;  %v2047_v13 = vsel %vm540_vm0, %v1925_v51, -inf }
 0x1f9   : > { %v2983_v5 = vadd.f32 -1.0, %v3641_v19  ;;  %v1924_v12 = vsel %vm1668_vm13, %v5417_v48, %v2951_v56  ;;  %v2954_v3 = vadd.f32 -1.0, %v3639_v6  ;;  %3652 = vpow2.f32 %v2234_v2 }
 0x1fa   : > { %v3643_v62 = vpop.eup %3642  ;;  %v2082_v27 = vsub.f32 %v1922_v29, %v2040_v49  ;;  %v2114_v40 = vsub.f32 %v1954_v52, %v2040_v49  ;;  %v1957_v9 = vsel %vm1701_vm14, %v5411_v42, %v2984_v0  ;;  %vm1703_vm2 = vcmp.gt.f32.partialorder %v5456_v28, 0.0 }
 0x1fb   : > { %v1956_v8 = vsel %vm1700_vm1, %v5447_v24, %v2983_v5  ;;  %v2174_v63 = vmul.f32 1.442695, %v2083_v54  ;;  %v2238_v32 = vmul.f32 1.442695, %v2115_v15  ;;  %v2048_v50 = vsel %vm540_vm0, %v1957_v9, -inf }
 0x1fc   : > { %v2044_v47 = vsel %vm540_vm0, %v1924_v12, -inf  ;;  %3654 = vpow2.f32 %v2168_v46  ;;  %v2049_v48 = vmax.f32 %v2047_v13, %v2048_v50  ;;  %v2045_v29 = vsel %vm540_vm0, %v1956_v8, -inf  ;;  %v3645_v59 = vpop.eup %3644 }
 0x1fd   : > { %v2986_v53 = vadd.f32 -1.0, %v3643_v62  ;;  %3656 = vpow2.f32 %v2232_v21  ;;  %v5547_v42 = vsel %vm1671_vm15, %v5420_v37, %v2954_v3  ;;  %v2046_v24 = vmax.f32 %v2044_v47, %v2045_v29 }
 0x1fe   : > { %v1828_v52 = vmul.f32 1.442695, %v5525_v44  ;;  %v2172_v6 = vmul.f32 1.442695, %v2082_v27  ;;  %v2236_v2 = vmul.f32 1.442695, %v2114_v40  ;;  %v2085_v19 = vsub.f32 %v1925_v51, %v2049_v48 }
 0x1ff   : > { %v2117_v54 = vsub.f32 %v1957_v9, %v2049_v48  ;;  %v2084_v45 = vsub.f32 %v1924_v12, %v2046_v24  ;;  %v2116_v4 = vsub.f32 %v1956_v8, %v2046_v24  ;;  %v1959_v15 = vsel %vm1703_vm2, %v5456_v28, %v2986_v53 }
 0x200   : > { %3658 = vpow2.f32 %v1828_v52  ;;  %v2178_v49 = vmul.f32 1.442695, %v2085_v19  ;;  %v2053_v37 = vsel %vm540_vm0, %v5547_v42, -inf  ;;  %v2054_v56 = vsel %vm540_vm0, %v1959_v15, -inf }
 0x201   : > { %3660 = vpow2.f32 %v2174_v63  ;;  %v5556_v0 = vpop.eup %3646  ;;  %v2242_v46 = vmul.f32 1.442695, %v2117_v54  ;;  %v2953_v51 = vadd.f32 -1.0, %v3645_v59  ;;  %v2251_v21 = vsel %vm540_vm0, %v4910_v31, 0.0  ;;  %v6330_v54 = vld [vmem:[#allocation29_spill] sm:$0xff] }
 0x202   : > { %6326 = vst [vmem:[#allocation45_spill] sm:$0xff] %v5556_v0  ;;  %3662 = vpow2.f32 %v2238_v32  ;;  %v5560_v13 = vpop.eup %3648  ;;  %v2252_v28 = vsel %vm540_vm0, %v4916_v14, 0.0  ;;  %v2257_v5 = vsel %vm540_vm0, %v4941_v35, 0.0  ;;  %v2258_v62 = vsel %vm540_vm0, %v4947_v17, 0.0 }
 0x203   : > { %3664 = vpow2.f32 %v2172_v6  ;;  %v5568_v27 = vpop.eup %3650  ;;  %v2176_v40 = vmul.f32 1.442695, %v2084_v45  ;;  %v2240_v12 = vmul.f32 1.442695, %v2116_v4  ;;  %v5570_v3 = vmax.f32 %v2053_v37, %v2054_v56 }
 0x204   : > { %6327 = vst [vmem:[#allocation46_spill] sm:$0xff] %v5568_v27  ;;  %3666 = vpow2.f32 %v2236_v2  ;;  %v2253_v9 = vadd.f32 %v2252_v28, %v2251_v21  ;;  %v2259_v8 = vadd.f32 %v2258_v62, %v2257_v5  ;;  %v2248_v63 = vsel %vm540_vm0, %v4922_v41, 0.0  ;;  %v6332_v28 = vld [vmem:[#allocation8_spill] sm:$0xff] }
 0x205   : > { %3668 = vpow2.f32 %v2178_v49  ;;  %v5576_v32 = vsel %vm540_vm0, %v5413_v1, 0.0  ;;  %vm1670_vm3 = vcmp.gt.f32.partialorder %v5454_v26, 0.0  ;;  %v2250_v50 = vadd.f32 %v5108_v25, %v2248_v63 }
 0x206   : > { %3670 = vpow2.f32 %v2242_v46  ;;  %v5581_v47 = vsel %vm1670_vm3, %v5454_v26, %v2953_v51  ;;  %v2254_v48 = vsel %vm540_vm0, %v4954_v20, 0.0  ;;  %v2260_v29 = vsel %vm540_vm0, %v4991_v36, 0.0  ;;  %v5587_v53 = vpop.eup %3652 }
 0x207   : > { %3672 = vrcp.f32 %v2253_v9  ;;  %6328 = vst [vmem:[#allocation47_spill] sm:$0xff] %v5587_v53  ;;  %v2256_v59 = vadd.f32 %v5112_v58, %v2254_v48  ;;  %v2262_v24 = vadd.f32 %v5123_v43, %v2260_v29  ;;  %v2263_v25 = vsel %vm540_vm0, %v4966_v23, 0.0  ;;  %v6336_v48 = vld [vmem:[#allocation42_spill] sm:$0xff] }
 0x208   : > { %3674 = vpow2.f32 %v2176_v40  ;;  %v2119_v26 = vsub.f32 %v1959_v15, %v5570_v3  ;;  %v2265_v52 = vadd.f32 %v5116_v18, %v2263_v25  ;;  %v2266_v6 = vsel %vm540_vm0, %v5062_v22, 0.0  ;;  %v6334_v40 = vld [vmem:[#allocation34_spill] sm:$0xff]  ;;  %v6337_v25 = vld [vmem:[#allocation13_spill] sm:$0xff] }
 0x209   : > { %3676 = vpow2.f32 %v2240_v12  ;;  %v5597_v2 = vpop.eup %3654  ;;  %v2268_v19 = vadd.f32 %v5309_v33, %v2266_v6  ;;  %v2269_v58 = vsel %vm540_vm0, %v6330_v54, 0.0  ;;  %v2272_v43 = vsel %vm540_vm0, %v5140_v60, 0.0  ;;  %v6338_v6 = vld [vmem:[#allocation10_spill] sm:$0xff] }
 0x20a   : > { %6329 = vst [vmem:[#allocation48_spill] sm:$0xff] %v5597_v2  ;;  %3678 = vrcp.f32 %v2259_v8  ;;  %v5604_v45 = vpop.eup %3656  ;;  %v5608_v4 = vsel %vm540_vm0, %v5432_v16, 0.0  ;;  %v2271_v18 = vadd.f32 %v5212_v11, %v2269_v58  ;;  %v2274_v15 = vadd.f32 %v5327_v57, %v2272_v43  ;;  %v6350_v16 = vld [vmem:[#allocation28_spill] sm:$0xff] }
 0x20b   : > { %3680 = vrcp.f32 %v2250_v50  ;;  %v5614_v33 = vsel %vm540_vm0, %v5449_v7, 0.0  ;;  %vm1702_vm4 = vcmp.gt.f32.partialorder %v5525_v44, 0.0  ;;  %v2278_v49 = vsel %vm540_vm0, %v5170_v38, 0.0 }
 0x20c   : > { %3682 = vrcp.f32 %v2256_v59  ;;  %v2050_v56 = vsel %vm540_vm0, %v5581_v47, -inf  ;;  %v2275_v11 = vsel %vm540_vm0, %v5119_v39, 0.0  ;;  %v2280_v57 = vadd.f32 %v5339_v10, %v2278_v49 }
 0x20d   : > { %v3659_v37 = vpop.eup %3658  ;;  %3684 = vrcp.f32 %v2262_v24  ;;  %v2246_v51 = vmul.f32 1.442695, %v2119_v26  ;;  %v2284_v5 = vsel %vm540_vm0, %v6332_v28, 0.0  ;;  %v2281_v12 = vsel %vm540_vm0, %v6334_v40, 0.0 }
 0x20e   : > { %v5624_v46 = vpop.eup %3660  ;;  %v2985_v21 = vadd.f32 -1.0, %v3659_v37  ;;  %3686 = vrcp.f32 %v2265_v52  ;;  %v2286_v9 = vadd.f32 %v5357_v30, %v2284_v5  ;;  %v2290_v8 = vsel %vm540_vm0, %v5318_v34, 0.0  ;;  %v3754_v34 = vld [vmem:[%s4133_s28 + $0x128] sm:$0xff] }
 0x20f   : > { %6331 = vst [vmem:[#allocation29_spill] sm:$0xff] %v5624_v46  ;;  %v5628_v62 = vpop.eup %3662  ;;  %3688 = vrcp.f32 %v2268_v19  ;;  %v2277_v50 = vadd.f32 %v5322_v55, %v2275_v11  ;;  %v2292_v29 = vadd.f32 %v6336_v48, %v2290_v8  ;;  %v2087_v24 = vsub.f32 %v5547_v42, %v5570_v3  ;;  %v6339_v55 = vld [vmem:[#allocation22_spill] sm:$0xff]  ;;  %v6341_v3 = vld [vmem:[#allocation17_spill] sm:$0xff]  ;;  %v6342_v11 = vld [vmem:[#allocation7_spill] sm:$0xff] }
 0x210   : > { %6333 = vst [vmem:[#allocation8_spill] sm:$0xff] %v5628_v62  ;;  %v5635_v10 = vpop.eup %3664  ;;  %v1958_v63 = vsel %vm1702_vm4, %v5525_v44, %v2985_v21  ;;  %3690 = vrcp.f32 %v2271_v18  ;;  %v2296_v26 = vsel %vm540_vm0, %v6337_v25, 0.0  ;;  %v2283_v19 = vadd.f32 %v6338_v6, %v2281_v12  ;;  %v6361_v25 = vld [vmem:[#allocation36_spill] sm:$0xff] }
 0x211   : > { %6335 = vst [vmem:[#allocation34_spill] sm:$0xff] %v5635_v10  ;;  %v5642_v59 = vpop.eup %3666  ;;  %v2051_v30 = vsel %vm540_vm0, %v1958_v63, -inf  ;;  %3692 = vrcp.f32 %v2274_v15  ;;  %v2298_v58 = vadd.f32 %v6339_v55, %v2296_v26  ;;  %v5657_v18 = vsel %vm540_vm0, %v5508_v61, 0.0  ;;  %v6345_v55 = vld [vmem:[#allocation20_spill] sm:$0xff] }
 0x212   : > { %v5649_v52 = vpop.eup %3668  ;;  %3694 = vpow2.f32 %v2246_v51  ;;  %v2052_v44 = vmax.f32 %v2050_v56, %v2051_v30  ;;  %v2315_v42 = vsel %vm540_vm0, %v5560_v13, 0.0  ;;  %v2302_v15 = vsel %vm540_vm0, %v6341_v3, 0.0  ;;  %v3748_v30 = vld [vmem:[%s4133_s28 + $0x108] sm:$0xff] }
 0x213   : > { %v5653_v43 = vpop.eup %3670  ;;  %3696 = vrcp.f32 %v2280_v57  ;;  %v2287_v51 = vsel %vm540_vm0, %v6342_v11, 0.0  ;;  %v5672_v5 = vsel %vm540_vm0, %v5587_v53, 0.0  ;;  %v2304_v12 = vadd.f32 %v5576_v32, %v2302_v15  ;;  %v3750_v53 = vld [vmem:[%s4133_s28 + $0x100] sm:$0xff] }
 0x214   : > { %6340 = vst [vmem:[#allocation42_spill] sm:$0xff] %v5653_v43  ;;  %v5663_v49 = vpop.eup %3672  ;;  %v2086_v37 = vsub.f32 %v5581_v47, %v2052_v44  ;;  %v2118_v56 = vsub.f32 %v1958_v63, %v2052_v44  ;;  %3698 = vrcp.f32 %v2277_v50  ;;  %v2182_v47 = vmul.f32 1.442695, %v2087_v24  ;;  %v6344_v44 = vld [vmem:[#allocation41_spill] sm:$0xff]  ;;  %v6346_v24 = vld [vmem:[#allocation38_spill] sm:$0xff] }
 0x215   : > { %v5668_v21 = vpop.eup %3674  ;;  %v2409_v57 = vmul.f32 %v5663_v49, %v4916_v14  ;;  %3700 = vrcp.f32 %v2286_v9  ;;  %v2289_v6 = vadd.f32 %v6344_v44, %v2287_v51  ;;  %v2308_v14 = vsel %vm540_vm0, %v6345_v55, 0.0  ;;  %v6348_v51 = vld [vmem:[#allocation11_spill] sm:$0xff]  ;;  %v6349_v44 = vld [vmem:[#allocation26_spill] sm:$0xff] }
 0x216   : > { %6343 = vst [vmem:[#allocation10_spill] sm:$0xff] %v5668_v21  ;;  %v5677_v8 = vpop.eup %3676  ;;  %v2180_v63 = vmul.f32 1.442695, %v2086_v37  ;;  %v2244_v50 = vmul.f32 1.442695, %v2118_v56  ;;  %3702 = vrcp.f32 %v2283_v19  ;;  %v2293_v19 = vsel %vm540_vm0, %v6346_v24, 0.0 }
 0x217   : > { %v5679_v48 = vpop.eup %3678  ;;  %v2473_v26 = vmul.f32 %v3748_v30, %v2409_v57  ;;  %3704 = vrcp.f32 %v2292_v29  ;;  %v2310_v15 = vadd.f32 %v5614_v33, %v2308_v14  ;;  %v6347_v29 = vld [vmem:[#allocation25_spill] sm:$0xff]  ;;  %v2299_v57 = vsel %vm540_vm0, %v6348_v51, 0.0 }
 0x218   : > { %v5685_v9 = vpop.eup %3680  ;;  %3706 = vpow2.f32 %v2180_v63  ;;  %v2411_v32 = vmul.f32 %v5679_v48, %v4947_v17  ;;  %v2314_v17 = vsel %vm540_vm0, %v5556_v0, 0.0  ;;  %v3749_v33 = vld [vmem:[%s4133_s28 + $0x118] sm:$0xff] }
 0x219   : > { %v5692_v37 = vpop.eup %3682  ;;  %3708 = vpow2.f32 %v2244_v50  ;;  %2538 = vrot.lane.b32.xlu0 %v2473_v26, %s3874_s4  ;;  %v2408_v56 = vmul.f32 %v5685_v9, %v6347_v29  ;;  %v2316_v14 = vadd.f32 %v2315_v42, %v2314_v17  ;;  %v2321_v29 = vsel %vm540_vm0, %v5604_v45, 0.0  ;;  %v6352_v42 = vld [vmem:[#allocation18_spill] sm:$0xff] }
 0x21a   : > { %v5701_v63 = vpop.eup %3684  ;;  %3710 = vpow2.f32 %v2182_v47  ;;  %v2475_v30 = vmul.f32 %v3749_v33, %v2411_v32  ;;  %v2410_v50 = vmul.f32 %v5692_v37, %v6349_v44  ;;  %v6351_v32 = vld [vmem:[#allocation15_spill] sm:$0xff]  ;;  %v2301_v17 = vadd.f32 %v6352_v42, %v2299_v57  ;;  %v6353_v44 = vld [vmem:[#allocation16_spill] sm:$0xff] }
 0x21b   : > { %v5706_v26 = vpop.eup %3686  ;;  %v2472_v61 = vmul.f32 %v3750_v53, %v2408_v56  ;;  %v2412_v0 = vmul.f32 %v5701_v63, %v6350_v16  ;;  %3712 = vrcp.f32 %v2298_v58  ;;  %v2295_v33 = vadd.f32 %v6351_v32, %v2293_v19  ;;  %v3751_v53 = vld [vmem:[%s4133_s28 + $0x120] sm:$0xff]  ;;  %v6354_v56 = vld [vmem:[#allocation31_spill] sm:$0xff]  ;;  %v3752_v19 = vld [vmem:[%s4133_s28 + $0x110] sm:$0xff] }
 0x21c   : > { %v5713_v47 = vpop.eup %3688  ;;  %2542 = vrot.lane.b32.xlu1 %v2475_v30, %s3874_s4  ;;  %3714 = vrcp.f32 %v2289_v6  ;;  %v2305_v55 = vsel %vm540_vm0, %v6353_v44, 0.0  ;;  %v2320_v6 = vsel %vm540_vm0, %v5597_v2, 0.0  ;;  %v2474_v57 = vmul.f32 %v3752_v19, %v2410_v50  ;;  %v6355_v32 = vld [vmem:[#allocation27_spill] sm:$0xff]  ;;  %v6356_v44 = vld [vmem:[#allocation30_spill] sm:$0xff] }
 0x21d   : > { %v5720_v3 = vpop.eup %3690  ;;  %2536 = vrot.lane.b32.xlu0 %v2472_v61, %s3874_s4  ;;  %v2476_v16 = vmul.f32 %v3751_v53, %v2412_v0  ;;  %v2414_v58 = vmul.f32 %v5713_v47, %v6354_v56  ;;  %3716 = vrcp.f32 %v2304_v12  ;;  %v2413_v42 = vmul.f32 %v5706_v26, %v6355_v32  ;;  %v6358_v53 = vld [vmem:[#allocation33_spill] sm:$0xff]  ;;  %v6359_v2 = vld [vmem:[#allocation19_spill] sm:$0xff] }
 0x21e   : > { %v5728_v30 = vpop.eup %3692  ;;  %v2415_v61 = vmul.f32 %v5720_v3, %v6356_v44  ;;  %v2322_v51 = vadd.f32 %v2321_v29, %v2320_v6  ;;  %v2327_v12 = vsel %vm540_vm0, %v5642_v59, 0.0  ;;  %3718 = vrcp.f32 %v2310_v15  ;;  %v6360_v44 = vld [vmem:[#allocation23_spill] sm:$0xff]  ;;  %v3753_v15 = vld [vmem:[%s4133_s28 + $0x130] sm:$0xff] }
 0x21f   : > { %v5735_v0 = vpop.eup %3694  ;;  %v2416_v56 = vmul.f32 %v5728_v30, %v6358_v53  ;;  %v2311_v50 = vsel %vm540_vm0, %v6359_v2, 0.0  ;;  %v2330_v32 = vsel %vm540_vm0, %v5628_v62, 0.0  ;;  %v5749_v29 = vsel %vm540_vm0, %v5653_v43, 0.0 }
 0x220   : > { %6357 = vst [vmem:[#allocation22_spill] sm:$0xff] %v5735_v0  ;;  %v5743_v19 = vpop.eup %3696  ;;  %2540 = vrot.lane.b32.xlu1 %v2474_v57, %s3874_s4  ;;  %3720 = vrcp.f32 %v2295_v33  ;;  %v2307_v6 = vadd.f32 %v6360_v44, %v2305_v55  ;;  %v2478_v2 = vmul.f32 %v3753_v15, %v2414_v58  ;;  %v2326_v62 = vsel %vm540_vm0, %v5635_v10, 0.0  ;;  %v6362_v58 = vld [vmem:[#allocation37_spill] sm:$0xff] }
 0x221   : > { %v5753_v53 = vpop.eup %3698  ;;  %2544 = vrot.lane.b32.xlu0 %v2476_v16, %s3874_s4  ;;  %v2418_v24 = vmul.f32 %v5743_v19, %v6361_v25  ;;  %3722 = vrcp.f32 %v2316_v14  ;;  %v2477_v57 = vmul.f32 %v3754_v34, %v2413_v42  ;;  %v2313_v55 = vadd.f32 %v5608_v4, %v2311_v50  ;;  %v6363_v14 = vld [vmem:[#allocation24_spill] sm:$0xff] }
 0x222   : > { %v5761_v43 = vpop.eup %3700  ;;  %3724 = vrcp.f32 %v2301_v17  ;;  %v2328_v33 = vadd.f32 %v2327_v12, %v2326_v62  ;;  %v2333_v16 = vsel %vm540_vm0, %v5677_v8, 0.0  ;;  %v2317_v15 = vsel %vm540_vm0, %v6363_v14, 0.0  ;;  %v6364_v4 = vld [vmem:[#allocation32_spill] sm:$0xff]  ;;  %v3755_v12 = vld [vmem:[%s4133_s28 + $0x140] sm:$0xff] }
 0x223   : > { %v5765_v44 = vpop.eup %3702  ;;  %v2420_v25 = vmul.f32 %v5761_v43, %v6362_v58  ;;  %3726 = vrcp.f32 %v2322_v51  ;;  %v2342_v34 = vsel %vm540_vm0, %v5735_v0, 0.0  ;;  %v2417_v62 = vmul.f32 %v5753_v53, %v6364_v4  ;;  %v6366_v50 = vld [vmem:[#allocation40_spill] sm:$0xff] }
 0x224   : > { %v5773_v10 = vpop.eup %3704  ;;  %2546 = vrot.lane.b32.xlu1 %v2477_v57, %s3874_s4  ;;  %3728 = vrcp.f32 %v2307_v6  ;;  %v2323_v17 = vsel %vm540_vm0, %v5568_v27, 0.0  ;;  %v2480_v51 = vmul.f32 %v3755_v12, %v2416_v56  ;;  %v2332_v57 = vsel %vm540_vm0, %v5668_v21, 0.0  ;;  %v3756_v6 = vld [vmem:[%s4133_s28 + $0x138] sm:$0xff] }
 0x225   : > { %v5782_v42 = vpop.eup %3706  ;;  %2548 = vrot.lane.b32.xlu0 %v2478_v2, %s3874_s4  ;;  %v2422_v58 = vmul.f32 %v5773_v10, %v6366_v50  ;;  %3730 = vrcp.f32 %v2328_v33  ;;  %v2479_v4 = vmul.f32 %v3756_v6, %v2415_v61  ;;  %v2319_v27 = vadd.f32 %v5657_v18, %v2317_v15  ;;  %v3757_v18 = vld [vmem:[%s4133_s28 + $0x148] sm:$0xff]  ;;  %v6368_v6 = vld [vmem:[#allocation14_spill] sm:$0xff] }
 0x226   : > { %6365 = vst [vmem:[#allocation7_spill] sm:$0xff] %v5782_v42  ;;  %v5790_v0 = vpop.eup %3708  ;;  %3732 = vrcp.f32 %v2313_v55  ;;  %v2334_v14 = vadd.f32 %v2333_v16, %v2332_v57  ;;  %v2325_v12 = vadd.f32 %v5672_v5, %v2323_v17  ;;  %v2329_v33 = vsel %vm540_vm0, %v5624_v46, 0.0  ;;  %v6367_v55 = vld [vmem:[#allocation35_spill] sm:$0xff]  ;;  %v3758_v5 = vld [vmem:[%s4133_s28 + $0x150] sm:$0xff] }
 0x227   : > { %v5794_v2 = vpop.eup %3710  ;;  %v2339_v56 = vsel %vm540_vm0, %v5790_v0, 0.0  ;;  %v2338_v50 = vsel %vm540_vm0, %v5782_v42, 0.0  ;;  %v2481_v61 = vmul.f32 %v3757_v18, %v2417_v62  ;;  %v2419_v16 = vmul.f32 %v5765_v44, %v6367_v55  ;;  %v6370_v55 = vld [vmem:[#allocation39_spill] sm:$0xff] }
 0x228   : > { %v5803_v21 = vpop.eup %3712  ;;  %2550 = vrot.lane.b32.xlu1 %v2479_v4, %s3874_s4  ;;  %3734 = vrcp.f32 %v2334_v14  ;;  %v2340_v15 = vadd.f32 %v2339_v56, %v2338_v50  ;;  %v2482_v17 = vmul.f32 %v3758_v5, %v2418_v24  ;;  %v2335_v46 = vsel %vm540_vm0, %v5649_v52, 0.0 }
 0x229   : > { %v3715_v57 = vpop.eup %3714  ;;  %2552 = vrot.lane.b32.xlu0 %v2480_v51, %s3874_s4  ;;  %v2424_v42 = vmul.f32 %v5803_v21, %v6368_v6  ;;  %v5817_v62 = vmul.f32 %v5663_v49, %v4910_v31  ;;  %v2331_v14 = vadd.f32 %v2330_v32, %v2329_v33  ;;  %v2341_v56 = vsel %vm540_vm0, %v5794_v2, 0.0  ;;  %v3759_v31 = vld [vmem:[%s4133_s28 + $0x160] sm:$0xff] }
 0x22a   : > { %v5819_v4 = vpop.eup %3716  ;;  %3736 = vrcp.f32 %v2340_v15  ;;  %v5825_v24 = vmul.f32 %v5679_v48, %v4941_v35  ;;  %v2484_v49 = vmul.f32 %v3759_v31, %v2420_v25  ;;  %v2337_v32 = vadd.f32 %v5749_v29, %v2335_v46  ;;  %v6369_v25 = vld [vmem:[#allocation6_spill] sm:$0xff]  ;;  %v3765_v31 = vld [vmem:[%s4133_s28 + $0x190] sm:$0xff] }
 0x22b   : > { %v5829_v51 = vmul.f32 %v5819_v4, %v5413_v1  ;;  %3738 = vrcp.f32 %v2319_v27  ;;  %v5831_v50 = vpop.eup %3718  ;;  %v5838_v33 = vmul.f32 %v5685_v9, %v4922_v41  ;;  %v2343_v27 = vadd.f32 %v2342_v34, %v2341_v56  ;;  %v3760_v41 = vld [vmem:[%s4133_s28 + $0x158] sm:$0xff] }
 0x22c   : > { %2554 = vrot.lane.b32.xlu1 %v2481_v61, %s3874_s4  ;;  %3740 = vrcp.f32 %v2325_v12  ;;  %v5843_v1 = vmul.f32 %v5831_v50, %v5449_v7  ;;  %v5847_v48 = vmul.f32 %v5692_v37, %v4954_v20  ;;  %v5851_v46 = vmul.f32 %v5701_v63, %v4991_v36  ;;  %v3761_v36 = vld [vmem:[%s4133_s28 + $0x170] sm:$0xff] }
 0x22d   : > { %v3721_v35 = vpop.eup %3720  ;;  %2556 = vrot.lane.b32.xlu0 %v2482_v17, %s3874_s4  ;;  %v2483_v9 = vmul.f32 %v3760_v41, %v2419_v16  ;;  %v2421_v12 = vmul.f32 %v3715_v57, %v6369_v25  ;;  %3742 = vrcp.f32 %v2331_v14  ;;  %v5857_v18 = vmul.f32 %v5706_v26, %v4966_v23  ;;  %v3764_v17 = vld [vmem:[%s4133_s28 + $0x178] sm:$0xff]  ;;  %v3766_v41 = vld [vmem:[%s4133_s28 + $0x188] sm:$0xff] }
 0x22e   : > { %v3723_v29 = vpop.eup %3722  ;;  %v2486_v37 = vmul.f32 %v3761_v36, %v2422_v58  ;;  %3744 = vrcp.f32 %v2337_v32  ;;  %v5866_v63 = vmul.f32 %v5713_v47, %v5062_v22  ;;  %v5878_v26 = vmul.f32 %v5728_v30, %v5140_v60  ;;  %v3762_v22 = vld [vmem:[%s4133_s28 + $0x168] sm:$0xff]  ;;  %v6378_v36 = vld [vmem:[#allocation16_spill] sm:$0xff] }
 0x22f   : > { %v3725_v7 = vpop.eup %3724  ;;  %v5860_v34 = vmul.f32 %v3723_v29, %v5560_v13  ;;  %3746 = vrcp.f32 %v2343_v27  ;;  %v5874_v13 = vmul.f32 %v5720_v3, %v6330_v54  ;;  %v2485_v47 = vmul.f32 %v3762_v22, %v2421_v12  ;;  %v3763_v3 = vld [vmem:[%s4133_s28 + $0x180] sm:$0xff]  ;;  %v6375_v32 = vld [vmem:[#allocation11_spill] sm:$0xff]  ;;  %v6379_v22 = vld [vmem:[#allocation20_spill] sm:$0xff] }
 0x230   : > { %v3727_v20 = vpop.eup %3726  ;;  %2558 = vrot.lane.b32.xlu1 %v2483_v9, %s3874_s4  ;;  %v2423_v16 = vmul.f32 %v3721_v35, %v6370_v55  ;;  %v5884_v15 = vmul.f32 %v5753_v53, %v5119_v39  ;;  %v5892_v60 = vmul.f32 %v5743_v19, %v5170_v38  ;;  %v2488_v30 = vmul.f32 %v3763_v3, %v2424_v42  ;;  %v6371_v19 = vld [vmem:[#allocation12_spill] sm:$0xff]  ;;  %v6372_v42 = vld [vmem:[#allocation9_spill] sm:$0xff]  ;;  %v6376_v9 = vld [vmem:[#allocation43_spill] sm:$0xff] }
 0x231   : > { %v3729_v61 = vpop.eup %3728  ;;  %2560 = vrot.lane.b32.xlu0 %v2484_v49, %s3874_s4  ;;  %v5870_v23 = vmul.f32 %v3727_v20, %v5604_v45  ;;  %v5898_v39 = vmul.f32 %v5765_v44, %v6334_v40  ;;  %v5905_v53 = vmul.f32 %v3715_v57, %v6342_v11  ;;  %v2425_v6 = vmul.f32 %v3725_v7, %v6371_v19  ;;  %v6374_v49 = vld [vmem:[#allocation13_spill] sm:$0xff]  ;;  %v6384_v19 = vld [vmem:[#allocation46_spill] sm:$0xff] }
 0x232   : > { %v3731_v58 = vpop.eup %3730  ;;  %v2487_v38 = vmul.f32 %v3764_v17, %v2423_v16  ;;  %v5914_v56 = vmul.f32 %v5773_v10, %v6372_v42  ;;  %v5928_v10 = vmul.f32 %v5803_v21, %v6374_v49  ;;  %v5931_v27 = vmul.f32 %v3725_v7, %v6375_v32  ;;  %v6380_v7 = vld [vmem:[#allocation19_spill] sm:$0xff]  ;;  %v6381_v55 = vld [vmem:[#allocation45_spill] sm:$0xff] }
 0x233   : > { %v3733_v45 = vpop.eup %3732  ;;  %v5887_v5 = vmul.f32 %v3731_v58, %v5642_v59  ;;  %v5902_v59 = vmul.f32 %v5761_v43, %v6332_v28  ;;  %v6373_v43 = vld [vmem:[#allocation38_spill] sm:$0xff]  ;;  %v2427_v25 = vmul.f32 %v3729_v61, %v6376_v9  ;;  %v5944_v21 = vmul.f32 %v5831_v50, %v6379_v22  ;;  %v6383_v50 = vld [vmem:[#allocation48_spill] sm:$0xff] }
 0x234   : > { %2562 = vrot.lane.b32.xlu1 %v2485_v47, %s3874_s4  ;;  %v5921_v11 = vmul.f32 %v3721_v35, %v6373_v43  ;;  %v6377_v35 = vld [vmem:[#allocation17_spill] sm:$0xff]  ;;  %v5948_v47 = vmul.f32 %v3733_v45, %v6380_v7  ;;  %v5951_v16 = vmul.f32 %v3723_v29, %v6381_v55  ;;  %v6390_v7 = vld [vmem:[#allocation44_spill] sm:$0xff] }
 0x235   : > { %v3735_v54 = vpop.eup %3734  ;;  %2564 = vrot.lane.b32.xlu0 %v2486_v37, %s3874_s4  ;;  %v5937_v12 = vmul.f32 %v5819_v4, %v6377_v35  ;;  %v5940_v37 = vmul.f32 %v3729_v61, %v6378_v36  ;;  %v3767_v4 = vld [vmem:[%s4133_s28 + $0x1a0] sm:$0xff]  ;;  %v3768_v29 = vld [vmem:[%s4133_s28 + $0x198] sm:$0xff]  ;;  %v6389_v35 = vld [vmem:[#allocation7_spill] sm:$0xff] }
 0x236   : > { %v5910_v14 = vmul.f32 %v3735_v54, %v5677_v8  ;;  %v2490_v8 = vmul.f32 %v3765_v31, %v5829_v51  ;;  %v2492_v61 = vmul.f32 %v3767_v4, %v5843_v1  ;;  %v2491_v43 = vmul.f32 %v3768_v29, %v2427_v25  ;;  %v6385_v31 = vld [vmem:[#allocation21_spill] sm:$0xff]  ;;  %v6392_v29 = vld [vmem:[#allocation8_spill] sm:$0xff] }
 0x237   : > { %v3737_v40 = vpop.eup %3736  ;;  %v2429_v49 = vmul.f32 %v3733_v45, %v6385_v31  ;;  %v6387_v1 = vld [vmem:[#allocation29_spill] sm:$0xff] }
 0x238   : > { %v3739_v44 = vpop.eup %3738  ;;  %2566 = vrot.lane.b32.xlu1 %v2487_v38, %s3874_s4  ;;  %v5918_v28 = vmul.f32 %v3737_v40, %v5790_v0  ;;  %v2489_v0 = vmul.f32 %v3766_v41, %v2425_v6  ;;  %v5960_v38 = vmul.f32 %v3727_v20, %v6383_v50  ;;  %v5981_v25 = vmul.f32 %v3737_v40, %v6389_v35  ;;  %v3772_v4 = vld [vmem:[%s4133_s28 + $0x1b8] sm:$0xff]  ;;  %v3774_v50 = vld [vmem:[%s4133_s28 + $0x1c8] sm:$0xff] }
 0x239   : > { %v3741_v57 = vpop.eup %3740  ;;  %2568 = vrot.lane.b32.xlu0 %v2488_v30, %s3874_s4  ;;  %v6382_v30 = vld [vmem:[#allocation24_spill] sm:$0xff]  ;;  %v2431_v55 = vmul.f32 %v3739_v44, %v6390_v7  ;;  %v3776_v31 = vld [vmem:[%s4133_s28 + $0x1d8] sm:$0xff] }
 0x23a   : > { %v3743_v51 = vpop.eup %3742  ;;  %v5957_v17 = vmul.f32 %v3739_v44, %v6382_v30  ;;  %v5963_v6 = vmul.f32 %v3741_v57, %v6384_v19 }
 0x23b   : > { %v3745_v3 = vpop.eup %3744  ;;  %v5971_v41 = vmul.f32 %v3743_v51, %v6387_v1 }
 0x23c   : > { %2570 = vrot.lane.b32.xlu1 %v2489_v0, %s3874_s4  ;;  %v3747_v42 = vpop.eup %3746  ;;  %v6388_v0 = vld [vmem:[#allocation10_spill] sm:$0xff]  ;;  %v5978_v9 = vmul.f32 %v3745_v3, %v5649_v52 }
 0x23d   : > { %2572 = vrot.lane.b32.xlu0 %v2490_v8, %s3874_s4  ;;  %v6386_v8 = vld [vmem:[#allocation34_spill] sm:$0xff]  ;;  %v5974_v20 = vmul.f32 %v3735_v54, %v6388_v0  ;;  %v5987_v36 = vmul.f32 %v3747_v42, %v5794_v2  ;;  %v3770_v54 = vld [vmem:[%s4133_s28 + $0x1a8] sm:$0xff]  ;;  %v3773_v2 = vld [vmem:[%s4133_s28 + $0x1d0] sm:$0xff] }
 0x23e   : > { %v5968_v32 = vmul.f32 %v3731_v58, %v6386_v8  ;;  %v3769_v58 = vld [vmem:[%s4133_s28 + $0x1b0] sm:$0xff]  ;;  %v2493_v22 = vmul.f32 %v3770_v54, %v2429_v49  ;;  %v3771_v52 = vld [vmem:[%s4133_s28 + $0x1c0] sm:$0xff]  ;;  %v2498_v44 = vmul.f32 %v3773_v2, %v5887_v5  ;;  %v3778_v0 = vld [vmem:[%s4133_s28 + $0x1e8] sm:$0xff] }
 0x23f   : > { %v2494_v45 = vmul.f32 %v3769_v58, %v5860_v34  ;;  %v2496_v40 = vmul.f32 %v3771_v52, %v5870_v23  ;;  %v6391_v34 = vld [vmem:[#allocation47_spill] sm:$0xff]  ;;  %v3775_v23 = vld [vmem:[%s4133_s28 + $0x1e0] sm:$0xff]  ;;  %v3777_v5 = vld [vmem:[%s4133_s28 + $0x1f0] sm:$0xff] }
 0x240   : > { %2574 = vrot.lane.b32.xlu1 %v2491_v43, %s3874_s4  ;;  %v2433_v30 = vmul.f32 %v3741_v57, %v6391_v34  ;;  %v2435_v43 = vmul.f32 %v3743_v51, %v6392_v29  ;;  %v2500_v57 = vmul.f32 %v3775_v23, %v5910_v14  ;;  %v6393_v8 = vld [vmem:[#allocation42_spill] sm:$0xff]  ;;  %v2502_v51 = vmul.f32 %v3777_v5, %v5918_v28  ;;  %v3779_v14 = vld [vmem:[%s4133_s28 + $0x1f8] sm:$0xff] }
 0x241   : > { %2576 = vrot.lane.b32.xlu0 %v2492_v61, %s3874_s4  ;;  %v2495_v61 = vmul.f32 %v3772_v4, %v2431_v55  ;;  %v2437_v1 = vmul.f32 %v3745_v3, %v6393_v8  ;;  %v6394_v58 = vld [vmem:[#allocation22_spill] sm:$0xff]  ;;  %v3780_v3 = vld [vmem:[%s4133_s28 + $0x8] sm:$0xff] }
 0x242   : > { %v2497_v19 = vmul.f32 %v3774_v50, %v2433_v30  ;;  %v2499_v49 = vmul.f32 %v3776_v31, %v2435_v43  ;;  %v3783_v30 = vld [vmem:[%s4133_s28 + $0x10] sm:$0xff]  ;;  %v3785_v43 = vld [vmem:[%s4133_s28 + $0x28] sm:$0xff] }
 0x243   : > { %v2501_v35 = vmul.f32 %v3778_v0, %v2437_v1  ;;  %v2442_v2 = vmul.f32 %v3783_v30, %v5847_v48  ;;  %v2445_v23 = vmul.f32 %v3785_v43, %v5857_v18  ;;  %v3787_v1 = vld [vmem:[%s4133_s28 + $0x38] sm:$0xff] }
 0x244   : > { %2578 = vrot.lane.b32.xlu1 %v2493_v22, %s3874_s4  ;;  %v2441_v22 = vmul.f32 %v3780_v3, %v5817_v62  ;;  %v2447_v5 = vmul.f32 %v3787_v1, %v5874_v13 }
 0x245   : > { %2580 = vrot.lane.b32.xlu0 %v2494_v45, %s3874_s4  ;;  %v2439_v45 = vmul.f32 %v3747_v42, %v6394_v58  ;;  %v3781_v42 = vld [vmem:[%s4133_s28 + $0x18] sm:$0xff] }
 0x246   : > { %v2443_v55 = vmul.f32 %v3781_v42, %v5825_v24 }
 0x247   : > { %v2503_v54 = vmul.f32 %v3779_v14, %v2439_v45  ;;  %v3789_v45 = vld [vmem:[%s4133_s28 + $0x48] sm:$0xff] }
 0x248   : > { %2582 = vrot.lane.b32.xlu1 %v2495_v61, %s3874_s4  ;;  %v2449_v14 = vmul.f32 %v3789_v45, %v5884_v15 }
 0x249   : > { %2584 = vrot.lane.b32.xlu0 %v2496_v40, %s3874_s4  ;;  %v3782_v40 = vld [vmem:[%s4133_s28] sm:$0xff] }
 0x24a   : > { %v2440_v4 = vmul.f32 %v3782_v40, %v5838_v33 }
 0x24c   : > { %2586 = vrot.lane.b32.xlu1 %v2497_v19, %s3874_s4 }
 0x24d   : > { %2588 = vrot.lane.b32.xlu0 %v2498_v44, %s3874_s4  ;;  %v3784_v44 = vld [vmem:[%s4133_s28 + $0x20] sm:$0xff] }
 0x24e   : > { %v2444_v50 = vmul.f32 %v3784_v44, %v5851_v46  ;;  %v3795_v44 = vld [vmem:[%s4133_s28 + $0x78] sm:$0xff] }
 0x250   : > { %2590 = vrot.lane.b32.xlu1 %v2499_v49, %s3874_s4 }
 0x251   : > { %2592 = vrot.lane.b32.xlu0 %v2500_v57, %s3874_s4  ;;  %v3786_v57 = vld [vmem:[%s4133_s28 + $0x30] sm:$0xff] }
 0x252   : > { %v2446_v31 = vmul.f32 %v3786_v57, %v5866_v63  ;;  %v3798_v57 = vld [vmem:[%s4133_s28 + $0x90] sm:$0xff] }
 0x254   : > { %2594 = vrot.lane.b32.xlu1 %v2501_v35, %s3874_s4 }
 0x255   : > { %2596 = vrot.lane.b32.xlu0 %v2502_v51, %s3874_s4  ;;  %v3788_v51 = vld [vmem:[%s4133_s28 + $0x40] sm:$0xff] }
 0x256   : > { %v2448_v0 = vmul.f32 %v3788_v51, %v5878_v26 }
 0x258   : > { %2598 = vrot.lane.b32.xlu1 %v2503_v54, %s3874_s4  ;;  %v3790_v54 = vld [vmem:[%s4133_s28 + $0x50] sm:$0xff] }
 0x259   : > { %v2450_v3 = vmul.f32 %v3790_v54, %v5892_v60  ;;  %v3803_v54 = vld [vmem:[%s4133_s28 + $0xb8] sm:$0xff] }
 0x28b   : > { %v2539_v28 = vpop.permute.xlu0 %2538 }
 0x28c   : > { %v2633_v7 = vsel %vm540_vm0, %v2441_v22, %v2539_v28 }
 0x28d   : > { %2665 = vst [vmem:[%s6023_s6 + $0x8] sm:$0xff] %v2633_v7  ;;  %v3791_v7 = vld [vmem:[%s4133_s28 + $0x58] sm:$0xff] }
 0x28e   : > { %v2543_v52 = vpop.permute.xlu1 %2542  ;;  %v2451_v42 = vmul.f32 %v3791_v7, %v5898_v39 }
 0x28f   : > { %v2635_v62 = vsel %vm540_vm0, %v2443_v55, %v2543_v52  ;;  %v2537_v61 = vpop.permute.xlu0 %2536  ;;  %v3792_v55 = vld [vmem:[%s4133_s28 + $0x60] sm:$0xff] }
 0x290   : > { %2667 = vst [vmem:[%s6023_s6 + $0x18] sm:$0xff] %v2635_v62  ;;  %v2632_v34 = vsel %vm540_vm0, %v2440_v4, %v2537_v61  ;;  %v2452_v52 = vmul.f32 %v3792_v55, %v5902_v59  ;;  %v3793_v62 = vld [vmem:[%s4133_s28 + $0x68] sm:$0xff]  ;;  %v3806_v55 = vld [vmem:[%s4133_s28 + $0xd0] sm:$0xff] }
 0x291   : > { %2664 = vst [vmem:[%s6023_s6] sm:$0xff] %v2632_v34  ;;  %v2453_v61 = vmul.f32 %v3793_v62, %v5905_v53  ;;  %v3794_v34 = vld [vmem:[%s4133_s28 + $0x70] sm:$0xff] }
 0x292   : > { %v2541_v24 = vpop.permute.xlu1 %2540  ;;  %v2454_v30 = vmul.f32 %v3794_v34, %v5914_v56 }
 0x293   : > { %v2634_v33 = vsel %vm540_vm0, %v2442_v2, %v2541_v24  ;;  %v2545_v19 = vpop.permute.xlu0 %2544 }
 0x294   : > { %2666 = vst [vmem:[%s6023_s6 + $0x10] sm:$0xff] %v2634_v33  ;;  %v2636_v29 = vsel %vm540_vm0, %v2444_v50, %v2545_v19  ;;  %v2455_v50 = vmul.f32 %v3795_v44, %v5921_v11  ;;  %v3796_v33 = vld [vmem:[%s4133_s28 + $0x80] sm:$0xff] }
 0x295   : > { %2668 = vst [vmem:[%s6023_s6 + $0x20] sm:$0xff] %v2636_v29  ;;  %v2456_v19 = vmul.f32 %v3796_v33, %v5928_v10  ;;  %v3811_v33 = vld [vmem:[%s4133_s28 + $0xf8] sm:$0xff] }
 0x296   : > { %v2547_v48 = vpop.permute.xlu1 %2546 }
 0x297   : > { %v2637_v46 = vsel %vm540_vm0, %v2445_v23, %v2547_v48  ;;  %v2549_v49 = vpop.permute.xlu0 %2548  ;;  %v3797_v23 = vld [vmem:[%s4133_s28 + $0x88] sm:$0xff] }
 0x298   : > { %2669 = vst [vmem:[%s6023_s6 + $0x28] sm:$0xff] %v2637_v46  ;;  %v2638_v8 = vsel %vm540_vm0, %v2446_v31, %v2549_v49  ;;  %v2457_v48 = vmul.f32 %v3797_v23, %v5931_v27  ;;  %v2458_v31 = vmul.f32 %v3798_v57, %v5937_v12 }
 0x299   : > { %2670 = vst [vmem:[%s6023_s6 + $0x30] sm:$0xff] %v2638_v8  ;;  %v3799_v8 = vld [vmem:[%s4133_s28 + $0x98] sm:$0xff] }
 0x29a   : > { %v2551_v18 = vpop.permute.xlu1 %2550  ;;  %v2459_v1 = vmul.f32 %v3799_v8, %v5940_v37 }
 0x29b   : > { %v2639_v63 = vsel %vm540_vm0, %v2447_v5, %v2551_v18  ;;  %v2553_v35 = vpop.permute.xlu0 %2552  ;;  %v3800_v5 = vld [vmem:[%s4133_s28 + $0xa0] sm:$0xff] }
 0x29c   : > { %2671 = vst [vmem:[%s6023_s6 + $0x38] sm:$0xff] %v2639_v63  ;;  %v2640_v58 = vsel %vm540_vm0, %v2448_v0, %v2553_v35  ;;  %v2460_v18 = vmul.f32 %v3800_v5, %v5944_v21  ;;  %v3801_v63 = vld [vmem:[%s4133_s28 + $0xa8] sm:$0xff] }
 0x29d   : > { %2672 = vst [vmem:[%s6023_s6 + $0x40] sm:$0xff] %v2640_v58  ;;  %v2461_v35 = vmul.f32 %v3801_v63, %v5948_v47  ;;  %v3802_v58 = vld [vmem:[%s4133_s28 + $0xb0] sm:$0xff] }
 0x29e   : > { %v2555_v13 = vpop.permute.xlu1 %2554  ;;  %v2462_v45 = vmul.f32 %v3802_v58, %v5951_v16 }
 0x29f   : > { %v2641_v26 = vsel %vm540_vm0, %v2449_v14, %v2555_v13  ;;  %v2557_v22 = vpop.permute.xlu0 %2556 }
 0x2a0   : > { %2673 = vst [vmem:[%s6023_s6 + $0x48] sm:$0xff] %v2641_v26  ;;  %v2642_v28 = vsel %vm540_vm0, %v2450_v3, %v2557_v22  ;;  %v2463_v3 = vmul.f32 %v3803_v54, %v5957_v17  ;;  %v3804_v26 = vld [vmem:[%s4133_s28 + $0xc0] sm:$0xff] }
 0x2a1   : > { %2674 = vst [vmem:[%s6023_s6 + $0x50] sm:$0xff] %v2642_v28  ;;  %v2464_v22 = vmul.f32 %v3804_v26, %v5960_v38 }
 0x2a2   : > { %v2559_v15 = vpop.permute.xlu1 %2558 }
 0x2a3   : > { %v2643_v60 = vsel %vm540_vm0, %v2451_v42, %v2559_v15  ;;  %v2561_v40 = vpop.permute.xlu0 %2560  ;;  %v3805_v42 = vld [vmem:[%s4133_s28 + $0xc8] sm:$0xff] }
 0x2a4   : > { %2675 = vst [vmem:[%s6023_s6 + $0x58] sm:$0xff] %v2643_v60  ;;  %v2644_v4 = vsel %vm540_vm0, %v2452_v52, %v2561_v40  ;;  %v2465_v15 = vmul.f32 %v3805_v42, %v5963_v6  ;;  %v2466_v52 = vmul.f32 %v3806_v55, %v5968_v32 }
 0x2a5   : > { %2676 = vst [vmem:[%s6023_s6 + $0x60] sm:$0xff] %v2644_v4  ;;  %v3807_v4 = vld [vmem:[%s4133_s28 + $0xd8] sm:$0xff] }
 0x2a6   : > { %v2563_v39 = vpop.permute.xlu1 %2562  ;;  %v2467_v6 = vmul.f32 %v3807_v4, %v5971_v41  ;;  %v3810_v41 = vld [vmem:[%s4133_s28 + $0xf0] sm:$0xff] }
 0x2a7   : > { %v2645_v59 = vsel %vm540_vm0, %v2453_v61, %v2563_v39  ;;  %v2565_v2 = vpop.permute.xlu0 %2564  ;;  %v3808_v61 = vld [vmem:[%s4133_s28 + $0xe0] sm:$0xff]  ;;  %v2470_v44 = vmul.f32 %v3810_v41, %v5981_v25 }
 0x2a8   : > { %2677 = vst [vmem:[%s6023_s6 + $0x68] sm:$0xff] %v2645_v59  ;;  %v2646_v24 = vsel %vm540_vm0, %v2454_v30, %v2565_v2  ;;  %v2468_v39 = vmul.f32 %v3808_v61, %v5974_v20  ;;  %v3809_v59 = vld [vmem:[%s4133_s28 + $0xe8] sm:$0xff]  ;;  %s3875_s28 = smov [#allocation3]  }
 0x2a9   : > { %2678 = vst [vmem:[%s6023_s6 + $0x70] sm:$0xff] %v2646_v24  ;;  %v2469_v2 = vmul.f32 %v3809_v59, %v5978_v9  ;;  %v2471_v9 = vmul.f32 %v3811_v33, %v5987_v36  ;;  %s3816_s19 = sshll.u32 %s3875_s28, 4  ;;  %s3817_s19 = int_to_ptr.vmem [resolvable:$false] %s3816_s19 }
 0x2aa   : > { %v2567_v53 = vpop.permute.xlu1 %2566  ;;  %s3818_s20 = scalar_lea.vmem %s3817_s19, 8192  ;;  %p3819_p2 = scmp.lt.s32.totalorder %s6156_s8, %s3817_s19 }
 0x2ab   : > { %v2647_v56 = vsel %vm540_vm0, %v2455_v50, %v2567_v53  ;;  %v2569_v29 = vpop.permute.xlu0 %2568  ;;  %p3820_p3 = scmp.lt.s32.totalorder %s3818_s20, %s3812_s17 }
 0x2ac   : > { %2679 = vst [vmem:[%s6023_s6 + $0x78] sm:$0xff] %v2647_v56  ;;  %v2648_v43 = vsel %vm540_vm0, %v2456_v19, %v2569_v29 }
 0x2ad   : > { %2680 = vst [vmem:[%s6023_s6 + $0x80] sm:$0xff] %v2648_v43  ;;  %p3821_p4 = por %p3820_p3, %p3819_p2 }
 0x2ae   : > { %v2571_v11 = vpop.permute.xlu1 %2570 }
 0x2af   : > { %v2649_v10 = vsel %vm540_vm0, %v2457_v48, %v2571_v11  ;;  %v2573_v46 = vpop.permute.xlu0 %2572  ;;  %p3822_p5 = pnand %p3821_p4, %p3815_p1 }
 0x2b0   : > { %2681 = vst [vmem:[%s6023_s6 + $0x88] sm:$0xff] %v2649_v10  ;;  %v2650_v49 = vsel %vm540_vm0, %v2458_v31, %v2573_v46 }
 0x2b1   : > { %2682 = vst [vmem:[%s6023_s6 + $0x90] sm:$0xff] %v2650_v49 }
 0x2b2   : > { %v2575_v27 = vpop.permute.xlu1 %2574 }
 0x2b3   : > { %v2651_v12 = vsel %vm540_vm0, %v2459_v1, %v2575_v27  ;;  %v2577_v51 = vpop.permute.xlu0 %2576 }
 0x2b4   : > { %2683 = vst [vmem:[%s6023_s6 + $0x98] sm:$0xff] %v2651_v12  ;;  %v2652_v0 = vsel %vm540_vm0, %v2460_v18, %v2577_v51 }
 0x2b5   : > { %2684 = vst [vmem:[%s6023_s6 + $0xa0] sm:$0xff] %v2652_v0 }
 0x2b6   : > { %v2579_v37 = vpop.permute.xlu1 %2578 }
 0x2b7   : > { %v2653_v21 = vsel %vm540_vm0, %v2461_v35, %v2579_v37  ;;  %v2581_v14 = vpop.permute.xlu0 %2580 }
 0x2b8   : > { %2685 = vst [vmem:[%s6023_s6 + $0xa8] sm:$0xff] %v2653_v21  ;;  %v2654_v13 = vsel %vm540_vm0, %v2462_v45, %v2581_v14 }
 0x2b9   : > { %2686 = vst [vmem:[%s6023_s6 + $0xb0] sm:$0xff] %v2654_v13 }
 0x2ba   : > { %v2583_v47 = vpop.permute.xlu1 %2582 }
 0x2bb   : > { %v2655_v16 = vsel %vm540_vm0, %v2463_v3, %v2583_v47  ;;  %v2585_v28 = vpop.permute.xlu0 %2584 }
 0x2bc   : > { %2687 = vst [vmem:[%s6023_s6 + $0xb8] sm:$0xff] %v2655_v16  ;;  %v2656_v7 = vsel %vm540_vm0, %v2464_v22, %v2585_v28 }
 0x2bd   : > { %2688 = vst [vmem:[%s6023_s6 + $0xc0] sm:$0xff] %v2656_v7 }
 0x2be   : > { %v2587_v17 = vpop.permute.xlu1 %2586 }
 0x2bf   : > { %v2657_v38 = vsel %vm540_vm0, %v2465_v15, %v2587_v17  ;;  %v2589_v60 = vpop.permute.xlu0 %2588 }
 0x2c0   : > { %2689 = vst [vmem:[%s6023_s6 + $0xc8] sm:$0xff] %v2657_v38  ;;  %v2658_v40 = vsel %vm540_vm0, %v2466_v52, %v2589_v60 }
 0x2c1   : > { %2690 = vst [vmem:[%s6023_s6 + $0xd0] sm:$0xff] %v2658_v40 }
 0x2c2   : > { %v2591_v62 = vpop.permute.xlu1 %2590 }
 0x2c3   : > { %v2659_v32 = vsel %vm540_vm0, %v2467_v6, %v2591_v62  ;;  %v2593_v34 = vpop.permute.xlu0 %2592 }
 0x2c4   : > { %2691 = vst [vmem:[%s6023_s6 + $0xd8] sm:$0xff] %v2659_v32  ;;  %v2660_v30 = vsel %vm540_vm0, %v2468_v39, %v2593_v34 }
 0x2c5   : > { %2692 = vst [vmem:[%s6023_s6 + $0xe0] sm:$0xff] %v2660_v30 }
 0x2c6   : > { %v2595_v24 = vpop.permute.xlu1 %2594 }
 0x2c7   : > { %v2661_v20 = vsel %vm540_vm0, %v2469_v2, %v2595_v24  ;;  %v2597_v50 = vpop.permute.xlu0 %2596 }
 0x2c8   : > { %2693 = vst [vmem:[%s6023_s6 + $0xe8] sm:$0xff] %v2661_v20  ;;  %v2662_v53 = vsel %vm540_vm0, %v2470_v44, %v2597_v50 }
 0x2c9   : > { %2694 = vst [vmem:[%s6023_s6 + $0xf0] sm:$0xff] %v2662_v53 }
 0x2ca   : > { %v2599_v25 = vpop.permute.xlu1 %2598 }
 0x2cb   : > { %v2663_v19 = vsel %vm540_vm0, %v2471_v9, %v2599_v25 }
 0x2cc   : > { %2695 = vst [vmem:[%s6023_s6 + $0xf8] sm:$0xff] %v2663_v19 }
 0x2cd   : > { %3825 = shalt.err (!%p3822_p5)
}
 0x2ce   : > { %s3826_s24 = scalar_lea.hbm %s6154_s11, 4096  ;;  %s3830_s29 = scalar_lea.hbm %s6203_s3, 16384 }
 0x2cf   : > { %p3827_p7 = scmp.ne.s32.totalorder %s6154_s11, %s3826_s24  ;;  %p3831_p11 = scmp.lt.s32.totalorder %s6154_s11, %s6203_s3 }
 0x2d0   : > { %p3832_p12 = scmp.lt.s32.totalorder %s3830_s29, %s3826_s24 }
 0x2d1   : > { %p3828_p9 = pnand %p3827_p7, %p3936_p6 }
 0x2d2   : > { %p3833_p13 = por %p3832_p12, %p3831_p11 }
 0x2d3   : > { %p3829_p10 = pneg %p3828_p9 }
 0x2d5   : > { %p3834_p0 = pnand %p3833_p13, %p3829_p10 }
 0x2d7   : > { %3837 = shalt.err (!%p3834_p0)
}
 0x2d8   : > { %s3876_s5 = smov 128   ;;  %s3877_s6 = smov 8  }
 0x2d9   : > { %3386 = dma.vmem_to_hbm [thread:$0]  (%p3936_p6), %s6156_s8, 4096, %s6154_s11, %s2697_s16, %s3876_s5, %s3876_s5, %s3877_s6  }
 0x2da PF: > { %p3392_p1 = scmp.ge.s32.totalorder %s3872_s15, 2  ;;  %s2725_s7 = sand.u32 1, %s3860_s12  }
 0x2db   : > { %s2726_s9 = scalar_lea.sflag [#allocation4], %s2725_s7 }
 0x2dc   : > { %p3389_p2 = pnand %p3392_p1, %p3940_p8 }
 0x2de   : > { %p3390_p3 = pneg %p3389_p2 }
 0x2e0   : > { %3855 = dma.done.wait (%p3390_p3), %s2726_s9, 4096  }
 0x2e1   : > { %3857 = vsyncadd (%p3390_p3), %s2726_s9, 4294963200  ;;  %p13_p4 = scmp.ge.s32.totalorder %s3921_s18, 6   ;;  %s6395_s12 = smov %s3864_s13 }
 0x2e2   : > { %s6396_s13 = smov %s3868_s14  ;;  %s6397_s14 = smov %s3934_s21 }
 0x2e3   : > { %s6398_s15 = smov %s3921_s18  ;;  %15 = sbr.rel (!%p13_p4) target bundleno = 3 (0x3), region = 111 }
 0x2e8   :  { %2731 = vsyncpa [#allocation4], 1 }
 0x2e9   :  { %2733 = vsyncpa [#allocation4 + $0x1], 1 }

</bundles_post_ra>
